<compile_context>
chip_gen: v7x
topology: tpu7x:2x2x1
jax: 0.10.0
libtpu: 0.0.40
codegen_flags: <defaults>
</compile_context>

<pallas_src>
import functools

import jax
import jax.numpy as jnp
from jax import lax
from jax.experimental import pallas as pl
from jax.experimental.pallas import tpu as pltpu

_VMEM_LIMIT = 32 * 1024 * 1024


def _parallel(n_axes):
    return pltpu.CompilerParams(
        dimension_semantics=("parallel",) * n_axes,
        vmem_limit_bytes=_VMEM_LIMIT,
    )


def _pick_row_tile(m, target=1024):
    # Largest tile (<= target) that divides m AND leaves >= 2 grid steps, so a
    # v7x chip can shard the parallel axis over both TensorCores.
    for t in (target, 512, 256, 128, 64, 32, 16, 8):
        if t <= m and m % t == 0 and m // t >= 2:
            return t
    return m


# ----------------------------------------------------------------------------
# Pallas kernels
# ----------------------------------------------------------------------------
def _matmul_bias_kernel(x_ref, w_ref, b_ref, o_ref):
    # o = x @ w + b   (row-tiled; bf16 MXU operands, f32 accumulation)
    x = x_ref[...].astype(w_ref.dtype)
    o_ref[...] = (
        jnp.dot(x, w_ref[...], preferred_element_type=jnp.float32) + b_ref[...]
    )


def _tail_kernel(c1_ref, up_ref, x_ref, wf_ref, bf_ref, w4_ref, b4_ref, o_ref):
    # cf = c1_ @ wf + bf ; c4 = (up + cf) @ w4 + b4 ; out = x * sigmoid(c4)
    cf = (jnp.dot(c1_ref[...].astype(wf_ref.dtype), wf_ref[...],
                  preferred_element_type=jnp.float32) + bf_ref[...])
    s = (up_ref[...] + cf).astype(w4_ref.dtype)
    c4 = (jnp.dot(s, w4_ref[...], preferred_element_type=jnp.float32)
          + b4_ref[...])
    m = pl.reciprocal(1.0 + jnp.exp(-c4), approx=True)   # exp + rcp on EUP
    o_ref[...] = x_ref[...] * m                           # gate stays f32


def _small_branch_kernel(xe_ref, xo_ref, w2_ref, b2_ref, w3_ref, b3_ref,
                         awk_ref, ah_ref, o_ref,
                         col2_scr, c2_scr, pool_scr, col3_scr, c3_scr,
                         *, Ho2, Wo2, Hp, Wp, f):
    """Fused conv2(3x3,s2) -> max_pool(7,3) -> conv3(3x3,p1) -> bilinear up."""
    # ---- conv2: one K=9f im2col matmul per output row. xe/xo hold even/odd
    #      input columns so every read below is a contiguous slice.
    def conv2_row(oy, carry):
        for ky in range(3):
            iy = 2 * oy + ky
            t0 = 3 * ky
            col2_scr[:, (t0 + 0) * f:(t0 + 1) * f] = xe_ref[0, iy, pl.ds(0, Wo2), :]
            col2_scr[:, (t0 + 1) * f:(t0 + 2) * f] = xo_ref[0, iy, pl.ds(0, Wo2), :]
            col2_scr[:, (t0 + 2) * f:(t0 + 3) * f] = xe_ref[0, iy, pl.ds(1, Wo2), :]
        row = jnp.dot(col2_scr[...], w2_ref[...],
                      preferred_element_type=jnp.float32) + b2_ref[...]
        c2_scr[oy, :, :] = row
        return carry

    lax.fori_loop(0, Ho2, conv2_row, 0)

    # ---- max_pool2d 7x7 stride 3 (VALID): row-slab max then per-window
    #      column max, written into the interior of a zero-padded map.
    pool_scr[...] = jnp.zeros(pool_scr.shape, pool_scr.dtype)

    def pool_row(py, carry):
        rowmax = jnp.max(c2_scr[pl.ds(3 * py, 7), :, :], axis=0)   # (Wo2, f)
        # TODO(synk): for large pooled widths, replace this static unroll with
        # a strided-slab max (pl.ds(..., stride=3)) over the whole row.
        for px in range(Wp):
            win = rowmax[3 * px:3 * px + 7, :]
            pool_scr[py + 1, pl.ds(px + 1, 1), :] = jnp.max(
                win, axis=0, keepdims=True)
        return carry

    lax.fori_loop(0, Hp, pool_row, 0)

    # ---- conv3 (3x3, stride 1, pad 1): per output column, one K=9f im2col
    #      matmul; the results land directly in a lane-dense (Hp, Wp*f) slab.
    for px in range(Wp):
        for ky in range(3):
            for kx in range(3):
                t = 3 * ky + kx
                col3_scr[:, t * f:(t + 1) * f] = pool_scr[pl.ds(ky, Hp), px + kx, :]
        ccol = jnp.dot(col3_scr[...], w3_ref[...],
                       preferred_element_type=jnp.float32) + b3_ref[...]
        c3_scr[:, px * f:(px + 1) * f] = ccol

    # ---- separable bilinear upsample: W axis via kron(Aw^T, I_f) (tiny),
    #      then H axis; the (H, W*f) output store is lane-dense.
    t_slab = jnp.dot(c3_scr[...], awk_ref[...],
                     preferred_element_type=jnp.float32)            # (Hp, W*f)
    o_ref[0] = jnp.dot(ah_ref[...], t_slab,
                       preferred_element_type=jnp.float32)          # (H, W*f)


# ----------------------------------------------------------------------------
# Pallas wrappers
# ----------------------------------------------------------------------------
def conv1x1(x2d, w_bd, b_row):
    """x2d:(M,K) @ w:(K,N) + b:(1,N), row-tiled parallel grid (w is bf16)."""
    M, K = x2d.shape
    Nc = w_bd.shape[1]
    TM = _pick_row_tile(M)
    return pl.pallas_call(
        _matmul_bias_kernel,
        out_shape=jax.ShapeDtypeStruct((M, Nc), jnp.float32),
        grid=(M // TM,),
        in_specs=[
            pl.BlockSpec((TM, K), lambda i: (i, 0)),
            pl.BlockSpec((K, Nc), lambda i: (0, 0)),
            pl.BlockSpec((1, Nc), lambda i: (0, 0)),
        ],
        out_specs=pl.BlockSpec((TM, Nc), lambda i: (i, 0)),
        compiler_params=_parallel(1),
    )(x2d, w_bd, b_row)


def _bilinear_matrix(in_size, out_size):
    """Row-stochastic matrix A (out,in): PyTorch bilinear, align_corners=False."""
    scale = in_size / out_size
    dst = jnp.arange(out_size, dtype=jnp.float32)
    src = (dst + 0.5) * scale - 0.5
    src = jnp.maximum(src, 0.0)
    i0 = jnp.minimum(jnp.floor(src).astype(jnp.int32), in_size - 1)
    i1 = jnp.minimum(i0 + 1, in_size - 1)
    w1 = src - i0.astype(jnp.float32)
    w0 = 1.0 - w1
    rows = jnp.arange(out_size)
    A = jnp.zeros((out_size, in_size), jnp.float32)
    A = A.at[rows, i0].add(w0)
    A = A.at[rows, i1].add(w1)
    return A


def small_branch(c1_img, w2_flat, b2_row, w3_flat, b3_row, H, W, f):
    """Fused conv2 -> max_pool -> conv3 -> bilinear upsample.

    Returns the up-sampled attention features as a lane-dense (N, H, W*f) slab.
    """
    N = c1_img.shape[0]
    Ho2 = (H - 3) // 2 + 1
    Wo2 = (W - 3) // 2 + 1
    Hp = (Ho2 - 7) // 3 + 1
    Wp = (Wo2 - 7) // 3 + 1

    # Even/odd column split (glue-level, tiny) so the stride-2 conv reads only
    # contiguous slices inside the kernel -- no strided loads, no sel matmul.
    xe = c1_img[:, :, 0::2, :]
    xo = c1_img[:, :, 1::2, :]
    We, Wod = xe.shape[2], xo.shape[2]

    Ah = _bilinear_matrix(Hp, H)                            # (H, Hp)
    Aw = _bilinear_matrix(Wp, W)                            # (W, Wp)
    awk = jnp.kron(Aw.T, jnp.eye(f, dtype=jnp.float32))     # (Wp*f, W*f), tiny

    kern = functools.partial(_small_branch_kernel,
                             Ho2=Ho2, Wo2=Wo2, Hp=Hp, Wp=Wp, f=f)
    # TODO(synk): for large H*W (v7x has 64 MiB VMEM), grid this kernel over
    # row tiles with a 2-row halo instead of one whole image per grid step.
    return pl.pallas_call(
        kern,
        out_shape=jax.ShapeDtypeStruct((N, H, W * f), jnp.float32),
        grid=(N,),
        in_specs=[
            pl.BlockSpec((1, H, We, f), lambda n: (n, 0, 0, 0)),
            pl.BlockSpec((1, H, Wod, f), lambda n: (n, 0, 0, 0)),
            pl.BlockSpec((9 * f, f), lambda n: (0, 0)),
            pl.BlockSpec((1, f), lambda n: (0, 0)),
            pl.BlockSpec((9 * f, f), lambda n: (0, 0)),
            pl.BlockSpec((1, f), lambda n: (0, 0)),
            pl.BlockSpec((Wp * f, W * f), lambda n: (0, 0)),
            pl.BlockSpec((H, Hp), lambda n: (0, 0)),
        ],
        out_specs=pl.BlockSpec((1, H, W * f), lambda n: (n, 0, 0)),
        scratch_shapes=[
            pltpu.VMEM((Wo2, 9 * f), jnp.float32),          # conv2 im2col slab
            pltpu.VMEM((Ho2, Wo2, f), jnp.float32),         # conv2 output
            pltpu.VMEM((Hp + 2, Wp + 2, f), jnp.float32),   # zero-padded pool
            pltpu.VMEM((Hp, 9 * f), jnp.float32),           # conv3 im2col slab
            pltpu.VMEM((Hp, Wp * f), jnp.float32),          # c3 lane-dense slab
        ],
        compiler_params=_parallel(1),
    )(xe, xo, w2_flat, b2_row, w3_flat, b3_row, awk, Ah)


def esa_tail(c1_p, up_p, x_p, wf_bd, bf_row, w4_bd, b4_row):
    """Fused conv_f + add + conv4 + sigmoid + gate, row-tiled parallel grid."""
    M, Kf = c1_p.shape
    Kc = x_p.shape[1]
    TM = _pick_row_tile(M)
    return pl.pallas_call(
        _tail_kernel,
        out_shape=jax.ShapeDtypeStruct((M, Kc), jnp.float32),
        grid=(M // TM,),
        in_specs=[
            pl.BlockSpec((TM, Kf), lambda i: (i, 0)),
            pl.BlockSpec((TM, Kf), lambda i: (i, 0)),
            pl.BlockSpec((TM, Kc), lambda i: (i, 0)),
            pl.BlockSpec((Kf, Kf), lambda i: (0, 0)),
            pl.BlockSpec((1, Kf), lambda i: (0, 0)),
            pl.BlockSpec((Kf, Kc), lambda i: (0, 0)),
            pl.BlockSpec((1, Kc), lambda i: (0, 0)),
        ],
        out_specs=pl.BlockSpec((TM, Kc), lambda i: (i, 0)),
        compiler_params=_parallel(1),
    )(c1_p, up_p, x_p, wf_bd, bf_row, w4_bd, b4_row)


# ----------------------------------------------------------------------------
# Glue: pixel packing (lane density) and parameter setup
# ----------------------------------------------------------------------------
def _block_diag(w, g):
    # (Cin, Cout) -> block-diagonal (g*Cin, g*Cout) so g packed pixels share
    # one lane-dense matmul.
    return jnp.kron(jnp.eye(g, dtype=w.dtype), w)


def _tile_bias(b, g):
    return jnp.tile(b.reshape(1, -1), (1, g))


def init_params(key, n_feats, f=16):
    ks = jax.random.split(key, 10)
    w = lambda k, s: jax.random.normal(k, s, jnp.float32) * 0.1
    return {
        "w1": w(ks[0], (1, 1, n_feats, f)), "b1": w(ks[1], (f,)) * 0.1,
        "wf": w(ks[2], (1, 1, f, f)),       "bf": w(ks[3], (f,)) * 0.1,
        "w2": w(ks[4], (3, 3, f, f)),       "b2": w(ks[5], (f,)) * 0.1,
        "w3": w(ks[6], (3, 3, f, f)),       "b3": w(ks[7], (f,)) * 0.1,
        "w4": w(ks[8], (1, 1, f, n_feats)), "b4": w(ks[9], (n_feats,)) * 0.1,
    }


# ----------------------------------------------------------------------------
# ESA forward (Pallas path)
# ----------------------------------------------------------------------------
def esa_forward(x_nchw, params):
    N, C, H, W = x_nchw.shape
    f = params["b1"].shape[0]
    M = N * H * W
    G = next(g for g in (8, 4, 2, 1) if M % g == 0)   # pixels packed per row
    # TODO(synk): on v7x consider G=16 (256 output lanes / K=512) when M%16==0.

    x_nhwc = jnp.transpose(x_nchw, (0, 2, 3, 1))
    x_pack = x_nhwc.reshape(M // G, G * C)            # lane-dense packed view
    # TODO(synk): an NCHW per-batch (C, H*W) formulation would remove the two
    # full-tensor transposes and the block-diagonal packing entirely.

    # conv1: 1x1 (n_feats -> f), block-diagonal bf16 weights on packed rows.
    w1_bd = _block_diag(params["w1"].reshape(C, f), G).astype(jnp.bfloat16)
    b1_bd = _tile_bias(params["b1"], G)
    c1_pack = conv1x1(x_pack, w1_bd, b1_bd)           # (M//G, G*f) f32
    c1_img = c1_pack.reshape(N, H, W, f)              # free contiguous view

    # conv2 -> max_pool -> conv3 -> bilinear upsample: ONE fused kernel.
    up = small_branch(c1_img,
                      params["w2"].reshape(9 * f, f), params["b2"].reshape(1, f),
                      params["w3"].reshape(9 * f, f), params["b3"].reshape(1, f),
                      H, W, f)                        # (N, H, W*f)
    up_pack = up.reshape(M // G, G * f)               # free contiguous view

    # conv_f + conv4 + sigmoid + gate, fused in one kernel (bf16 MXU operands).
    wf_bd = _block_diag(params["wf"].reshape(f, f), G).astype(jnp.bfloat16)
    bf_bd = _tile_bias(params["bf"], G)
    w4_bd = _block_diag(params["w4"].reshape(f, C), G).astype(jnp.bfloat16)
    b4_bd = _tile_bias(params["b4"], G)
    out_pack = esa_tail(c1_pack, up_pack, x_pack, wf_bd, bf_bd, w4_bd, b4_bd)

    out_nhwc = out_pack.reshape(N, H, W, C)
    return jnp.transpose(out_nhwc, (0, 3, 1, 2))      # back to NCHW


# ----------------------------------------------------------------------------
# Pure-JAX reference (no Pallas) for correctness check
# ----------------------------------------------------------------------------
def _im2col(x, ksize, stride):
    """x: (N,H,W,C) -> (N,Ho,Wo, ksize*ksize*C), tap order (ky, kx, c)."""
    N, H, W, C = x.shape
    Ho = (H - ksize) // stride + 1
    Wo = (W - ksize) // stride + 1
    cols = []
    for ky in range(ksize):
        for kx in range(ksize):
            sl = lax.slice(
                x,
                (0, ky, kx, 0),
                (N, ky + (Ho - 1) * stride + 1, kx + (Wo - 1) * stride + 1, C),
                (1, stride, stride, 1),
            )
            cols.append(sl)
    patches = jnp.stack(cols, axis=3)
    return patches.reshape(N, Ho, Wo, ksize * ksize * C)


def esa_reference(x_nchw, params):
    N, C, H, W = x_nchw.shape
    f = params["b1"].shape[0]
    x = jnp.transpose(x_nchw, (0, 2, 3, 1))
    c1_ = x @ params["w1"].reshape(C, f) + params["b1"]
    p2 = _im2col(c1_, 3, 2)
    c1 = p2 @ params["w2"].reshape(9 * f, f) + params["b2"]
    v = lax.reduce_window(c1, -jnp.inf, lax.max, (1, 7, 7, 1), (1, 3, 3, 1), "VALID")
    p3 = _im2col(jnp.pad(v, ((0, 0), (1, 1), (1, 1), (0, 0))), 3, 1)
    c3 = p3 @ params["w3"].reshape(9 * f, f) + params["b3"]
    Ah = _bilinear_matrix(c3.shape[1], H)
    Aw = _bilinear_matrix(c3.shape[2], W)
    up = jnp.einsum("Ii,nijc,Jj->nIJc", Ah, c3, Aw)
    cf = c1_ @ params["wf"].reshape(f, f) + params["bf"]
    c4 = (up + cf) @ params["w4"].reshape(f, C) + params["b4"]
    m = jax.nn.sigmoid(c4)
    return jnp.transpose(x * m, (0, 3, 1, 2))


# ----------------------------------------------------------------------------
if __name__ == "__main__":
    key = jax.random.PRNGKey(0)
    k_x, k_p = jax.random.split(key)

    n_feats = 32
    N, H, W = 2, 32, 32

    x = jax.random.normal(k_x, (N, n_feats, H, W), jnp.float32)
    params = init_params(k_p, n_feats)

    fwd = jax.jit(esa_forward)
    out = jax.block_until_ready(fwd(x, params))

    ref = jax.block_until_ready(esa_reference(x, params))
    err = float(jnp.max(jnp.abs(out - ref)))
    assert out.shape == x.shape and out.dtype == x.dtype
    assert err < 5e-2, f"mismatch vs pure-JAX reference: max abs err = {err}"

    print("KERNEL_OK")
</pallas_src>

<mosaic_0001>
module attributes {stable_mosaic.version = 11 : i64} {
  func.func private @main(%arg0: i32) attributes {dimension_semantics = [#tpu.dimension_semantics<core_parallel>], iteration_bounds = array<i64: 2>, tpu.core_type = #tpu.core_type<sc_scalar_subcore>, window_params = []} {
    return
  }
}

module attributes {stable_mosaic.version = 11 : i64} {
  func.func private @main(%arg0: i32) attributes {dimension_semantics = [#tpu.dimension_semantics<core_parallel>], iteration_bounds = array<i64: 2>, tpu.core_type = #tpu.core_type<sc_scalar_subcore>, window_params = []} {
    return
  }
}

module attributes {stable_mosaic.version = 11 : i64} {
  func.func @_matmul_bias_kernel(%arg0: i32, %arg1: memref<128x256xf32, #tpu.memory_space<vmem>>, %arg2: memref<256x128xbf16, #tpu.memory_space<vmem>>, %arg3: memref<1x128xf32, #tpu.memory_space<vmem>>, %arg4: memref<128x128xf32, #tpu.memory_space<vmem>>) attributes {dimension_semantics = [#tpu.dimension_semantics<parallel>], iteration_bounds = array<i64: 2>, scalar_prefetch = 0 : i64, scratch_operands = 0 : i64, tpu.core_type = #tpu.core_type<tc>, window_params = [{transform_indices = @transform_0, window_bounds = array<i64: 128, 256>}, {pipeline_mode = #tpu.pipeline_mode<synchronous>, transform_indices = @transform_1, window_bounds = array<i64: 256, 128>}, {pipeline_mode = #tpu.pipeline_mode<synchronous>, transform_indices = @transform_2, window_bounds = array<i64: 1, 128>}, {transform_indices = @transform_3, window_bounds = array<i64: 128, 128>}]} {
    %c0 = arith.constant 0 : index
    %c0_0 = arith.constant 0 : index
    %0 = vector.load %arg1[%c0, %c0_0] : memref<128x256xf32, #tpu.memory_space<vmem>>, vector<128x256xf32>
    %1 = arith.truncf %0 : vector<128x256xf32> to vector<128x256xbf16>
    %c0_1 = arith.constant 0 : index
    %c0_2 = arith.constant 0 : index
    %2 = vector.load %arg2[%c0_1, %c0_2] : memref<256x128xbf16, #tpu.memory_space<vmem>>, vector<256x128xbf16>
    %cst = arith.constant dense<0.000000e+00> : vector<128x128xf32>
    %3 = tpu.matmul %1, %2, %cst {dimension_numbers = #tpu.dot_dimension_numbers<[1], [0], [0], [1], [0, 0, 1, 1], [], []>} : vector<128x256xbf16>, vector<256x128xbf16>, vector<128x128xf32> -> vector<128x128xf32>
    %c0_3 = arith.constant 0 : index
    %c0_4 = arith.constant 0 : index
    %4 = vector.load %arg3[%c0_3, %c0_4] : memref<1x128xf32, #tpu.memory_space<vmem>>, vector<1x128xf32>
    %5 = vector.broadcast %4 : vector<1x128xf32> to vector<128x128xf32>
    %6 = arith.addf %3, %5 : vector<128x128xf32>
    %c0_5 = arith.constant 0 : index
    %c0_6 = arith.constant 0 : index
    %7 = vector.load %arg4[%c0_5, %c0_6] : memref<128x128xf32, #tpu.memory_space<vmem>>, vector<128x128xf32>
    tpu.vector_store %arg4[%c0_5, %c0_6], %6 {strides = array<i32>} : memref<128x128xf32, #tpu.memory_space<vmem>>, vector<128x128xf32>,
    return
  }
  func.func @transform_0(%arg0: i32) -> (i32, i32) {
    %c0_i32 = arith.constant 0 : i32
    %c0_i32_0 = arith.constant 0 : i32
    return %arg0, %c0_i32 : i32, i32
  }
  func.func @transform_1(%arg0: i32) -> (i32, i32) {
    %c0_i32 = arith.constant 0 : i32
    %c0_i32_0 = arith.constant 0 : i32
    %c0_i32_1 = arith.constant 0 : i32
    return %c0_i32, %c0_i32_0 : i32, i32
  }
  func.func @transform_2(%arg0: i32) -> (i32, i32) {
    %c0_i32 = arith.constant 0 : i32
    %c0_i32_0 = arith.constant 0 : i32
    %c0_i32_1 = arith.constant 0 : i32
    return %c0_i32, %c0_i32_0 : i32, i32
  }
  func.func @transform_3(%arg0: i32) -> (i32, i32) {
    %c0_i32 = arith.constant 0 : i32
    %c0_i32_0 = arith.constant 0 : i32
    return %arg0, %c0_i32 : i32, i32
  }
}

module attributes {stable_mosaic.version = 11 : i64} {
  func.func @_small_branch_kernel(%arg0: i32, %arg1: memref<1x32x16x16xf32, #tpu.memory_space<vmem>>, %arg2: memref<1x32x16x16xf32, #tpu.memory_space<vmem>>, %arg3: memref<144x16xf32, #tpu.memory_space<vmem>>, %arg4: memref<1x16xf32, #tpu.memory_space<vmem>>, %arg5: memref<144x16xf32, #tpu.memory_space<vmem>>, %arg6: memref<1x16xf32, #tpu.memory_space<vmem>>, %arg7: memref<48x512xf32, #tpu.memory_space<vmem>>, %arg8: memref<32x3xf32, #tpu.memory_space<vmem>>, %arg9: memref<1x32x512xf32, #tpu.memory_space<vmem>>, %arg10: memref<15x144xf32, #tpu.memory_space<vmem>>, %arg11: memref<15x15x16xf32, #tpu.memory_space<vmem>>, %arg12: memref<5x5x16xf32, #tpu.memory_space<vmem>>, %arg13: memref<3x144xf32, #tpu.memory_space<vmem>>, %arg14: memref<3x48xf32, #tpu.memory_space<vmem>>) attributes {dimension_semantics = [#tpu.dimension_semantics<parallel>], iteration_bounds = array<i64: 2>, scalar_prefetch = 0 : i64, scratch_operands = 5 : i64, tpu.core_type = #tpu.core_type<tc>, window_params = [{transform_indices = @transform_0, window_bounds = array<i64: 1, 32, 16, 16>}, {transform_indices = @transform_1, window_bounds = array<i64: 1, 32, 16, 16>}, {pipeline_mode = #tpu.pipeline_mode<synchronous>, transform_indices = @transform_2, window_bounds = array<i64: 144, 16>}, {pipeline_mode = #tpu.pipeline_mode<synchronous>, transform_indices = @transform_3, window_bounds = array<i64: 1, 16>}, {pipeline_mode = #tpu.pipeline_mode<synchronous>, transform_indices = @transform_4, window_bounds = array<i64: 144, 16>}, {pipeline_mode = #tpu.pipeline_mode<synchronous>, transform_indices = @transform_5, window_bounds = array<i64: 1, 16>}, {pipeline_mode = #tpu.pipeline_mode<synchronous>, transform_indices = @transform_6, window_bounds = array<i64: 48, 512>}, {pipeline_mode = #tpu.pipeline_mode<synchronous>, transform_indices = @transform_7, window_bounds = array<i64: 32, 3>}, {transform_indices = @transform_8, window_bounds = array<i64: 1, 32, 512>}]} {
    %c0_i32 = arith.constant 0 : i32
    %c15_i32 = arith.constant 15 : i32
    %0 = arith.addi %c0_i32, %c15_i32 : i32
    %c1_i32 = arith.constant 1 : i32
    scf.for %arg15 = %c0_i32 to %0 step %c1_i32  : i32 {
      %c2_i32 = arith.constant 2 : i32
      %114 = arith.muli %c2_i32, %arg15 : i32
      %c0_i32_167 = arith.constant 0 : i32
      %115 = arith.addi %114, %c0_i32_167 : i32
      %c0_168 = arith.constant 0 : index
      %116 = arith.index_cast %115 : i32 to index
      %c0_169 = arith.constant 0 : index
      %c0_170 = arith.constant 0 : index
      %117 = vector.load %arg1[%c0_168, %116, %c0_169, %c0_170] : memref<1x32x16x16xf32, #tpu.memory_space<vmem>>, vector<1x1x15x16xf32>
      %118 = vector.shape_cast %117 : vector<1x1x15x16xf32> to vector<15x16xf32>
      %c0_171 = arith.constant 0 : index
      %c0_172 = arith.constant 0 : index
      %119 = vector.load %arg10[%c0_171, %c0_172] : memref<15x144xf32, #tpu.memory_space<vmem>>, vector<15x16xf32>
      tpu.vector_store %arg10[%c0_171, %c0_172], %118 {strides = array<i32>} : memref<15x144xf32, #tpu.memory_space<vmem>>, vector<15x16xf32>,
      %c0_173 = arith.constant 0 : index
      %120 = arith.index_cast %115 : i32 to index
      %c0_174 = arith.constant 0 : index
      %c0_175 = arith.constant 0 : index
      %121 = vector.load %arg2[%c0_173, %120, %c0_174, %c0_175] : memref<1x32x16x16xf32, #tpu.memory_space<vmem>>, vector<1x1x15x16xf32>
      %122 = vector.shape_cast %121 : vector<1x1x15x16xf32> to vector<15x16xf32>
      %c0_176 = arith.constant 0 : index
      %c16_177 = arith.constant 16 : index
      %123 = vector.load %arg10[%c0_176, %c16_177] : memref<15x144xf32, #tpu.memory_space<vmem>>, vector<15x16xf32>
      tpu.vector_store %arg10[%c0_176, %c16_177], %122 {strides = array<i32>} : memref<15x144xf32, #tpu.memory_space<vmem>>, vector<15x16xf32>,
      %c0_178 = arith.constant 0 : index
      %124 = arith.index_cast %115 : i32 to index
      %c1_179 = arith.constant 1 : index
      %c0_180 = arith.constant 0 : index
      %125 = vector.load %arg1[%c0_178, %124, %c1_179, %c0_180] : memref<1x32x16x16xf32, #tpu.memory_space<vmem>>, vector<1x1x15x16xf32>
      %126 = vector.shape_cast %125 : vector<1x1x15x16xf32> to vector<15x16xf32>
      %c0_181 = arith.constant 0 : index
      %c32_182 = arith.constant 32 : index
      %127 = vector.load %arg10[%c0_181, %c32_182] : memref<15x144xf32, #tpu.memory_space<vmem>>, vector<15x16xf32>
      tpu.vector_store %arg10[%c0_181, %c32_182], %126 {strides = array<i32>} : memref<15x144xf32, #tpu.memory_space<vmem>>, vector<15x16xf32>,
      %c2_i32_183 = arith.constant 2 : i32
      %128 = arith.muli %c2_i32_183, %arg15 : i32
      %c1_i32_184 = arith.constant 1 : i32
      %129 = arith.addi %128, %c1_i32_184 : i32
      %c0_185 = arith.constant 0 : index
      %130 = arith.index_cast %129 : i32 to index
      %c0_186 = arith.constant 0 : index
      %c0_187 = arith.constant 0 : index
      %131 = vector.load %arg1[%c0_185, %130, %c0_186, %c0_187] : memref<1x32x16x16xf32, #tpu.memory_space<vmem>>, vector<1x1x15x16xf32>
      %132 = vector.shape_cast %131 : vector<1x1x15x16xf32> to vector<15x16xf32>
      %c0_188 = arith.constant 0 : index
      %c48_189 = arith.constant 48 : index
      %133 = vector.load %arg10[%c0_188, %c48_189] : memref<15x144xf32, #tpu.memory_space<vmem>>, vector<15x16xf32>
      tpu.vector_store %arg10[%c0_188, %c48_189], %132 {strides = array<i32>} : memref<15x144xf32, #tpu.memory_space<vmem>>, vector<15x16xf32>,
      %c0_190 = arith.constant 0 : index
      %134 = arith.index_cast %129 : i32 to index
      %c0_191 = arith.constant 0 : index
      %c0_192 = arith.constant 0 : index
      %135 = vector.load %arg2[%c0_190, %134, %c0_191, %c0_192] : memref<1x32x16x16xf32, #tpu.memory_space<vmem>>, vector<1x1x15x16xf32>
      %136 = vector.shape_cast %135 : vector<1x1x15x16xf32> to vector<15x16xf32>
      %c0_193 = arith.constant 0 : index
      %c64_194 = arith.constant 64 : index
      %137 = vector.load %arg10[%c0_193, %c64_194] : memref<15x144xf32, #tpu.memory_space<vmem>>, vector<15x16xf32>
      tpu.vector_store %arg10[%c0_193, %c64_194], %136 {strides = array<i32>} : memref<15x144xf32, #tpu.memory_space<vmem>>, vector<15x16xf32>,
      %c0_195 = arith.constant 0 : index
      %138 = arith.index_cast %129 : i32 to index
      %c1_196 = arith.constant 1 : index
      %c0_197 = arith.constant 0 : index
      %139 = vector.load %arg1[%c0_195, %138, %c1_196, %c0_197] : memref<1x32x16x16xf32, #tpu.memory_space<vmem>>, vector<1x1x15x16xf32>
      %140 = vector.shape_cast %139 : vector<1x1x15x16xf32> to vector<15x16xf32>
      %c0_198 = arith.constant 0 : index
      %c80_199 = arith.constant 80 : index
      %141 = vector.load %arg10[%c0_198, %c80_199] : memref<15x144xf32, #tpu.memory_space<vmem>>, vector<15x16xf32>
      tpu.vector_store %arg10[%c0_198, %c80_199], %140 {strides = array<i32>} : memref<15x144xf32, #tpu.memory_space<vmem>>, vector<15x16xf32>,
      %c2_i32_200 = arith.constant 2 : i32
      %142 = arith.muli %c2_i32_200, %arg15 : i32
      %c2_i32_201 = arith.constant 2 : i32
      %143 = arith.addi %142, %c2_i32_201 : i32
      %c0_202 = arith.constant 0 : index
      %144 = arith.index_cast %143 : i32 to index
      %c0_203 = arith.constant 0 : index
      %c0_204 = arith.constant 0 : index
      %145 = vector.load %arg1[%c0_202, %144, %c0_203, %c0_204] : memref<1x32x16x16xf32, #tpu.memory_space<vmem>>, vector<1x1x15x16xf32>
      %146 = vector.shape_cast %145 : vector<1x1x15x16xf32> to vector<15x16xf32>
      %c0_205 = arith.constant 0 : index
      %c96_206 = arith.constant 96 : index
      %147 = vector.load %arg10[%c0_205, %c96_206] : memref<15x144xf32, #tpu.memory_space<vmem>>, vector<15x16xf32>
      tpu.vector_store %arg10[%c0_205, %c96_206], %146 {strides = array<i32>} : memref<15x144xf32, #tpu.memory_space<vmem>>, vector<15x16xf32>,
      %c0_207 = arith.constant 0 : index
      %148 = arith.index_cast %143 : i32 to index
      %c0_208 = arith.constant 0 : index
      %c0_209 = arith.constant 0 : index
      %149 = vector.load %arg2[%c0_207, %148, %c0_208, %c0_209] : memref<1x32x16x16xf32, #tpu.memory_space<vmem>>, vector<1x1x15x16xf32>
      %150 = vector.shape_cast %149 : vector<1x1x15x16xf32> to vector<15x16xf32>
      %c0_210 = arith.constant 0 : index
      %c112_211 = arith.constant 112 : index
      %151 = vector.load %arg10[%c0_210, %c112_211] : memref<15x144xf32, #tpu.memory_space<vmem>>, vector<15x16xf32>
      tpu.vector_store %arg10[%c0_210, %c112_211], %150 {strides = array<i32>} : memref<15x144xf32, #tpu.memory_space<vmem>>, vector<15x16xf32>,
      %c0_212 = arith.constant 0 : index
      %152 = arith.index_cast %143 : i32 to index
      %c1_213 = arith.constant 1 : index
      %c0_214 = arith.constant 0 : index
      %153 = vector.load %arg1[%c0_212, %152, %c1_213, %c0_214] : memref<1x32x16x16xf32, #tpu.memory_space<vmem>>, vector<1x1x15x16xf32>
      %154 = vector.shape_cast %153 : vector<1x1x15x16xf32> to vector<15x16xf32>
      %c0_215 = arith.constant 0 : index
      %c128_216 = arith.constant 128 : index
      %155 = vector.load %arg10[%c0_215, %c128_216] : memref<15x144xf32, #tpu.memory_space<vmem>>, vector<15x16xf32>
      tpu.vector_store %arg10[%c0_215, %c128_216], %154 {strides = array<i32>} : memref<15x144xf32, #tpu.memory_space<vmem>>, vector<15x16xf32>,
      %c0_217 = arith.constant 0 : index
      %c0_218 = arith.constant 0 : index
      %156 = vector.load %arg10[%c0_217, %c0_218] : memref<15x144xf32, #tpu.memory_space<vmem>>, vector<15x144xf32>
      %c0_219 = arith.constant 0 : index
      %c0_220 = arith.constant 0 : index
      %157 = vector.load %arg3[%c0_219, %c0_220] : memref<144x16xf32, #tpu.memory_space<vmem>>, vector<144x16xf32>
      %cst_221 = arith.constant dense<0.000000e+00> : vector<15x16xf32>
      %158 = tpu.matmul %156, %157, %cst_221 {dimension_numbers = #tpu.dot_dimension_numbers<[1], [0], [0], [1], [0, 0, 1, 1], [], []>} : vector<15x144xf32>, vector<144x16xf32>, vector<15x16xf32> -> vector<15x16xf32>
      %c0_222 = arith.constant 0 : index
      %c0_223 = arith.constant 0 : index
      %159 = vector.load %arg4[%c0_222, %c0_223] : memref<1x16xf32, #tpu.memory_space<vmem>>, vector<1x16xf32>
      %160 = vector.broadcast %159 : vector<1x16xf32> to vector<15x16xf32>
      %161 = arith.addf %158, %160 : vector<15x16xf32>
      %162 = arith.index_cast %arg15 : i32 to index
      %c0_224 = arith.constant 0 : index
      %c0_225 = arith.constant 0 : index
      %163 = vector.load %arg11[%162, %c0_224, %c0_225] : memref<15x15x16xf32, #tpu.memory_space<vmem>>, vector<1x15x16xf32>
      %164 = vector.shape_cast %163 : vector<1x15x16xf32> to vector<15x16xf32>
      %165 = vector.shape_cast %161 : vector<15x16xf32> to vector<1x15x16xf32>
      tpu.vector_store %arg11[%162, %c0_224, %c0_225], %165 {strides = array<i32>} : memref<15x15x16xf32, #tpu.memory_space<vmem>>, vector<1x15x16xf32>,
    }
    %c15_i32_0 = arith.constant 15 : i32
    %cst = arith.constant 0.000000e+00 : f32
    %1 = vector.broadcast %cst : f32 to vector<5x5x16xf32>
    %c0 = arith.constant 0 : index
    %c0_1 = arith.constant 0 : index
    %c0_2 = arith.constant 0 : index
    %2 = vector.load %arg12[%c0, %c0_1, %c0_2] : memref<5x5x16xf32, #tpu.memory_space<vmem>>, vector<5x5x16xf32>
    tpu.vector_store %arg12[%c0, %c0_1, %c0_2], %1 {strides = array<i32>} : memref<5x5x16xf32, #tpu.memory_space<vmem>>, vector<5x5x16xf32>,
    %c0_i32_3 = arith.constant 0 : i32
    %c3_i32 = arith.constant 3 : i32
    %3 = arith.addi %c0_i32_3, %c3_i32 : i32
    %c1_i32_4 = arith.constant 1 : i32
    scf.for %arg15 = %c0_i32_3 to %3 step %c1_i32_4  : i32 {
      %c3_i32_167 = arith.constant 3 : i32
      %114 = arith.muli %c3_i32_167, %arg15 : i32
      %115 = arith.index_cast %114 : i32 to index
      %c0_168 = arith.constant 0 : index
      %c0_169 = arith.constant 0 : index
      %116 = vector.load %arg11[%115, %c0_168, %c0_169] : memref<15x15x16xf32, #tpu.memory_space<vmem>>, vector<7x15x16xf32>
      %cst_170 = arith.constant dense<0xFF800000> : vector<15x16xf32>
      %117 = vector.multi_reduction <maximumf>, %116, %cst_170 [0] : vector<7x15x16xf32> to vector<15x16xf32>
      %118 = vector.extract_strided_slice %117 {offsets = [0, 0], sizes = [7, 16], strides = [1, 1]} : vector<15x16xf32> to vector<7x16xf32>
      %cst_171 = arith.constant dense<0xFF800000> : vector<16xf32>
      %119 = vector.multi_reduction <maximumf>, %118, %cst_171 [0] : vector<7x16xf32> to vector<16xf32>
      %120 = vector.shape_cast %119 : vector<16xf32> to vector<1x16xf32>
      %c1_i32_172 = arith.constant 1 : i32
      %121 = arith.addi %arg15, %c1_i32_172 : i32
      %122 = arith.index_cast %121 : i32 to index
      %c1_173 = arith.constant 1 : index
      %c0_174 = arith.constant 0 : index
      %123 = vector.load %arg12[%122, %c1_173, %c0_174] : memref<5x5x16xf32, #tpu.memory_space<vmem>>, vector<1x1x16xf32>
      %124 = vector.shape_cast %123 : vector<1x1x16xf32> to vector<1x16xf32>
      %125 = vector.shape_cast %120 : vector<1x16xf32> to vector<1x1x16xf32>
      tpu.vector_store %arg12[%122, %c1_173, %c0_174], %125 {strides = array<i32>} : memref<5x5x16xf32, #tpu.memory_space<vmem>>, vector<1x1x16xf32>,
      %126 = vector.extract_strided_slice %117 {offsets = [3, 0], sizes = [7, 16], strides = [1, 1]} : vector<15x16xf32> to vector<7x16xf32>
      %cst_175 = arith.constant dense<0xFF800000> : vector<16xf32>
      %127 = vector.multi_reduction <maximumf>, %126, %cst_175 [0] : vector<7x16xf32> to vector<16xf32>
      %128 = vector.shape_cast %127 : vector<16xf32> to vector<1x16xf32>
      %c1_i32_176 = arith.constant 1 : i32
      %129 = arith.addi %arg15, %c1_i32_176 : i32
      %130 = arith.index_cast %129 : i32 to index
      %c2_177 = arith.constant 2 : index
      %c0_178 = arith.constant 0 : index
      %131 = vector.load %arg12[%130, %c2_177, %c0_178] : memref<5x5x16xf32, #tpu.memory_space<vmem>>, vector<1x1x16xf32>
      %132 = vector.shape_cast %131 : vector<1x1x16xf32> to vector<1x16xf32>
      %133 = vector.shape_cast %128 : vector<1x16xf32> to vector<1x1x16xf32>
      tpu.vector_store %arg12[%130, %c2_177, %c0_178], %133 {strides = array<i32>} : memref<5x5x16xf32, #tpu.memory_space<vmem>>, vector<1x1x16xf32>,
      %134 = vector.extract_strided_slice %117 {offsets = [6, 0], sizes = [7, 16], strides = [1, 1]} : vector<15x16xf32> to vector<7x16xf32>
      %cst_179 = arith.constant dense<0xFF800000> : vector<16xf32>
      %135 = vector.multi_reduction <maximumf>, %134, %cst_179 [0] : vector<7x16xf32> to vector<16xf32>
      %136 = vector.shape_cast %135 : vector<16xf32> to vector<1x16xf32>
      %c1_i32_180 = arith.constant 1 : i32
      %137 = arith.addi %arg15, %c1_i32_180 : i32
      %138 = arith.index_cast %137 : i32 to index
      %c3_181 = arith.constant 3 : index
      %c0_182 = arith.constant 0 : index
      %139 = vector.load %arg12[%138, %c3_181, %c0_182] : memref<5x5x16xf32, #tpu.memory_space<vmem>>, vector<1x1x16xf32>
      %140 = vector.shape_cast %139 : vector<1x1x16xf32> to vector<1x16xf32>
      %141 = vector.shape_cast %136 : vector<1x16xf32> to vector<1x1x16xf32>
      tpu.vector_store %arg12[%138, %c3_181, %c0_182], %141 {strides = array<i32>} : memref<5x5x16xf32, #tpu.memory_space<vmem>>, vector<1x1x16xf32>,
    }
    %c3_i32_5 = arith.constant 3 : i32
    %c0_6 = arith.constant 0 : index
    %c0_7 = arith.constant 0 : index
    %c0_8 = arith.constant 0 : index
    %4 = vector.load %arg12[%c0_6, %c0_7, %c0_8] : memref<5x5x16xf32, #tpu.memory_space<vmem>>, vector<3x1x16xf32>
    %5 = vector.shape_cast %4 : vector<3x1x16xf32> to vector<3x16xf32>
    %c0_9 = arith.constant 0 : index
    %c0_10 = arith.constant 0 : index
    %6 = vector.load %arg13[%c0_9, %c0_10] : memref<3x144xf32, #tpu.memory_space<vmem>>, vector<3x16xf32>
    tpu.vector_store %arg13[%c0_9, %c0_10], %5 {strides = array<i32>} : memref<3x144xf32, #tpu.memory_space<vmem>>, vector<3x16xf32>,
    %c0_11 = arith.constant 0 : index
    %c1 = arith.constant 1 : index
    %c0_12 = arith.constant 0 : index
    %7 = vector.load %arg12[%c0_11, %c1, %c0_12] : memref<5x5x16xf32, #tpu.memory_space<vmem>>, vector<3x1x16xf32>
    %8 = vector.shape_cast %7 : vector<3x1x16xf32> to vector<3x16xf32>
    %c0_13 = arith.constant 0 : index
    %c16 = arith.constant 16 : index
    %9 = vector.load %arg13[%c0_13, %c16] : memref<3x144xf32, #tpu.memory_space<vmem>>, vector<3x16xf32>
    tpu.vector_store %arg13[%c0_13, %c16], %8 {strides = array<i32>} : memref<3x144xf32, #tpu.memory_space<vmem>>, vector<3x16xf32>,
    %c0_14 = arith.constant 0 : index
    %c2 = arith.constant 2 : index
    %c0_15 = arith.constant 0 : index
    %10 = vector.load %arg12[%c0_14, %c2, %c0_15] : memref<5x5x16xf32, #tpu.memory_space<vmem>>, vector<3x1x16xf32>
    %11 = vector.shape_cast %10 : vector<3x1x16xf32> to vector<3x16xf32>
    %c0_16 = arith.constant 0 : index
    %c32 = arith.constant 32 : index
    %12 = vector.load %arg13[%c0_16, %c32] : memref<3x144xf32, #tpu.memory_space<vmem>>, vector<3x16xf32>
    tpu.vector_store %arg13[%c0_16, %c32], %11 {strides = array<i32>} : memref<3x144xf32, #tpu.memory_space<vmem>>, vector<3x16xf32>,
    %c1_17 = arith.constant 1 : index
    %c0_18 = arith.constant 0 : index
    %c0_19 = arith.constant 0 : index
    %13 = vector.load %arg12[%c1_17, %c0_18, %c0_19] : memref<5x5x16xf32, #tpu.memory_space<vmem>>, vector<3x1x16xf32>
    %14 = vector.shape_cast %13 : vector<3x1x16xf32> to vector<3x16xf32>
    %c0_20 = arith.constant 0 : index
    %c48 = arith.constant 48 : index
    %15 = vector.load %arg13[%c0_20, %c48] : memref<3x144xf32, #tpu.memory_space<vmem>>, vector<3x16xf32>
    tpu.vector_store %arg13[%c0_20, %c48], %14 {strides = array<i32>} : memref<3x144xf32, #tpu.memory_space<vmem>>, vector<3x16xf32>,
    %c1_21 = arith.constant 1 : index
    %c1_22 = arith.constant 1 : index
    %c0_23 = arith.constant 0 : index
    %16 = vector.load %arg12[%c1_21, %c1_22, %c0_23] : memref<5x5x16xf32, #tpu.memory_space<vmem>>, vector<3x1x16xf32>
    %17 = vector.shape_cast %16 : vector<3x1x16xf32> to vector<3x16xf32>
    %c0_24 = arith.constant 0 : index
    %c64 = arith.constant 64 : index
    %18 = vector.load %arg13[%c0_24, %c64] : memref<3x144xf32, #tpu.memory_space<vmem>>, vector<3x16xf32>
    tpu.vector_store %arg13[%c0_24, %c64], %17 {strides = array<i32>} : memref<3x144xf32, #tpu.memory_space<vmem>>, vector<3x16xf32>,
    %c1_25 = arith.constant 1 : index
    %c2_26 = arith.constant 2 : index
    %c0_27 = arith.constant 0 : index
    %19 = vector.load %arg12[%c1_25, %c2_26, %c0_27] : memref<5x5x16xf32, #tpu.memory_space<vmem>>, vector<3x1x16xf32>
    %20 = vector.shape_cast %19 : vector<3x1x16xf32> to vector<3x16xf32>
    %c0_28 = arith.constant 0 : index
    %c80 = arith.constant 80 : index
    %21 = vector.load %arg13[%c0_28, %c80] : memref<3x144xf32, #tpu.memory_space<vmem>>, vector<3x16xf32>
    tpu.vector_store %arg13[%c0_28, %c80], %20 {strides = array<i32>} : memref<3x144xf32, #tpu.memory_space<vmem>>, vector<3x16xf32>,
    %c2_29 = arith.constant 2 : index
    %c0_30 = arith.constant 0 : index
    %c0_31 = arith.constant 0 : index
    %22 = vector.load %arg12[%c2_29, %c0_30, %c0_31] : memref<5x5x16xf32, #tpu.memory_space<vmem>>, vector<3x1x16xf32>
    %23 = vector.shape_cast %22 : vector<3x1x16xf32> to vector<3x16xf32>
    %c0_32 = arith.constant 0 : index
    %c96 = arith.constant 96 : index
    %24 = vector.load %arg13[%c0_32, %c96] : memref<3x144xf32, #tpu.memory_space<vmem>>, vector<3x16xf32>
    tpu.vector_store %arg13[%c0_32, %c96], %23 {strides = array<i32>} : memref<3x144xf32, #tpu.memory_space<vmem>>, vector<3x16xf32>,
    %c2_33 = arith.constant 2 : index
    %c1_34 = arith.constant 1 : index
    %c0_35 = arith.constant 0 : index
    %25 = vector.load %arg12[%c2_33, %c1_34, %c0_35] : memref<5x5x16xf32, #tpu.memory_space<vmem>>, vector<3x1x16xf32>
    %26 = vector.shape_cast %25 : vector<3x1x16xf32> to vector<3x16xf32>
    %c0_36 = arith.constant 0 : index
    %c112 = arith.constant 112 : index
    %27 = vector.load %arg13[%c0_36, %c112] : memref<3x144xf32, #tpu.memory_space<vmem>>, vector<3x16xf32>
    tpu.vector_store %arg13[%c0_36, %c112], %26 {strides = array<i32>} : memref<3x144xf32, #tpu.memory_space<vmem>>, vector<3x16xf32>,
    %c2_37 = arith.constant 2 : index
    %c2_38 = arith.constant 2 : index
    %c0_39 = arith.constant 0 : index
    %28 = vector.load %arg12[%c2_37, %c2_38, %c0_39] : memref<5x5x16xf32, #tpu.memory_space<vmem>>, vector<3x1x16xf32>
    %29 = vector.shape_cast %28 : vector<3x1x16xf32> to vector<3x16xf32>
    %c0_40 = arith.constant 0 : index
    %c128 = arith.constant 128 : index
    %30 = vector.load %arg13[%c0_40, %c128] : memref<3x144xf32, #tpu.memory_space<vmem>>, vector<3x16xf32>
    tpu.vector_store %arg13[%c0_40, %c128], %29 {strides = array<i32>} : memref<3x144xf32, #tpu.memory_space<vmem>>, vector<3x16xf32>,
    %c0_41 = arith.constant 0 : index
    %c0_42 = arith.constant 0 : index
    %31 = vector.load %arg13[%c0_41, %c0_42] : memref<3x144xf32, #tpu.memory_space<vmem>>, vector<3x144xf32>
    %c0_43 = arith.constant 0 : index
    %c0_44 = arith.constant 0 : index
    %32 = vector.load %arg5[%c0_43, %c0_44] : memref<144x16xf32, #tpu.memory_space<vmem>>, vector<144x16xf32>
    %cst_45 = arith.constant dense<0.000000e+00> : vector<3x16xf32>
    %33 = tpu.matmul %31, %32, %cst_45 {dimension_numbers = #tpu.dot_dimension_numbers<[1], [0], [0], [1], [0, 0, 1, 1], [], []>} : vector<3x144xf32>, vector<144x16xf32>, vector<3x16xf32> -> vector<3x16xf32>
    %c0_46 = arith.constant 0 : index
    %c0_47 = arith.constant 0 : index
    %34 = vector.load %arg6[%c0_46, %c0_47] : memref<1x16xf32, #tpu.memory_space<vmem>>, vector<1x16xf32>
    %35 = vector.broadcast %34 : vector<1x16xf32> to vector<3x16xf32>
    %36 = arith.addf %33, %35 : vector<3x16xf32>
    %c0_48 = arith.constant 0 : index
    %c0_49 = arith.constant 0 : index
    %37 = vector.load %arg14[%c0_48, %c0_49] : memref<3x48xf32, #tpu.memory_space<vmem>>, vector<3x16xf32>
    tpu.vector_store %arg14[%c0_48, %c0_49], %36 {strides = array<i32>} : memref<3x48xf32, #tpu.memory_space<vmem>>, vector<3x16xf32>,
    %c0_50 = arith.constant 0 : index
    %c1_51 = arith.constant 1 : index
    %c0_52 = arith.constant 0 : index
    %38 = vector.load %arg12[%c0_50, %c1_51, %c0_52] : memref<5x5x16xf32, #tpu.memory_space<vmem>>, vector<3x1x16xf32>
    %39 = vector.shape_cast %38 : vector<3x1x16xf32> to vector<3x16xf32>
    %c0_53 = arith.constant 0 : index
    %c0_54 = arith.constant 0 : index
    %40 = vector.load %arg13[%c0_53, %c0_54] : memref<3x144xf32, #tpu.memory_space<vmem>>, vector<3x16xf32>
    tpu.vector_store %arg13[%c0_53, %c0_54], %39 {strides = array<i32>} : memref<3x144xf32, #tpu.memory_space<vmem>>, vector<3x16xf32>,
    %c0_55 = arith.constant 0 : index
    %c2_56 = arith.constant 2 : index
    %c0_57 = arith.constant 0 : index
    %41 = vector.load %arg12[%c0_55, %c2_56, %c0_57] : memref<5x5x16xf32, #tpu.memory_space<vmem>>, vector<3x1x16xf32>
    %42 = vector.shape_cast %41 : vector<3x1x16xf32> to vector<3x16xf32>
    %c0_58 = arith.constant 0 : index
    %c16_59 = arith.constant 16 : index
    %43 = vector.load %arg13[%c0_58, %c16_59] : memref<3x144xf32, #tpu.memory_space<vmem>>, vector<3x16xf32>
    tpu.vector_store %arg13[%c0_58, %c16_59], %42 {strides = array<i32>} : memref<3x144xf32, #tpu.memory_space<vmem>>, vector<3x16xf32>,
    %c0_60 = arith.constant 0 : index
    %c3 = arith.constant 3 : index
    %c0_61 = arith.constant 0 : index
    %44 = vector.load %arg12[%c0_60, %c3, %c0_61] : memref<5x5x16xf32, #tpu.memory_space<vmem>>, vector<3x1x16xf32>
    %45 = vector.shape_cast %44 : vector<3x1x16xf32> to vector<3x16xf32>
    %c0_62 = arith.constant 0 : index
    %c32_63 = arith.constant 32 : index
    %46 = vector.load %arg13[%c0_62, %c32_63] : memref<3x144xf32, #tpu.memory_space<vmem>>, vector<3x16xf32>
    tpu.vector_store %arg13[%c0_62, %c32_63], %45 {strides = array<i32>} : memref<3x144xf32, #tpu.memory_space<vmem>>, vector<3x16xf32>,
    %c1_64 = arith.constant 1 : index
    %c1_65 = arith.constant 1 : index
    %c0_66 = arith.constant 0 : index
    %47 = vector.load %arg12[%c1_64, %c1_65, %c0_66] : memref<5x5x16xf32, #tpu.memory_space<vmem>>, vector<3x1x16xf32>
    %48 = vector.shape_cast %47 : vector<3x1x16xf32> to vector<3x16xf32>
    %c0_67 = arith.constant 0 : index
    %c48_68 = arith.constant 48 : index
    %49 = vector.load %arg13[%c0_67, %c48_68] : memref<3x144xf32, #tpu.memory_space<vmem>>, vector<3x16xf32>
    tpu.vector_store %arg13[%c0_67, %c48_68], %48 {strides = array<i32>} : memref<3x144xf32, #tpu.memory_space<vmem>>, vector<3x16xf32>,
    %c1_69 = arith.constant 1 : index
    %c2_70 = arith.constant 2 : index
    %c0_71 = arith.constant 0 : index
    %50 = vector.load %arg12[%c1_69, %c2_70, %c0_71] : memref<5x5x16xf32, #tpu.memory_space<vmem>>, vector<3x1x16xf32>
    %51 = vector.shape_cast %50 : vector<3x1x16xf32> to vector<3x16xf32>
    %c0_72 = arith.constant 0 : index
    %c64_73 = arith.constant 64 : index
    %52 = vector.load %arg13[%c0_72, %c64_73] : memref<3x144xf32, #tpu.memory_space<vmem>>, vector<3x16xf32>
    tpu.vector_store %arg13[%c0_72, %c64_73], %51 {strides = array<i32>} : memref<3x144xf32, #tpu.memory_space<vmem>>, vector<3x16xf32>,
    %c1_74 = arith.constant 1 : index
    %c3_75 = arith.constant 3 : index
    %c0_76 = arith.constant 0 : index
    %53 = vector.load %arg12[%c1_74, %c3_75, %c0_76] : memref<5x5x16xf32, #tpu.memory_space<vmem>>, vector<3x1x16xf32>
    %54 = vector.shape_cast %53 : vector<3x1x16xf32> to vector<3x16xf32>
    %c0_77 = arith.constant 0 : index
    %c80_78 = arith.constant 80 : index
    %55 = vector.load %arg13[%c0_77, %c80_78] : memref<3x144xf32, #tpu.memory_space<vmem>>, vector<3x16xf32>
    tpu.vector_store %arg13[%c0_77, %c80_78], %54 {strides = array<i32>} : memref<3x144xf32, #tpu.memory_space<vmem>>, vector<3x16xf32>,
    %c2_79 = arith.constant 2 : index
    %c1_80 = arith.constant 1 : index
    %c0_81 = arith.constant 0 : index
    %56 = vector.load %arg12[%c2_79, %c1_80, %c0_81] : memref<5x5x16xf32, #tpu.memory_space<vmem>>, vector<3x1x16xf32>
    %57 = vector.shape_cast %56 : vector<3x1x16xf32> to vector<3x16xf32>
    %c0_82 = arith.constant 0 : index
    %c96_83 = arith.constant 96 : index
    %58 = vector.load %arg13[%c0_82, %c96_83] : memref<3x144xf32, #tpu.memory_space<vmem>>, vector<3x16xf32>
    tpu.vector_store %arg13[%c0_82, %c96_83], %57 {strides = array<i32>} : memref<3x144xf32, #tpu.memory_space<vmem>>, vector<3x16xf32>,
    %c2_84 = arith.constant 2 : index
    %c2_85 = arith.constant 2 : index
    %c0_86 = arith.constant 0 : index
    %59 = vector.load %arg12[%c2_84, %c2_85, %c0_86] : memref<5x5x16xf32, #tpu.memory_space<vmem>>, vector<3x1x16xf32>
    %60 = vector.shape_cast %59 : vector<3x1x16xf32> to vector<3x16xf32>
    %c0_87 = arith.constant 0 : index
    %c112_88 = arith.constant 112 : index
    %61 = vector.load %arg13[%c0_87, %c112_88] : memref<3x144xf32, #tpu.memory_space<vmem>>, vector<3x16xf32>
    tpu.vector_store %arg13[%c0_87, %c112_88], %60 {strides = array<i32>} : memref<3x144xf32, #tpu.memory_space<vmem>>, vector<3x16xf32>,
    %c2_89 = arith.constant 2 : index
    %c3_90 = arith.constant 3 : index
    %c0_91 = arith.constant 0 : index
    %62 = vector.load %arg12[%c2_89, %c3_90, %c0_91] : memref<5x5x16xf32, #tpu.memory_space<vmem>>, vector<3x1x16xf32>
    %63 = vector.shape_cast %62 : vector<3x1x16xf32> to vector<3x16xf32>
    %c0_92 = arith.constant 0 : index
    %c128_93 = arith.constant 128 : index
    %64 = vector.load %arg13[%c0_92, %c128_93] : memref<3x144xf32, #tpu.memory_space<vmem>>, vector<3x16xf32>
    tpu.vector_store %arg13[%c0_92, %c128_93], %63 {strides = array<i32>} : memref<3x144xf32, #tpu.memory_space<vmem>>, vector<3x16xf32>,
    %c0_94 = arith.constant 0 : index
    %c0_95 = arith.constant 0 : index
    %65 = vector.load %arg13[%c0_94, %c0_95] : memref<3x144xf32, #tpu.memory_space<vmem>>, vector<3x144xf32>
    %c0_96 = arith.constant 0 : index
    %c0_97 = arith.constant 0 : index
    %66 = vector.load %arg5[%c0_96, %c0_97] : memref<144x16xf32, #tpu.memory_space<vmem>>, vector<144x16xf32>
    %cst_98 = arith.constant dense<0.000000e+00> : vector<3x16xf32>
    %67 = tpu.matmul %65, %66, %cst_98 {dimension_numbers = #tpu.dot_dimension_numbers<[1], [0], [0], [1], [0, 0, 1, 1], [], []>} : vector<3x144xf32>, vector<144x16xf32>, vector<3x16xf32> -> vector<3x16xf32>
    %c0_99 = arith.constant 0 : index
    %c0_100 = arith.constant 0 : index
    %68 = vector.load %arg6[%c0_99, %c0_100] : memref<1x16xf32, #tpu.memory_space<vmem>>, vector<1x16xf32>
    %69 = vector.broadcast %68 : vector<1x16xf32> to vector<3x16xf32>
    %70 = arith.addf %67, %69 : vector<3x16xf32>
    %c0_101 = arith.constant 0 : index
    %c16_102 = arith.constant 16 : index
    %71 = vector.load %arg14[%c0_101, %c16_102] : memref<3x48xf32, #tpu.memory_space<vmem>>, vector<3x16xf32>
    tpu.vector_store %arg14[%c0_101, %c16_102], %70 {strides = array<i32>} : memref<3x48xf32, #tpu.memory_space<vmem>>, vector<3x16xf32>,
    %c0_103 = arith.constant 0 : index
    %c2_104 = arith.constant 2 : index
    %c0_105 = arith.constant 0 : index
    %72 = vector.load %arg12[%c0_103, %c2_104, %c0_105] : memref<5x5x16xf32, #tpu.memory_space<vmem>>, vector<3x1x16xf32>
    %73 = vector.shape_cast %72 : vector<3x1x16xf32> to vector<3x16xf32>
    %c0_106 = arith.constant 0 : index
    %c0_107 = arith.constant 0 : index
    %74 = vector.load %arg13[%c0_106, %c0_107] : memref<3x144xf32, #tpu.memory_space<vmem>>, vector<3x16xf32>
    tpu.vector_store %arg13[%c0_106, %c0_107], %73 {strides = array<i32>} : memref<3x144xf32, #tpu.memory_space<vmem>>, vector<3x16xf32>,
    %c0_108 = arith.constant 0 : index
    %c3_109 = arith.constant 3 : index
    %c0_110 = arith.constant 0 : index
    %75 = vector.load %arg12[%c0_108, %c3_109, %c0_110] : memref<5x5x16xf32, #tpu.memory_space<vmem>>, vector<3x1x16xf32>
    %76 = vector.shape_cast %75 : vector<3x1x16xf32> to vector<3x16xf32>
    %c0_111 = arith.constant 0 : index
    %c16_112 = arith.constant 16 : index
    %77 = vector.load %arg13[%c0_111, %c16_112] : memref<3x144xf32, #tpu.memory_space<vmem>>, vector<3x16xf32>
    tpu.vector_store %arg13[%c0_111, %c16_112], %76 {strides = array<i32>} : memref<3x144xf32, #tpu.memory_space<vmem>>, vector<3x16xf32>,
    %c0_113 = arith.constant 0 : index
    %c4 = arith.constant 4 : index
    %c0_114 = arith.constant 0 : index
    %78 = vector.load %arg12[%c0_113, %c4, %c0_114] : memref<5x5x16xf32, #tpu.memory_space<vmem>>, vector<3x1x16xf32>
    %79 = vector.shape_cast %78 : vector<3x1x16xf32> to vector<3x16xf32>
    %c0_115 = arith.constant 0 : index
    %c32_116 = arith.constant 32 : index
    %80 = vector.load %arg13[%c0_115, %c32_116] : memref<3x144xf32, #tpu.memory_space<vmem>>, vector<3x16xf32>
    tpu.vector_store %arg13[%c0_115, %c32_116], %79 {strides = array<i32>} : memref<3x144xf32, #tpu.memory_space<vmem>>, vector<3x16xf32>,
    %c1_117 = arith.constant 1 : index
    %c2_118 = arith.constant 2 : index
    %c0_119 = arith.constant 0 : index
    %81 = vector.load %arg12[%c1_117, %c2_118, %c0_119] : memref<5x5x16xf32, #tpu.memory_space<vmem>>, vector<3x1x16xf32>
    %82 = vector.shape_cast %81 : vector<3x1x16xf32> to vector<3x16xf32>
    %c0_120 = arith.constant 0 : index
    %c48_121 = arith.constant 48 : index
    %83 = vector.load %arg13[%c0_120, %c48_121] : memref<3x144xf32, #tpu.memory_space<vmem>>, vector<3x16xf32>
    tpu.vector_store %arg13[%c0_120, %c48_121], %82 {strides = array<i32>} : memref<3x144xf32, #tpu.memory_space<vmem>>, vector<3x16xf32>,
    %c1_122 = arith.constant 1 : index
    %c3_123 = arith.constant 3 : index
    %c0_124 = arith.constant 0 : index
    %84 = vector.load %arg12[%c1_122, %c3_123, %c0_124] : memref<5x5x16xf32, #tpu.memory_space<vmem>>, vector<3x1x16xf32>
    %85 = vector.shape_cast %84 : vector<3x1x16xf32> to vector<3x16xf32>
    %c0_125 = arith.constant 0 : index
    %c64_126 = arith.constant 64 : index
    %86 = vector.load %arg13[%c0_125, %c64_126] : memref<3x144xf32, #tpu.memory_space<vmem>>, vector<3x16xf32>
    tpu.vector_store %arg13[%c0_125, %c64_126], %85 {strides = array<i32>} : memref<3x144xf32, #tpu.memory_space<vmem>>, vector<3x16xf32>,
    %c1_127 = arith.constant 1 : index
    %c4_128 = arith.constant 4 : index
    %c0_129 = arith.constant 0 : index
    %87 = vector.load %arg12[%c1_127, %c4_128, %c0_129] : memref<5x5x16xf32, #tpu.memory_space<vmem>>, vector<3x1x16xf32>
    %88 = vector.shape_cast %87 : vector<3x1x16xf32> to vector<3x16xf32>
    %c0_130 = arith.constant 0 : index
    %c80_131 = arith.constant 80 : index
    %89 = vector.load %arg13[%c0_130, %c80_131] : memref<3x144xf32, #tpu.memory_space<vmem>>, vector<3x16xf32>
    tpu.vector_store %arg13[%c0_130, %c80_131], %88 {strides = array<i32>} : memref<3x144xf32, #tpu.memory_space<vmem>>, vector<3x16xf32>,
    %c2_132 = arith.constant 2 : index
    %c2_133 = arith.constant 2 : index
    %c0_134 = arith.constant 0 : index
    %90 = vector.load %arg12[%c2_132, %c2_133, %c0_134] : memref<5x5x16xf32, #tpu.memory_space<vmem>>, vector<3x1x16xf32>
    %91 = vector.shape_cast %90 : vector<3x1x16xf32> to vector<3x16xf32>
    %c0_135 = arith.constant 0 : index
    %c96_136 = arith.constant 96 : index
    %92 = vector.load %arg13[%c0_135, %c96_136] : memref<3x144xf32, #tpu.memory_space<vmem>>, vector<3x16xf32>
    tpu.vector_store %arg13[%c0_135, %c96_136], %91 {strides = array<i32>} : memref<3x144xf32, #tpu.memory_space<vmem>>, vector<3x16xf32>,
    %c2_137 = arith.constant 2 : index
    %c3_138 = arith.constant 3 : index
    %c0_139 = arith.constant 0 : index
    %93 = vector.load %arg12[%c2_137, %c3_138, %c0_139] : memref<5x5x16xf32, #tpu.memory_space<vmem>>, vector<3x1x16xf32>
    %94 = vector.shape_cast %93 : vector<3x1x16xf32> to vector<3x16xf32>
    %c0_140 = arith.constant 0 : index
    %c112_141 = arith.constant 112 : index
    %95 = vector.load %arg13[%c0_140, %c112_141] : memref<3x144xf32, #tpu.memory_space<vmem>>, vector<3x16xf32>
    tpu.vector_store %arg13[%c0_140, %c112_141], %94 {strides = array<i32>} : memref<3x144xf32, #tpu.memory_space<vmem>>, vector<3x16xf32>,
    %c2_142 = arith.constant 2 : index
    %c4_143 = arith.constant 4 : index
    %c0_144 = arith.constant 0 : index
    %96 = vector.load %arg12[%c2_142, %c4_143, %c0_144] : memref<5x5x16xf32, #tpu.memory_space<vmem>>, vector<3x1x16xf32>
    %97 = vector.shape_cast %96 : vector<3x1x16xf32> to vector<3x16xf32>
    %c0_145 = arith.constant 0 : index
    %c128_146 = arith.constant 128 : index
    %98 = vector.load %arg13[%c0_145, %c128_146] : memref<3x144xf32, #tpu.memory_space<vmem>>, vector<3x16xf32>
    tpu.vector_store %arg13[%c0_145, %c128_146], %97 {strides = array<i32>} : memref<3x144xf32, #tpu.memory_space<vmem>>, vector<3x16xf32>,
    %c0_147 = arith.constant 0 : index
    %c0_148 = arith.constant 0 : index
    %99 = vector.load %arg13[%c0_147, %c0_148] : memref<3x144xf32, #tpu.memory_space<vmem>>, vector<3x144xf32>
    %c0_149 = arith.constant 0 : index
    %c0_150 = arith.constant 0 : index
    %100 = vector.load %arg5[%c0_149, %c0_150] : memref<144x16xf32, #tpu.memory_space<vmem>>, vector<144x16xf32>
    %cst_151 = arith.constant dense<0.000000e+00> : vector<3x16xf32>
    %101 = tpu.matmul %99, %100, %cst_151 {dimension_numbers = #tpu.dot_dimension_numbers<[1], [0], [0], [1], [0, 0, 1, 1], [], []>} : vector<3x144xf32>, vector<144x16xf32>, vector<3x16xf32> -> vector<3x16xf32>
    %c0_152 = arith.constant 0 : index
    %c0_153 = arith.constant 0 : index
    %102 = vector.load %arg6[%c0_152, %c0_153] : memref<1x16xf32, #tpu.memory_space<vmem>>, vector<1x16xf32>
    %103 = vector.broadcast %102 : vector<1x16xf32> to vector<3x16xf32>
    %104 = arith.addf %101, %103 : vector<3x16xf32>
    %c0_154 = arith.constant 0 : index
    %c32_155 = arith.constant 32 : index
    %105 = vector.load %arg14[%c0_154, %c32_155] : memref<3x48xf32, #tpu.memory_space<vmem>>, vector<3x16xf32>
    tpu.vector_store %arg14[%c0_154, %c32_155], %104 {strides = array<i32>} : memref<3x48xf32, #tpu.memory_space<vmem>>, vector<3x16xf32>,
    %c0_156 = arith.constant 0 : index
    %c0_157 = arith.constant 0 : index
    %106 = vector.load %arg14[%c0_156, %c0_157] : memref<3x48xf32, #tpu.memory_space<vmem>>, vector<3x48xf32>
    %c0_158 = arith.constant 0 : index
    %c0_159 = arith.constant 0 : index
    %107 = vector.load %arg7[%c0_158, %c0_159] : memref<48x512xf32, #tpu.memory_space<vmem>>, vector<48x512xf32>
    %cst_160 = arith.constant dense<0.000000e+00> : vector<3x512xf32>
    %108 = tpu.matmul %106, %107, %cst_160 {dimension_numbers = #tpu.dot_dimension_numbers<[1], [0], [0], [1], [0, 0, 1, 1], [], []>} : vector<3x48xf32>, vector<48x512xf32>, vector<3x512xf32> -> vector<3x512xf32>
    %c0_161 = arith.constant 0 : index
    %c0_162 = arith.constant 0 : index
    %109 = vector.load %arg8[%c0_161, %c0_162] : memref<32x3xf32, #tpu.memory_space<vmem>>, vector<32x3xf32>
    %cst_163 = arith.constant dense<0.000000e+00> : vector<32x512xf32>
    %110 = tpu.matmul %109, %108, %cst_163 {dimension_numbers = #tpu.dot_dimension_numbers<[1], [0], [0], [1], [0, 0, 1, 1], [], []>} : vector<32x3xf32>, vector<3x512xf32>, vector<32x512xf32> -> vector<32x512xf32>
    %c0_164 = arith.constant 0 : index
    %c0_165 = arith.constant 0 : index
    %c0_166 = arith.constant 0 : index
    %111 = vector.load %arg9[%c0_164, %c0_165, %c0_166] : memref<1x32x512xf32, #tpu.memory_space<vmem>>, vector<1x32x512xf32>
    %112 = vector.shape_cast %111 : vector<1x32x512xf32> to vector<32x512xf32>
    %113 = vector.shape_cast %110 : vector<32x512xf32> to vector<1x32x512xf32>
    tpu.vector_store %arg9[%c0_164, %c0_165, %c0_166], %113 {strides = array<i32>} : memref<1x32x512xf32, #tpu.memory_space<vmem>>, vector<1x32x512xf32>,
    return
  }
  func.func @transform_0(%arg0: i32) -> (i32, i32, i32, i32) {
    %c0_i32 = arith.constant 0 : i32
    %c0_i32_0 = arith.constant 0 : i32
    %c0_i32_1 = arith.constant 0 : i32
    %c0_i32_2 = arith.constant 0 : i32
    return %arg0, %c0_i32, %c0_i32_0, %c0_i32_1 : i32, i32, i32, i32
  }
  func.func @transform_1(%arg0: i32) -> (i32, i32, i32, i32) {
    %c0_i32 = arith.constant 0 : i32
    %c0_i32_0 = arith.constant 0 : i32
    %c0_i32_1 = arith.constant 0 : i32
    %c0_i32_2 = arith.constant 0 : i32
    return %arg0, %c0_i32, %c0_i32_0, %c0_i32_1 : i32, i32, i32, i32
  }
  func.func @transform_2(%arg0: i32) -> (i32, i32) {
    %c0_i32 = arith.constant 0 : i32
    %c0_i32_0 = arith.constant 0 : i32
    %c0_i32_1 = arith.constant 0 : i32
    return %c0_i32, %c0_i32_0 : i32, i32
  }
  func.func @transform_3(%arg0: i32) -> (i32, i32) {
    %c0_i32 = arith.constant 0 : i32
    %c0_i32_0 = arith.constant 0 : i32
    %c0_i32_1 = arith.constant 0 : i32
    return %c0_i32, %c0_i32_0 : i32, i32
  }
  func.func @transform_4(%arg0: i32) -> (i32, i32) {
    %c0_i32 = arith.constant 0 : i32
    %c0_i32_0 = arith.constant 0 : i32
    %c0_i32_1 = arith.constant 0 : i32
    return %c0_i32, %c0_i32_0 : i32, i32
  }
  func.func @transform_5(%arg0: i32) -> (i32, i32) {
    %c0_i32 = arith.constant 0 : i32
    %c0_i32_0 = arith.constant 0 : i32
    %c0_i32_1 = arith.constant 0 : i32
    return %c0_i32, %c0_i32_0 : i32, i32
  }
  func.func @transform_6(%arg0: i32) -> (i32, i32) {
    %c0_i32 = arith.constant 0 : i32
    %c0_i32_0 = arith.constant 0 : i32
    %c0_i32_1 = arith.constant 0 : i32
    return %c0_i32, %c0_i32_0 : i32, i32
  }
  func.func @transform_7(%arg0: i32) -> (i32, i32) {
    %c0_i32 = arith.constant 0 : i32
    %c0_i32_0 = arith.constant 0 : i32
    %c0_i32_1 = arith.constant 0 : i32
    return %c0_i32, %c0_i32_0 : i32, i32
  }
  func.func @transform_8(%arg0: i32) -> (i32, i32, i32) {
    %c0_i32 = arith.constant 0 : i32
    %c0_i32_0 = arith.constant 0 : i32
    %c0_i32_1 = arith.constant 0 : i32
    return %arg0, %c0_i32, %c0_i32_0 : i32, i32, i32
  }
}

module attributes {stable_mosaic.version = 11 : i64} {
  func.func @_tail_kernel(%arg0: i32, %arg1: memref<128x128xf32, #tpu.memory_space<vmem>>, %arg2: memref<128x128xf32, #tpu.memory_space<vmem>>, %arg3: memref<128x256xf32, #tpu.memory_space<vmem>>, %arg4: memref<128x128xbf16, #tpu.memory_space<vmem>>, %arg5: memref<1x128xf32, #tpu.memory_space<vmem>>, %arg6: memref<128x256xbf16, #tpu.memory_space<vmem>>, %arg7: memref<1x256xf32, #tpu.memory_space<vmem>>, %arg8: memref<128x256xf32, #tpu.memory_space<vmem>>) attributes {dimension_semantics = [#tpu.dimension_semantics<parallel>], iteration_bounds = array<i64: 2>, scalar_prefetch = 0 : i64, scratch_operands = 0 : i64, tpu.core_type = #tpu.core_type<tc>, window_params = [{transform_indices = @transform_0, window_bounds = array<i64: 128, 128>}, {transform_indices = @transform_1, window_bounds = array<i64: 128, 128>}, {transform_indices = @transform_2, window_bounds = array<i64: 128, 256>}, {pipeline_mode = #tpu.pipeline_mode<synchronous>, transform_indices = @transform_3, window_bounds = array<i64: 128, 128>}, {pipeline_mode = #tpu.pipeline_mode<synchronous>, transform_indices = @transform_4, window_bounds = array<i64: 1, 128>}, {pipeline_mode = #tpu.pipeline_mode<synchronous>, transform_indices = @transform_5, window_bounds = array<i64: 128, 256>}, {pipeline_mode = #tpu.pipeline_mode<synchronous>, transform_indices = @transform_6, window_bounds = array<i64: 1, 256>}, {transform_indices = @transform_7, window_bounds = array<i64: 128, 256>}]} {
    %c0 = arith.constant 0 : index
    %c0_0 = arith.constant 0 : index
    %0 = vector.load %arg1[%c0, %c0_0] : memref<128x128xf32, #tpu.memory_space<vmem>>, vector<128x128xf32>
    %1 = arith.truncf %0 : vector<128x128xf32> to vector<128x128xbf16>
    %c0_1 = arith.constant 0 : index
    %c0_2 = arith.constant 0 : index
    %2 = vector.load %arg4[%c0_1, %c0_2] : memref<128x128xbf16, #tpu.memory_space<vmem>>, vector<128x128xbf16>
    %cst = arith.constant dense<0.000000e+00> : vector<128x128xf32>
    %3 = tpu.matmul %1, %2, %cst {dimension_numbers = #tpu.dot_dimension_numbers<[1], [0], [0], [1], [0, 0, 1, 1], [], []>} : vector<128x128xbf16>, vector<128x128xbf16>, vector<128x128xf32> -> vector<128x128xf32>
    %c0_3 = arith.constant 0 : index
    %c0_4 = arith.constant 0 : index
    %4 = vector.load %arg5[%c0_3, %c0_4] : memref<1x128xf32, #tpu.memory_space<vmem>>, vector<1x128xf32>
    %5 = vector.broadcast %4 : vector<1x128xf32> to vector<128x128xf32>
    %6 = arith.addf %3, %5 : vector<128x128xf32>
    %c0_5 = arith.constant 0 : index
    %c0_6 = arith.constant 0 : index
    %7 = vector.load %arg2[%c0_5, %c0_6] : memref<128x128xf32, #tpu.memory_space<vmem>>, vector<128x128xf32>
    %8 = arith.addf %7, %6 : vector<128x128xf32>
    %9 = arith.truncf %8 : vector<128x128xf32> to vector<128x128xbf16>
    %c0_7 = arith.constant 0 : index
    %c0_8 = arith.constant 0 : index
    %10 = vector.load %arg6[%c0_7, %c0_8] : memref<128x256xbf16, #tpu.memory_space<vmem>>, vector<128x256xbf16>
    %cst_9 = arith.constant dense<0.000000e+00> : vector<128x256xf32>
    %11 = tpu.matmul %9, %10, %cst_9 {dimension_numbers = #tpu.dot_dimension_numbers<[1], [0], [0], [1], [0, 0, 1, 1], [], []>} : vector<128x128xbf16>, vector<128x256xbf16>, vector<128x256xf32> -> vector<128x256xf32>
    %c0_10 = arith.constant 0 : index
    %c0_11 = arith.constant 0 : index
    %12 = vector.load %arg7[%c0_10, %c0_11] : memref<1x256xf32, #tpu.memory_space<vmem>>, vector<1x256xf32>
    %13 = vector.broadcast %12 : vector<1x256xf32> to vector<128x256xf32>
    %14 = arith.addf %11, %13 : vector<128x256xf32>
    %cst_12 = arith.constant 0.000000e+00 : f32
    %15 = vector.broadcast %cst_12 : f32 to vector<128x256xf32>
    %16 = arith.subf %15, %14 : vector<128x256xf32>
    %17 = math.exp %16 : vector<128x256xf32>
    %cst_13 = arith.constant 1.000000e+00 : f32
    %18 = vector.broadcast %cst_13 : f32 to vector<128x256xf32>
    %19 = arith.addf %18, %17 : vector<128x256xf32>
    %20 = tpu.reciprocal %19 {approx = true} : vector<128x256xf32> -> vector<128x256xf32>
    %c0_14 = arith.constant 0 : index
    %c0_15 = arith.constant 0 : index
    %21 = vector.load %arg3[%c0_14, %c0_15] : memref<128x256xf32, #tpu.memory_space<vmem>>, vector<128x256xf32>
    %22 = arith.mulf %21, %20 : vector<128x256xf32>
    %c0_16 = arith.constant 0 : index
    %c0_17 = arith.constant 0 : index
    %23 = vector.load %arg8[%c0_16, %c0_17] : memref<128x256xf32, #tpu.memory_space<vmem>>, vector<128x256xf32>
    tpu.vector_store %arg8[%c0_16, %c0_17], %22 {strides = array<i32>} : memref<128x256xf32, #tpu.memory_space<vmem>>, vector<128x256xf32>,
    return
  }
  func.func @transform_0(%arg0: i32) -> (i32, i32) {
    %c0_i32 = arith.constant 0 : i32
    %c0_i32_0 = arith.constant 0 : i32
    return %arg0, %c0_i32 : i32, i32
  }
  func.func @transform_1(%arg0: i32) -> (i32, i32) {
    %c0_i32 = arith.constant 0 : i32
    %c0_i32_0 = arith.constant 0 : i32
    return %arg0, %c0_i32 : i32, i32
  }
  func.func @transform_2(%arg0: i32) -> (i32, i32) {
    %c0_i32 = arith.constant 0 : i32
    %c0_i32_0 = arith.constant 0 : i32
    return %arg0, %c0_i32 : i32, i32
  }
  func.func @transform_3(%arg0: i32) -> (i32, i32) {
    %c0_i32 = arith.constant 0 : i32
    %c0_i32_0 = arith.constant 0 : i32
    %c0_i32_1 = arith.constant 0 : i32
    return %c0_i32, %c0_i32_0 : i32, i32
  }
  func.func @transform_4(%arg0: i32) -> (i32, i32) {
    %c0_i32 = arith.constant 0 : i32
    %c0_i32_0 = arith.constant 0 : i32
    %c0_i32_1 = arith.constant 0 : i32
    return %c0_i32, %c0_i32_0 : i32, i32
  }
  func.func @transform_5(%arg0: i32) -> (i32, i32) {
    %c0_i32 = arith.constant 0 : i32
    %c0_i32_0 = arith.constant 0 : i32
    %c0_i32_1 = arith.constant 0 : i32
    return %c0_i32, %c0_i32_0 : i32, i32
  }
  func.func @transform_6(%arg0: i32) -> (i32, i32) {
    %c0_i32 = arith.constant 0 : i32
    %c0_i32_0 = arith.constant 0 : i32
    %c0_i32_1 = arith.constant 0 : i32
    return %c0_i32, %c0_i32_0 : i32, i32
  }
  func.func @transform_7(%arg0: i32) -> (i32, i32) {
    %c0_i32 = arith.constant 0 : i32
    %c0_i32_0 = arith.constant 0 : i32
    return %arg0, %c0_i32 : i32, i32
  }
}

</mosaic_0001>

<bundles_post_ra>
// kernel: esa_forward.3
= control target key start
LH: loop header
LB: loop body
LE: loop exit
PB: predicated region body
PF: predicated region fallthrough
CT: control target
= control target key end

     0   :  { %s692_s12 = smov 0   ;;  %s834_s0 = inlined_call_operand.vmem [shape: f32[256,256], index: 0, kind: input, shape index: {}]   ;;  %s835_s1 = inlined_call_operand.vmem [shape: bf16[256,128], index: 1, kind: input, shape index: {}]   ;;  %s836_s2 = inlined_call_operand.vmem [shape: f32[1,128], index: 2, kind: input, shape index: {}]   ;;  %s837_s3 = inlined_call_operand.vmem [shape: f32[256,128], index: 3, kind: output, shape index: {}]  }
   0x1 LB: > { %s530_s13 = sadd.s32 4294967295, %s670_s12   ;;  %p534_p0 = scmp.ge.s32.totalorder %s670_s12, 1  ;;  %s670_s12 = sphi %s692_s12, %s13_s12  }
   0x2   : > { %p139_p1 = scmp.lt.s32.totalorder %s670_s12, 3 }
   0x4   : > { %p140_p2 = pnand %p534_p0, %p139_p1 }
   0x5   : > { %v648_v0 = vld [vmem:[%s835_s1 + $0x40] sm:$0xff] (!%p140_p2)   ;;  %s535_s16 = sshll.u32 (!%p140_p2), %s530_s13, 4  ;;  %v650_v2 = vld [vmem:[%s835_s1 + $0x48] sm:$0xff] (!%p140_p2)   ;;  %v652_v4 = vld [vmem:[%s835_s1 + $0x50] sm:$0xff] (!%p140_p2)  }
   0x6   : > { %143 = sbr.rel (%p140_p2) target bundleno = 282 (0x11a), region = 32  ;;  %v649_v1 = vld [vmem:[%s835_s1] sm:$0xff] (!%p140_p2)   ;;  %560 = vmatprep.subr.bf16.mxu0 (!%p140_p2), %v648_v0  ;;  %624 = vmatprep.subr.bf16.mxu1 (!%p140_p2), %v648_v0  ;;  %p165_p3 = scmp.lt.s32.totalorder (!%p140_p2), %s535_s16, 31  ;;  %v651_v3 = vld [vmem:[%s835_s1 + $0x8] sm:$0xff] (!%p140_p2)   ;;  %v653_v5 = vld [vmem:[%s835_s1 + $0x10] sm:$0xff] (!%p140_p2)  }
   0x7   : > { %561 = vmatpush3.bf16.msra.mxu0 (!%p140_p2), %v649_v1  ;;  %632 = vmatpush3.bf16.msra.mxu1 (!%p140_p2), %v649_v1  ;;  %v654_v6 = vld [vmem:[%s835_s1 + $0x58] sm:$0xff] (!%p140_p2)   ;;  %v656_v8 = vld [vmem:[%s835_s1 + $0x60] sm:$0xff] (!%p140_p2)   ;;  %v658_v10 = vld [vmem:[%s835_s1 + $0x68] sm:$0xff] (!%p140_p2)  }
   0x8   : > { %562 = vmatprep.subr.bf16.mxu0 (!%p140_p2), %v650_v2  ;;  %625 = vmatprep.subr.bf16.mxu1 (!%p140_p2), %v650_v2  ;;  %v655_v7 = vld [vmem:[%s835_s1 + $0x18] sm:$0xff] (!%p140_p2)   ;;  %v657_v9 = vld [vmem:[%s835_s1 + $0x20] sm:$0xff] (!%p140_p2)   ;;  %v659_v17 = vld [vmem:[%s835_s1 + $0x28] sm:$0xff] (!%p140_p2)  }
   0x9   : > { %v660_v18 = vld [vmem:[%s835_s1 + $0x70] sm:$0xff] (!%p140_p2)   ;;  %v662_v20 = vld [vmem:[%s835_s1 + $0x78] sm:$0xff] (!%p140_p2)   ;;  %v792_v2 = vld [vmem:[%s836_s2] ss:$0 sm:$0xff] (!%p140_p2) }
   0xa   : > { %v661_v19 = vld [vmem:[%s835_s1 + $0x30] sm:$0xff] (!%p140_p2)   ;;  %v663_v21 = vld [vmem:[%s835_s1 + $0x38] sm:$0xff] (!%p140_p2)  }
   0xb   : > { %563 = vmatpush3.bf16.msra.mxu0 (!%p140_p2), %v651_v3  ;;  %633 = vmatpush3.bf16.msra.mxu1 (!%p140_p2), %v651_v3 }
   0xc   : > { %564 = vmatprep.subr.bf16.mxu0 (!%p140_p2), %v652_v4  ;;  %626 = vmatprep.subr.bf16.mxu1 (!%p140_p2), %v652_v4 }
   0xd   : > { %s839_s16 = smov (!%p165_p3, %s535_s16), 31 }
   0xe   : > { %s559_s29 = sshll.u32 %s839_s16, 4  ;;  %s539_s26 = sshll.u32 %s839_s16, 3 }
   0xf   : > { %565 = vmatpush3.bf16.msra.mxu0 %v653_v5  ;;  %634 = vmatpush3.bf16.msra.mxu1 %v653_v5  ;;  %s733_s9 = scalar_lea.vmem %s834_s0, %s559_s29  ;;  %s797_s4 = scalar_lea.vmem %s837_s3, %s539_s26 }
  0x10   : > { %566 = vmatprep.subr.bf16.mxu0 %v654_v6  ;;  %627 = vmatprep.subr.bf16.mxu1 %v654_v6  ;;  %v179_v11 = vld [vmem:[%s733_s9 + $0x8] sm:$0xff]  ;;  %v181_v12 = vld [vmem:[%s733_s9 + $0x18] sm:$0xff]  ;;  %v178_v22 = vld [vmem:[%s733_s9] sm:$0xff] }
  0x11   : > { %v195_v13 = vld [vmem:[%s733_s9 + $0x88] sm:$0xff]  ;;  %v211_v14 = vpack.c.bf16 %v181_v12, %v179_v11  ;;  %v197_v15 = vld [vmem:[%s733_s9 + $0x98] sm:$0xff]  ;;  %v180_v23 = vld [vmem:[%s733_s9 + $0x10] sm:$0xff] }
  0x12   : > { %v219_v16 = vpack.c.bf16 %v197_v15, %v195_v13  ;;  %v194_v24 = vld [vmem:[%s733_s9 + $0x80] sm:$0xff]  ;;  %v196_v25 = vld [vmem:[%s733_s9 + $0x90] sm:$0xff]  ;;  %v183_v26 = vld [vmem:[%s733_s9 + $0x28] sm:$0xff]  ;;  %v210_v30 = vpack.c.bf16 %v180_v23, %v178_v22 }
  0x13   : > { %567 = vmatpush3.bf16.msra.mxu0 %v655_v7  ;;  %635 = vmatpush3.bf16.msra.mxu1 %v655_v7  ;;  %v185_v27 = vld [vmem:[%s733_s9 + $0x38] sm:$0xff]  ;;  %v199_v28 = vld [vmem:[%s733_s9 + $0xa8] sm:$0xff]  ;;  %v218_v31 = vpack.c.bf16 %v196_v25, %v194_v24  ;;  %v182_v34 = vld [vmem:[%s733_s9 + $0x20] sm:$0xff] }
  0x14   : > { %568 = vmatprep.subr.bf16.mxu0 %v656_v8  ;;  %628 = vmatprep.subr.bf16.mxu1 %v656_v8  ;;  %v201_v29 = vld [vmem:[%s733_s9 + $0xb8] sm:$0xff]  ;;  %v213_v32 = vpack.c.bf16 %v185_v27, %v183_v26  ;;  %v184_v35 = vld [vmem:[%s733_s9 + $0x30] sm:$0xff]  ;;  %v198_v36 = vld [vmem:[%s733_s9 + $0xa0] sm:$0xff] }
  0x15   : > { %393 = vmatprep.mubr.bf16.mxu0 %v211_v14  ;;  %425 = vmatprep.mubr.bf16.mxu1 %v219_v16  ;;  %v221_v33 = vpack.c.bf16 %v201_v29, %v199_v28  ;;  %v200_v37 = vld [vmem:[%s733_s9 + $0xb0] sm:$0xff]  ;;  %v187_v38 = vld [vmem:[%s733_s9 + $0x48] sm:$0xff]  ;;  %v189_v39 = vld [vmem:[%s733_s9 + $0x58] sm:$0xff]  ;;  %v212_v42 = vpack.c.bf16 %v184_v35, %v182_v34 }
  0x16   : > { %v203_v40 = vld [vmem:[%s733_s9 + $0xc8] sm:$0xff]  ;;  %v205_v41 = vld [vmem:[%s733_s9 + $0xd8] sm:$0xff]  ;;  %v220_v43 = vpack.c.bf16 %v200_v37, %v198_v36  ;;  %v215_v44 = vpack.c.bf16 %v189_v39, %v187_v38  ;;  %v186_v46 = vld [vmem:[%s733_s9 + $0x40] sm:$0xff] }
  0x17   : > { %569 = vmatpush3.bf16.msra.mxu0 %v657_v9  ;;  %636 = vmatpush3.bf16.msra.mxu1 %v657_v9  ;;  %v223_v45 = vpack.c.bf16 %v205_v41, %v203_v40  ;;  %v188_v47 = vld [vmem:[%s733_s9 + $0x50] sm:$0xff]  ;;  %v202_v48 = vld [vmem:[%s733_s9 + $0xc0] sm:$0xff]  ;;  %v191_v50 = vld [vmem:[%s733_s9 + $0x68] sm:$0xff] }
  0x18   : > { %570 = vmatprep.subr.bf16.mxu0 %v658_v10  ;;  %629 = vmatprep.subr.bf16.mxu1 %v658_v10  ;;  %v204_v49 = vld [vmem:[%s733_s9 + $0xd0] sm:$0xff]  ;;  %v193_v51 = vld [vmem:[%s733_s9 + $0x78] sm:$0xff]  ;;  %v207_v52 = vld [vmem:[%s733_s9 + $0xe8] sm:$0xff]  ;;  %v214_v54 = vpack.c.bf16 %v188_v47, %v186_v46 }
  0x19   : > { %v209_v53 = vld [vmem:[%s733_s9 + $0xf8] sm:$0xff]  ;;  %v222_v55 = vpack.c.bf16 %v204_v49, %v202_v48  ;;  %v217_v56 = vpack.c.bf16 %v193_v51, %v191_v50  ;;  %v190_v58 = vld [vmem:[%s733_s9 + $0x60] sm:$0xff]  ;;  %v192_v59 = vld [vmem:[%s733_s9 + $0x70] sm:$0xff] }
  0x1a   : > { %v225_v57 = vpack.c.bf16 %v209_v53, %v207_v52  ;;  %v206_v60 = vld [vmem:[%s733_s9 + $0xe0] sm:$0xff]  ;;  %v208_v61 = vld [vmem:[%s733_s9 + $0xf0] sm:$0xff]  ;;  %v216_v62 = vpack.c.bf16 %v192_v59, %v190_v58 }
  0x1b   : > { %571 = vmatpush3.bf16.msra.mxu0 %v659_v17  ;;  %637 = vmatpush3.bf16.msra.mxu1 %v659_v17  ;;  %v224_v63 = vpack.c.bf16 %v208_v61, %v206_v60 }
  0x1c   : > { %572 = vmatprep.subr.bf16.mxu0 %v660_v18  ;;  %630 = vmatprep.subr.bf16.mxu1 %v660_v18 }
  0x1f   : > { %573 = vmatpush3.bf16.msra.mxu0 %v661_v19  ;;  %638 = vmatpush3.bf16.msra.mxu1 %v661_v19 }
  0x20   : > { %574 = vmatprep.subr.bf16.mxu0 %v662_v20  ;;  %631 = vmatprep.subr.bf16.mxu1 %v662_v20 }
  0x23   : > { %575 = vmatpush3.bf16.msra.mxu0 %v663_v21  ;;  %639 = vmatpush3.bf16.msra.mxu1 %v663_v21 }
  0x26   : > { %394 = vmatmul.mubr.bf16.vlgmr.msra.gmra.mrb[0].mxu0 %v210_v30  ;;  %426 = vmatmul.mubr.bf16.vlgmr.msra.gmra.mrb[0].mxu1 %v218_v31 }
  0x27   : > { %401 = vmatprep.mubr.bf16.mxu0 %v213_v32  ;;  %433 = vmatprep.mubr.bf16.mxu1 %v221_v33 }
  0x2e   : > { %402 = vmatmul.mubr.bf16.gmra.mrb[4].mxu0 %v212_v42  ;;  %434 = vmatmul.mubr.bf16.gmra.mrb[4].mxu1 %v220_v43 }
  0x2f   : > { %409 = vmatprep.mubr.bf16.mxu0 %v215_v44  ;;  %441 = vmatprep.mubr.bf16.mxu1 %v223_v45 }
  0x36   : > { %410 = vmatmul.mubr.bf16.gmra.mrb[8].mxu0 %v214_v54  ;;  %442 = vmatmul.mubr.bf16.gmra.mrb[8].mxu1 %v222_v55 }
  0x37   : > { %417 = vmatprep.mubr.bf16.mxu0 %v217_v56  ;;  %449 = vmatprep.mubr.bf16.mxu1 %v225_v57 }
  0x3e   : > { %418 = vmatmul.mubr.bf16.gmra.mrb[12].mxu0 %v216_v62  ;;  %450 = vmatmul.mubr.bf16.gmra.mrb[12].mxu1 %v224_v63 }
  0xf9   : > { %v576_v0 = vpop.f32.mrb[0].mxu0  ;;  %v600_v1 = vpop.f32.mrb[0].mxu1 }
  0xfa   : > { %v577_v3 = vpop.f32.mrb[1].mxu0  ;;  %v601_v4 = vpop.f32.mrb[1].mxu1 }
  0xfb   : > { %v578_v5 = vadd.f32 %v577_v3, %v576_v0  ;;  %v602_v6 = vadd.f32 %v601_v4, %v600_v1  ;;  %v579_v7 = vpop.f32.mrb[2].mxu0  ;;  %v603_v8 = vpop.f32.mrb[2].mxu1 }
  0xfc   : > { %v580_v9 = vpop.f32.mrb[3].mxu0  ;;  %v604_v10 = vpop.f32.mrb[3].mxu1 }
  0xfd   : > { %v396_v11 = vadd.f32 %v578_v5, %v792_v2  ;;  %v428_v12 = vadd.f32 %v602_v6, %v792_v2  ;;  %v581_v13 = vadd.f32 %v580_v9, %v579_v7  ;;  %v605_v14 = vadd.f32 %v604_v10, %v603_v8 }
  0xff   : > { %458 = vst [vmem:[%s797_s4] sm:$0xff] %v396_v11  ;;  %466 = vst [vmem:[%s797_s4 + $0x40] sm:$0xff] %v428_v12  ;;  %v399_v15 = vadd.f32 %v581_v13, %v792_v2  ;;  %v431_v16 = vadd.f32 %v605_v14, %v792_v2 }
 0x101   : > { %459 = vst [vmem:[%s797_s4 + $0x8] sm:$0xff] %v399_v15  ;;  %467 = vst [vmem:[%s797_s4 + $0x48] sm:$0xff] %v431_v16  ;;  %v582_v17 = vpop.f32.mrb[4].mxu0  ;;  %v606_v18 = vpop.f32.mrb[4].mxu1 }
 0x102   : > { %v583_v19 = vpop.f32.mrb[5].mxu0  ;;  %v607_v20 = vpop.f32.mrb[5].mxu1 }
 0x103   : > { %v584_v21 = vadd.f32 %v583_v19, %v582_v17  ;;  %v608_v22 = vadd.f32 %v607_v20, %v606_v18  ;;  %v585_v23 = vpop.f32.mrb[6].mxu0  ;;  %v609_v24 = vpop.f32.mrb[6].mxu1 }
 0x104   : > { %v586_v25 = vpop.f32.mrb[7].mxu0  ;;  %v610_v26 = vpop.f32.mrb[7].mxu1 }
 0x105   : > { %v404_v27 = vadd.f32 %v584_v21, %v792_v2  ;;  %v436_v28 = vadd.f32 %v608_v22, %v792_v2  ;;  %v587_v29 = vadd.f32 %v586_v25, %v585_v23  ;;  %v611_v30 = vadd.f32 %v610_v26, %v609_v24 }
 0x107   : > { %460 = vst [vmem:[%s797_s4 + $0x10] sm:$0xff] %v404_v27  ;;  %468 = vst [vmem:[%s797_s4 + $0x50] sm:$0xff] %v436_v28  ;;  %v407_v31 = vadd.f32 %v587_v29, %v792_v2  ;;  %v439_v32 = vadd.f32 %v611_v30, %v792_v2 }
 0x109   : > { %461 = vst [vmem:[%s797_s4 + $0x18] sm:$0xff] %v407_v31  ;;  %469 = vst [vmem:[%s797_s4 + $0x58] sm:$0xff] %v439_v32  ;;  %v588_v33 = vpop.f32.mrb[8].mxu0  ;;  %v612_v34 = vpop.f32.mrb[8].mxu1 }
 0x10a   : > { %v589_v35 = vpop.f32.mrb[9].mxu0  ;;  %v613_v36 = vpop.f32.mrb[9].mxu1 }
 0x10b   : > { %v590_v37 = vadd.f32 %v589_v35, %v588_v33  ;;  %v614_v38 = vadd.f32 %v613_v36, %v612_v34  ;;  %v591_v39 = vpop.f32.mrb[10].mxu0  ;;  %v615_v40 = vpop.f32.mrb[10].mxu1 }
 0x10c   : > { %v592_v41 = vpop.f32.mrb[11].mxu0  ;;  %v616_v42 = vpop.f32.mrb[11].mxu1 }
 0x10d   : > { %v412_v43 = vadd.f32 %v590_v37, %v792_v2  ;;  %v444_v44 = vadd.f32 %v614_v38, %v792_v2  ;;  %v593_v45 = vadd.f32 %v592_v41, %v591_v39  ;;  %v617_v46 = vadd.f32 %v616_v42, %v615_v40 }
 0x10f   : > { %462 = vst [vmem:[%s797_s4 + $0x20] sm:$0xff] %v412_v43  ;;  %470 = vst [vmem:[%s797_s4 + $0x60] sm:$0xff] %v444_v44  ;;  %v415_v47 = vadd.f32 %v593_v45, %v792_v2  ;;  %v447_v48 = vadd.f32 %v617_v46, %v792_v2 }
 0x111   : > { %463 = vst [vmem:[%s797_s4 + $0x28] sm:$0xff] %v415_v47  ;;  %471 = vst [vmem:[%s797_s4 + $0x68] sm:$0xff] %v447_v48  ;;  %v594_v49 = vpop.f32.mrb[12].mxu0  ;;  %v618_v50 = vpop.f32.mrb[12].mxu1 }
 0x112   : > { %v595_v51 = vpop.f32.mrb[13].mxu0  ;;  %v619_v52 = vpop.f32.mrb[13].mxu1 }
 0x113   : > { %v596_v53 = vadd.f32 %v595_v51, %v594_v49  ;;  %v620_v54 = vadd.f32 %v619_v52, %v618_v50  ;;  %v597_v55 = vpop.f32.mrb[14].mxu0  ;;  %v621_v56 = vpop.f32.mrb[14].mxu1 }
 0x114   : > { %v598_v57 = vpop.f32.mrb[15].mxu0  ;;  %v622_v58 = vpop.f32.mrb[15].mxu1 }
 0x115   : > { %v420_v59 = vadd.f32 %v596_v53, %v792_v2  ;;  %v452_v60 = vadd.f32 %v620_v54, %v792_v2  ;;  %v599_v61 = vadd.f32 %v598_v57, %v597_v55  ;;  %v623_v62 = vadd.f32 %v622_v58, %v621_v56 }
 0x117   : > { %464 = vst [vmem:[%s797_s4 + $0x30] sm:$0xff] %v420_v59  ;;  %472 = vst [vmem:[%s797_s4 + $0x70] sm:$0xff] %v452_v60  ;;  %v423_v63 = vadd.f32 %v599_v61, %v792_v2  ;;  %v455_v0 = vadd.f32 %v623_v62, %v792_v2 }
 0x119   : > { %465 = vst [vmem:[%s797_s4 + $0x38] sm:$0xff] %v423_v63  ;;  %473 = vst [vmem:[%s797_s4 + $0x78] sm:$0xff] %v455_v0 }
 0x11a PF: > { %s13_s12 = sadd.s32 1, %s670_s12  }
 0x11b   : > { %p10_p4 = scmp.ge.s32.totalorder %s13_s12, 4  }
 0x11d   :  { %12 = sbr.rel (!%p10_p4) target bundleno = 1 (0x1), region = 62 }

// kernel: esa_forward.5
= control target key start
LH: loop header
LB: loop body
LE: loop exit
PB: predicated region body
PF: predicated region fallthrough
CT: control target
= control target key end

     0   :  { %s1449_s24 = smov 0   ;;  %s1728_s0 = inlined_call_operand.vmem [shape: f32[256,128], index: 0, kind: input, shape index: {}]   ;;  %s1729_s1 = inlined_call_operand.vmem [shape: f32[256,128], index: 1, kind: input, shape index: {}]   ;;  %s1730_s2 = inlined_call_operand.vmem [shape: f32[256,256], index: 2, kind: input, shape index: {}]   ;;  %s1731_s3 = inlined_call_operand.vmem [shape: bf16[128,128], index: 3, kind: input, shape index: {}]   ;;  %s1732_s4 = inlined_call_operand.vmem [shape: f32[1,128], index: 4, kind: input, shape index: {}]   ;;  %s1733_s5 = inlined_call_operand.vmem [shape: bf16[128,256], index: 5, kind: input, shape index: {}]   ;;  %s1734_s6 = inlined_call_operand.vmem [shape: f32[1,256], index: 6, kind: input, shape index: {}]   ;;  %s1735_s7 = inlined_call_operand.vmem [shape: f32[256,256], index: 7, kind: output, shape index: {}]  }
   0x1 LB: > { %s1123_s25 = sadd.s32 4294967295, %s1406_s24   ;;  %p1127_p0 = scmp.ge.s32.totalorder %s1406_s24, 1  ;;  %s1406_s24 = sphi %s1449_s24, %s17_s24  }
   0x2   : > { %p261_p1 = scmp.lt.s32.totalorder %s1406_s24, 3 }
   0x4   : > { %p262_p2 = pnand %p1127_p0, %p261_p1 }
   0x5   : > { %v1240_v0 = vld [vmem:[%s1731_s3] sm:$0xff] (!%p262_p2)   ;;  %s1128_s28 = sshll.u32 (!%p262_p2), %s1123_s25, 4  ;;  %v1241_v1 = vld [vmem:[%s1731_s3 + $0x8] sm:$0xff] (!%p262_p2)   ;;  %v1242_v2 = vld [vmem:[%s1731_s3 + $0x10] sm:$0xff] (!%p262_p2)   ;;  %v1408_v48 = vmov (!%p262_p2), 0  }
   0x6   : > { %265 = sbr.rel (%p262_p2) target bundleno = 565 (0x235), region = 48  ;;  %p306_p3 = scmp.lt.s32.totalorder (!%p262_p2), %s1128_s28, 31  ;;  %1183 = vmatprep.subr.bf16.mxu0 (!%p262_p2), %v1240_v0  ;;  %v1243_v3 = vld [vmem:[%s1731_s3 + $0x18] sm:$0xff] (!%p262_p2)   ;;  %v1244_v7 = vld [vmem:[%s1731_s3 + $0x20] sm:$0xff] (!%p262_p2)   ;;  %v1245_v9 = vld [vmem:[%s1731_s3 + $0x28] sm:$0xff] (!%p262_p2)   ;;  %724 = vmatprep.mubr.bf16.mxu1 (!%p262_p2), %v1408_v48 }
   0x7   : > { %1184 = vmatpush3.bf16.msra.mxu0 (!%p262_p2), %v1240_v0  ;;  %v1250_v8 = vld [vmem:[%s1733_s5 + $0x4] ss:$8 sps:$4 sm:$0xff] (!%p262_p2)   ;;  %v1248_v10 = vld [vmem:[%s1733_s5] ss:$8 sps:$4 sm:$0xff] (!%p262_p2)   ;;  %v1253_v11 = vld [vmem:[%s1733_s5 + $0x14] ss:$8 sps:$4 sm:$0xff] (!%p262_p2)  }
   0x8   : > { %1185 = vmatprep.subr.bf16.mxu0 (!%p262_p2), %v1241_v1  ;;  %1215 = vmatprep.subr.bf16.mxu1 (!%p262_p2), %v1250_v8  ;;  %v1246_v12 = vld [vmem:[%s1731_s3 + $0x30] sm:$0xff] (!%p262_p2)   ;;  %v1256_v14 = vld [vmem:[%s1733_s5 + $0x24] ss:$8 sps:$4 sm:$0xff] (!%p262_p2)   ;;  %v1254_v15 = vld [vmem:[%s1733_s5 + $0x20] ss:$8 sps:$4 sm:$0xff] (!%p262_p2)  }
   0x9   : > { %1223 = vmatpush1.bf16.msra.mxu1 (!%p262_p2), %v1248_v10  ;;  %v1251_v13 = vld [vmem:[%s1733_s5 + $0x10] ss:$8 sps:$4 sm:$0xff] (!%p262_p2)   ;;  %v1259_v17 = vld [vmem:[%s1733_s5 + $0x34] ss:$8 sps:$4 sm:$0xff] (!%p262_p2)   ;;  %v1262_v23 = vld [vmem:[%s1733_s5 + $0x44] ss:$8 sps:$4 sm:$0xff] (!%p262_p2)  }
   0xa   : > { %1216 = vmatprep.subr.bf16.mxu1 (!%p262_p2), %v1253_v11  ;;  %v1247_v16 = vld [vmem:[%s1731_s3 + $0x38] sm:$0xff] (!%p262_p2)   ;;  %v1260_v26 = vld [vmem:[%s1733_s5 + $0x40] ss:$8 sps:$4 sm:$0xff] (!%p262_p2)   ;;  %v1268_v44 = vld [vmem:[%s1733_s5 + $0x64] ss:$8 sps:$4 sm:$0xff] (!%p262_p2)  }
   0xb   : > { %1186 = vmatpush3.bf16.msra.mxu0 (!%p262_p2), %v1241_v1  ;;  %v1257_v20 = vld [vmem:[%s1733_s5 + $0x30] ss:$8 sps:$4 sm:$0xff] (!%p262_p2)   ;;  %v1265_v27 = vld [vmem:[%s1733_s5 + $0x54] ss:$8 sps:$4 sm:$0xff] (!%p262_p2)   ;;  %v1266_v45 = vld [vmem:[%s1733_s5 + $0x60] ss:$8 sps:$4 sm:$0xff] (!%p262_p2)  }
   0xc   : > { %1187 = vmatprep.subr.bf16.mxu0 (!%p262_p2), %v1242_v2  ;;  %v1263_v30 = vld [vmem:[%s1733_s5 + $0x50] ss:$8 sps:$4 sm:$0xff] (!%p262_p2)   ;;  %v1271_v46 = vld [vmem:[%s1733_s5 + $0x74] ss:$8 sps:$4 sm:$0xff] (!%p262_p2)   ;;  %v1567_v49 = vld [vmem:[%s1732_s4] ss:$0 sm:$0xff] (!%p262_p2) }
   0xd   : > { %s1737_s28 = smov (!%p306_p3, %s1128_s28), 31  ;;  %1224 = vmatpush1.bf16.msra.mxu1 %v1251_v13  ;;  %v1269_v47 = vld [vmem:[%s1733_s5 + $0x70] ss:$8 sps:$4 sm:$0xff]  }
   0xe   : > { %s1129_s10 = sshll.u32 %s1737_s28, 3  ;;  %1217 = vmatprep.subr.bf16.mxu1 %v1256_v14  ;;  %s1165_s23 = sshll.u32 %s1737_s28, 4 }
   0xf   : > { %s1474_s13 = scalar_lea.vmem %s1728_s0, %s1129_s10  ;;  %1188 = vmatpush3.bf16.msra.mxu0 %v1242_v2  ;;  %s1562_s19 = scalar_lea.vmem %s1729_s1, %s1129_s10 }
  0x10   : > { %v332_v4 = vld [vmem:[%s1474_s13] sm:$0xff]  ;;  %v333_v5 = vld [vmem:[%s1474_s13 + $0x8] sm:$0xff]  ;;  %1189 = vmatprep.subr.bf16.mxu0 %v1243_v3  ;;  %v334_v18 = vld [vmem:[%s1474_s13 + $0x10] sm:$0xff]  ;;  %s1636_s27 = scalar_lea.vmem %s1730_s2, %s1165_s23  ;;  %s1647_s8 = scalar_lea.vmem %s1735_s7, %s1165_s23 }
  0x11   : > { %v348_v6 = vpack.c.bf16 %v333_v5, %v332_v4  ;;  %1225 = vmatpush1.bf16.msra.mxu1 %v1254_v15  ;;  %v335_v19 = vld [vmem:[%s1474_s13 + $0x18] sm:$0xff]  ;;  %v336_v21 = vld [vmem:[%s1474_s13 + $0x20] sm:$0xff]  ;;  %v337_v22 = vld [vmem:[%s1474_s13 + $0x28] sm:$0xff] }
  0x12   : > { %1218 = vmatprep.subr.bf16.mxu1 %v1259_v17  ;;  %v349_v24 = vpack.c.bf16 %v335_v19, %v334_v18  ;;  %v350_v25 = vpack.c.bf16 %v337_v22, %v336_v21  ;;  %v338_v28 = vld [vmem:[%s1474_s13 + $0x30] sm:$0xff]  ;;  %v339_v29 = vld [vmem:[%s1474_s13 + $0x38] sm:$0xff]  ;;  %v340_v31 = vld [vmem:[%s1474_s13 + $0x40] sm:$0xff] }
  0x13   : > { %1199 = vmatprep.mubr.bf16.mxu0 %v348_v6  ;;  %1190 = vmatpush3.bf16.msra.mxu0 %v1243_v3  ;;  %v341_v32 = vld [vmem:[%s1474_s13 + $0x48] sm:$0xff]  ;;  %v351_v33 = vpack.c.bf16 %v339_v29, %v338_v28  ;;  %v342_v35 = vld [vmem:[%s1474_s13 + $0x50] sm:$0xff]  ;;  %v343_v36 = vld [vmem:[%s1474_s13 + $0x58] sm:$0xff] }
  0x14   : > { %1191 = vmatprep.subr.bf16.mxu0 %v1244_v7  ;;  %v352_v34 = vpack.c.bf16 %v341_v32, %v340_v31  ;;  %v344_v37 = vld [vmem:[%s1474_s13 + $0x60] sm:$0xff]  ;;  %v345_v38 = vld [vmem:[%s1474_s13 + $0x68] sm:$0xff]  ;;  %v353_v39 = vpack.c.bf16 %v343_v36, %v342_v35  ;;  %v346_v41 = vld [vmem:[%s1474_s13 + $0x70] sm:$0xff] }
  0x15   : > { %1226 = vmatpush1.bf16.msra.mxu1 %v1257_v20  ;;  %v354_v40 = vpack.c.bf16 %v345_v38, %v344_v37  ;;  %v347_v42 = vld [vmem:[%s1474_s13 + $0x78] sm:$0xff]  ;;  %v526_v51 = vld [vmem:[%s1562_s19 + $0x10] sm:$0xff]  ;;  %v524_v54 = vld [vmem:[%s1562_s19] sm:$0xff] }
  0x16   : > { %1219 = vmatprep.subr.bf16.mxu1 %v1262_v23  ;;  %v355_v43 = vpack.c.bf16 %v347_v42, %v346_v41  ;;  %v527_v57 = vld [vmem:[%s1562_s19 + $0x18] sm:$0xff]  ;;  %v525_v61 = vld [vmem:[%s1562_s19 + $0x8] sm:$0xff]  ;;  %v530_v5 = vld [vmem:[%s1562_s19 + $0x30] sm:$0xff] }
  0x17   : > { %1192 = vmatpush3.bf16.msra.mxu0 %v1244_v7  ;;  %v535_v29 = vld [vmem:[%s1562_s19 + $0x58] sm:$0xff]  ;;  %v538_v41 = vld [vmem:[%s1562_s19 + $0x70] sm:$0xff] }
  0x18   : > { %1193 = vmatprep.subr.bf16.mxu0 %v1245_v9 }
  0x19   : > { %1227 = vmatpush1.bf16.msra.mxu1 %v1260_v26 }
  0x1a   : > { %1220 = vmatprep.subr.bf16.mxu1 %v1265_v27 }
  0x1b   : > { %1194 = vmatpush3.bf16.msra.mxu0 %v1245_v9 }
  0x1c   : > { %1195 = vmatprep.subr.bf16.mxu0 %v1246_v12 }
  0x1d   : > { %1228 = vmatpush1.bf16.msra.mxu1 %v1263_v30 }
  0x1e   : > { %1221 = vmatprep.subr.bf16.mxu1 %v1268_v44 }
  0x1f   : > { %1196 = vmatpush3.bf16.msra.mxu0 %v1246_v12 }
  0x20   : > { %1197 = vmatprep.subr.bf16.mxu0 %v1247_v16 }
  0x21   : > { %1229 = vmatpush1.bf16.msra.mxu1 %v1266_v45 }
  0x22   : > { %1222 = vmatprep.subr.bf16.mxu1 %v1271_v46 }
  0x23   : > { %1198 = vmatpush3.bf16.msra.mxu0 %v1247_v16 }
  0x24   : > { %672 = vmatprep.subr.bf16.mxu0 %v1250_v8  ;;  %v528_v8 = vld [vmem:[%s1562_s19 + $0x20] sm:$0xff] }
  0x25   : > { %1230 = vmatpush1.bf16.msra.mxu1 %v1269_v47 }
  0x26   : > { %1200 = vmatmul.mubr.bf16.vlgmr.msra.gmra.mrb[0].mxu0 %v349_v24 }
  0x27   : > { %1203 = vmatprep.mubr.bf16.mxu0 %v350_v25  ;;  %673 = vmatpush1.bf16.msra.mxu0 %v1248_v10 }
  0x28   : > { %674 = vmatprep.subr.bf16.mxu0 %v1253_v11  ;;  %v531_v11 = vld [vmem:[%s1562_s19 + $0x38] sm:$0xff] }
  0x2b   : > { %675 = vmatpush1.bf16.msra.mxu0 %v1251_v13 }
  0x2c   : > { %676 = vmatprep.subr.bf16.mxu0 %v1256_v14 }
  0x2e   : > { %1204 = vmatmul.mubr.bf16.gmra.mrb[4].mxu0 %v351_v33  ;;  %v533_v33 = vld [vmem:[%s1562_s19 + $0x48] sm:$0xff] }
  0x2f   : > { %1207 = vmatprep.mubr.bf16.mxu0 %v352_v34  ;;  %677 = vmatpush1.bf16.msra.mxu0 %v1254_v15  ;;  %v529_v15 = vld [vmem:[%s1562_s19 + $0x28] sm:$0xff] }
  0x30   : > { %678 = vmatprep.subr.bf16.mxu0 %v1259_v17 }
  0x33   : > { %679 = vmatpush1.bf16.msra.mxu0 %v1257_v20 }
  0x34   : > { %680 = vmatprep.subr.bf16.mxu0 %v1262_v23  ;;  %v534_v23 = vld [vmem:[%s1562_s19 + $0x50] sm:$0xff] }
  0x36   : > { %1208 = vmatmul.mubr.bf16.gmra.mrb[8].mxu0 %v353_v39 }
  0x37   : > { %1211 = vmatprep.mubr.bf16.mxu0 %v354_v40  ;;  %681 = vmatpush1.bf16.msra.mxu0 %v1260_v26  ;;  %v532_v26 = vld [vmem:[%s1562_s19 + $0x40] sm:$0xff] }
  0x38   : > { %682 = vmatprep.subr.bf16.mxu0 %v1265_v27 }
  0x3b   : > { %683 = vmatpush1.bf16.msra.mxu0 %v1263_v30 }
  0x3c   : > { %684 = vmatprep.subr.bf16.mxu0 %v1268_v44  ;;  %v536_v44 = vld [vmem:[%s1562_s19 + $0x60] sm:$0xff] }
  0x3e   : > { %1212 = vmatmul.mubr.bf16.gmra.mrb[12].mxu0 %v355_v43 }
  0x3f   : > { %685 = vmatpush1.bf16.msra.mxu0 %v1266_v45  ;;  %704 = vmatprep.mubr.bf16.mxu0 %v1408_v48 }
  0x40   : > { %686 = vmatprep.subr.bf16.mxu0 %v1271_v46 }
  0x43   : > { %687 = vmatpush1.bf16.msra.mxu0 %v1269_v47  ;;  %v539_v47 = vld [vmem:[%s1562_s19 + $0x78] sm:$0xff] }
  0xf9   : > { %v1201_v50 = vpop.f32.mrb[0].mxu0 }
  0xfa   : > { %v470_v52 = vadd.f32 %v1201_v50, %v1567_v49  ;;  %v461_v53 = vpop.f32.mrb[1].mxu0 }
  0xfb   : > { %v462_v55 = vadd.f32 %v1567_v49, %v461_v53  ;;  %v1202_v56 = vpop.f32.mrb[2].mxu0  ;;  %v537_v53 = vld [vmem:[%s1562_s19 + $0x68] sm:$0xff] }
  0xfc   : > { %v542_v58 = vadd.f32 %v526_v51, %v470_v52  ;;  %v473_v59 = vadd.f32 %v1202_v56, %v1567_v49  ;;  %v464_v60 = vpop.f32.mrb[3].mxu0 }
  0xfd   : > { %v540_v62 = vadd.f32 %v524_v54, %v462_v55  ;;  %v465_v63 = vadd.f32 %v1567_v49, %v464_v60  ;;  %v582_v60 = vlaneseq }
  0xfe   : > { %v543_v0 = vadd.f32 %v527_v57, %v473_v59 }
  0xff   : > { %v541_v1 = vadd.f32 %v525_v61, %v465_v63  ;;  %v583_v61 = vshrl.u32 %v582_v60, 7 }
 0x100   : > { %v557_v2 = vpack.c.bf16 %v543_v0, %v542_v58 }
 0x101   : > { %v556_v3 = vpack.c.bf16 %v541_v1, %v540_v62  ;;  %v1205_v4 = vpop.f32.mrb[4].mxu0  ;;  %v584_v62 = vsub.s32 0, %v583_v61  ;;  %v588_v63 = vsub.s32 1, %v583_v61 }
 0x102   : > { %v486_v6 = vadd.f32 %v1205_v4, %v1567_v49  ;;  %v477_v7 = vpop.f32.mrb[5].mxu0 }
 0x103   : > { %v478_v9 = vadd.f32 %v1567_v49, %v477_v7  ;;  %v1206_v10 = vpop.f32.mrb[6].mxu0  ;;  %705 = vmatmul.mubr.bf16.vlgmr.msra.gmra.mrb[16].mxu0 %v556_v3 }
 0x104   : > { %v546_v12 = vadd.f32 %v530_v5, %v486_v6  ;;  %v489_v13 = vadd.f32 %v1206_v10, %v1567_v49  ;;  %v480_v14 = vpop.f32.mrb[7].mxu0  ;;  %714 = vmatprep.mubr.bf16.mxu0 %v1408_v48 }
 0x105   : > { %v544_v16 = vadd.f32 %v528_v8, %v478_v9  ;;  %v481_v17 = vadd.f32 %v1567_v49, %v480_v14 }
 0x106   : > { %v547_v18 = vadd.f32 %v531_v11, %v489_v13 }
 0x107   : > { %v545_v19 = vadd.f32 %v529_v15, %v481_v17 }
 0x108   : > { %v559_v20 = vpack.c.bf16 %v547_v18, %v546_v12 }
 0x109   : > { %v558_v21 = vpack.c.bf16 %v545_v19, %v544_v16  ;;  %v1209_v22 = vpop.f32.mrb[8].mxu0 }
 0x10a   : > { %v502_v24 = vadd.f32 %v1209_v22, %v1567_v49  ;;  %v493_v25 = vpop.f32.mrb[9].mxu0 }
 0x10b   : > { %715 = vmatmul.mubr.bf16.gmra.mrb[20].mxu0 %v557_v2  ;;  %725 = vmatmul.mubr.bf16.vlgmr.msra.gmra.mrb[0].mxu1 %v558_v21  ;;  %v494_v27 = vadd.f32 %v1567_v49, %v493_v25  ;;  %v1210_v28 = vpop.f32.mrb[10].mxu0 }
 0x10c   : > { %v550_v30 = vadd.f32 %v534_v23, %v502_v24  ;;  %v505_v31 = vadd.f32 %v1210_v28, %v1567_v49  ;;  %v496_v32 = vpop.f32.mrb[11].mxu0  ;;  %734 = vmatprep.mubr.bf16.mxu1 %v1408_v48 }
 0x10d   : > { %v548_v34 = vadd.f32 %v532_v26, %v494_v27  ;;  %v497_v35 = vadd.f32 %v1567_v49, %v496_v32 }
 0x10e   : > { %v551_v36 = vadd.f32 %v535_v29, %v505_v31 }
 0x10f   : > { %v549_v37 = vadd.f32 %v533_v33, %v497_v35 }
 0x110   : > { %v561_v38 = vpack.c.bf16 %v551_v36, %v550_v30 }
 0x111   : > { %v560_v39 = vpack.c.bf16 %v549_v37, %v548_v34  ;;  %v1213_v40 = vpop.f32.mrb[12].mxu0 }
 0x112   : > { %v518_v42 = vadd.f32 %v1213_v40, %v1567_v49  ;;  %v509_v43 = vpop.f32.mrb[13].mxu0 }
 0x113   : > { %735 = vmatmul.mubr.bf16.gmra.mrb[4].mxu1 %v559_v20  ;;  %v510_v45 = vadd.f32 %v1567_v49, %v509_v43  ;;  %v1214_v46 = vpop.f32.mrb[14].mxu0 }
 0x114   : > { %744 = vmatprep.mubr.bf16.mxu1 %v1408_v48  ;;  %v554_v50 = vadd.f32 %v538_v41, %v518_v42  ;;  %v521_v51 = vadd.f32 %v1214_v46, %v1567_v49  ;;  %v512_v52 = vpop.f32.mrb[15].mxu0 }
 0x115   : > { %v552_v54 = vadd.f32 %v536_v44, %v510_v45  ;;  %v513_v55 = vadd.f32 %v1567_v49, %v512_v52  ;;  %v580_v49 = vld [vmem:[%s1734_s6] sm:$0x3] }
 0x116   : > { %v555_v56 = vadd.f32 %v539_v47, %v521_v51  ;;  %v1610_v0 = vrot.slane %v580_v49, %v584_v62  ;;  %v1612_v1 = vrot.slane %v580_v49, %v588_v63 }
 0x117   : > { %v553_v57 = vadd.f32 %v537_v53, %v513_v55 }
 0x118   : > { %v563_v58 = vpack.c.bf16 %v555_v56, %v554_v50 }
 0x119   : > { %v562_v59 = vpack.c.bf16 %v553_v57, %v552_v54 }
 0x11b   : > { %745 = vmatmul.mubr.bf16.gmra.mrb[8].mxu1 %v560_v39 }
 0x11c   : > { %754 = vmatprep.mubr.bf16.mxu1 %v1408_v48 }
 0x123   : > { %755 = vmatmul.mubr.bf16.gmra.mrb[12].mxu1 %v561_v38 }
 0x124   : > { %764 = vmatprep.mubr.bf16.mxu1 %v1408_v48 }
 0x12b   : > { %765 = vmatmul.mubr.bf16.gmra.mrb[16].mxu1 %v562_v59 }
 0x12c   : > { %774 = vmatprep.mubr.bf16.mxu1 %v1408_v48 }
 0x133   : > { %775 = vmatmul.mubr.bf16.gmra.mrb[20].mxu1 %v563_v58 }
 0x1d6   : > { %v706_v2 = vpop.f32.mrb[16].mxu0 }
 0x1d7   : > { %v707_v3 = vadd.f32 %v706_v2, %v1610_v0  ;;  %v708_v4 = vpop.f32.mrb[17].mxu0 }
 0x1d8   : > { %v709_v5 = vadd.f32 %v708_v4, %v1612_v1  ;;  %v710_v48 = vpop.f32.mrb[18].mxu0 }
 0x1d9   : > { %v785_v6 = vsub.f32 0.0, %v707_v3  ;;  %v711_v7 = vadd.f32 %v710_v48, %v1610_v0  ;;  %v712_v8 = vpop.f32.mrb[19].mxu0 }
 0x1da   : > { %v786_v9 = vsub.f32 0.0, %v709_v5  ;;  %v713_v10 = vadd.f32 %v712_v8, %v1612_v1 }
 0x1db   : > { %v817_v11 = vmul.f32 1.442695, %v785_v6  ;;  %v787_v12 = vsub.f32 0.0, %v711_v7 }
 0x1dc   : > { %v819_v13 = vmul.f32 1.442695, %v786_v9  ;;  %v788_v14 = vsub.f32 0.0, %v713_v10 }
 0x1dd   : > { %1272 = vpow2.f32 %v817_v11  ;;  %v821_v15 = vmul.f32 1.442695, %v787_v12 }
 0x1de   : > { %1274 = vpow2.f32 %v819_v13  ;;  %v823_v16 = vmul.f32 1.442695, %v788_v14  ;;  %v716_v17 = vpop.f32.mrb[20].mxu0  ;;  %v726_v18 = vpop.f32.mrb[0].mxu1 }
 0x1df   : > { %1276 = vpow2.f32 %v821_v15  ;;  %v717_v19 = vadd.f32 %v716_v17, %v1610_v0  ;;  %v727_v20 = vadd.f32 %v726_v18, %v1610_v0  ;;  %v718_v21 = vpop.f32.mrb[21].mxu0  ;;  %v728_v22 = vpop.f32.mrb[1].mxu1 }
 0x1e0   : > { %1278 = vpow2.f32 %v823_v16  ;;  %v719_v23 = vadd.f32 %v718_v21, %v1612_v1  ;;  %v729_v24 = vadd.f32 %v728_v22, %v1612_v1  ;;  %v720_v25 = vpop.f32.mrb[22].mxu0  ;;  %v730_v26 = vpop.f32.mrb[2].mxu1 }
 0x1e1   : > { %v789_v27 = vsub.f32 0.0, %v717_v19  ;;  %v793_v28 = vsub.f32 0.0, %v727_v20  ;;  %v721_v29 = vadd.f32 %v720_v25, %v1610_v0  ;;  %v722_v30 = vpop.f32.mrb[23].mxu0  ;;  %v732_v31 = vpop.f32.mrb[3].mxu1  ;;  %v731_v34 = vadd.f32 %v730_v26, %v1610_v0  ;;  %v945_v19 = vld [vmem:[%s1636_s27] sm:$0xff] }
 0x1e2   : > { %v790_v32 = vsub.f32 0.0, %v719_v23  ;;  %v794_v33 = vsub.f32 0.0, %v729_v24  ;;  %v723_v38 = vadd.f32 %v722_v30, %v1612_v1  ;;  %v733_v41 = vadd.f32 %v732_v31, %v1612_v1  ;;  %v946_v23 = vld [vmem:[%s1636_s27 + $0x8] sm:$0xff] }
 0x1e3   : > { %v825_v35 = vmul.f32 1.442695, %v789_v27  ;;  %v833_v36 = vmul.f32 1.442695, %v793_v28  ;;  %v791_v37 = vsub.f32 0.0, %v721_v29  ;;  %v795_v43 = vsub.f32 0.0, %v731_v34 }
 0x1e4   : > { %v827_v39 = vmul.f32 1.442695, %v790_v32  ;;  %v835_v40 = vmul.f32 1.442695, %v794_v33  ;;  %v792_v46 = vsub.f32 0.0, %v723_v38  ;;  %v796_v53 = vsub.f32 0.0, %v733_v41 }
 0x1e5   : > { %1280 = vpow2.f32 %v825_v35  ;;  %v829_v42 = vmul.f32 1.442695, %v791_v37  ;;  %v837_v61 = vmul.f32 1.442695, %v795_v43  ;;  %v947_v28 = vld [vmem:[%s1636_s27 + $0x10] sm:$0xff]  ;;  %v948_v34 = vld [vmem:[%s1636_s27 + $0x18] sm:$0xff] }
 0x1e6   : > { %1282 = vpow2.f32 %v833_v36  ;;  %v736_v44 = vpop.f32.mrb[4].mxu1  ;;  %v831_v49 = vmul.f32 1.442695, %v792_v46  ;;  %v839_v2 = vmul.f32 1.442695, %v796_v53 }
 0x1e7   : > { %v1273_v45 = vpop.eup %1272  ;;  %1284 = vpow2.f32 %v827_v39  ;;  %v737_v47 = vadd.f32 %v736_v44, %v1610_v0  ;;  %v738_v50 = vpop.f32.mrb[5].mxu1 }
 0x1e8   : > { %v1275_v51 = vpop.eup %1274  ;;  %v881_v52 = vadd.f32 1.0, %v1273_v45  ;;  %1286 = vpow2.f32 %v835_v40  ;;  %v740_v54 = vpop.f32.mrb[6].mxu1  ;;  %v739_v63 = vadd.f32 %v738_v50, %v1612_v1 }
 0x1e9   : > { %v1277_v55 = vpop.eup %1276  ;;  %v882_v56 = vadd.f32 1.0, %v1275_v51  ;;  %1288 = vpow2.f32 %v829_v42  ;;  %v797_v57 = vsub.f32 0.0, %v737_v47  ;;  %v742_v58 = vpop.f32.mrb[7].mxu1  ;;  %v741_v3 = vadd.f32 %v740_v54, %v1610_v0 }
 0x1ea   : > { %v1279_v59 = vpop.eup %1278  ;;  %1290 = vrcp.f32 %v881_v52  ;;  %v883_v60 = vadd.f32 1.0, %v1277_v55  ;;  %v743_v5 = vadd.f32 %v742_v58, %v1612_v1  ;;  %v798_v7 = vsub.f32 0.0, %v739_v63  ;;  %v949_v58 = vld [vmem:[%s1636_s27 + $0x20] sm:$0xff] }
 0x1eb   : > { %1292 = vrcp.f32 %v882_v56  ;;  %v884_v62 = vadd.f32 1.0, %v1279_v59  ;;  %v841_v4 = vmul.f32 1.442695, %v797_v57  ;;  %v799_v12 = vsub.f32 0.0, %v741_v3 }
 0x1ec   : > { %1294 = vrcp.f32 %v883_v60  ;;  %v800_v16 = vsub.f32 0.0, %v743_v5  ;;  %v843_v25 = vmul.f32 1.442695, %v798_v7 }
 0x1ed   : > { %1296 = vrcp.f32 %v884_v62  ;;  %v845_v30 = vmul.f32 1.442695, %v799_v12  ;;  %v953_v62 = vld [vmem:[%s1636_s27 + $0x40] sm:$0xff] }
 0x1ee   : > { %1298 = vpow2.f32 %v837_v61  ;;  %v746_v48 = vpop.f32.mrb[8].mxu1  ;;  %v847_v35 = vmul.f32 1.442695, %v800_v16 }
 0x1ef   : > { %v1281_v6 = vpop.eup %1280  ;;  %1300 = vpow2.f32 %v831_v49  ;;  %v747_v8 = vadd.f32 %v746_v48, %v1610_v0  ;;  %v748_v9 = vpop.f32.mrb[9].mxu1 }
 0x1f0   : > { %v1283_v10 = vpop.eup %1282  ;;  %v885_v11 = vadd.f32 1.0, %v1281_v6  ;;  %1302 = vpow2.f32 %v839_v2  ;;  %v750_v13 = vpop.f32.mrb[10].mxu1  ;;  %v749_v26 = vadd.f32 %v748_v9, %v1612_v1  ;;  %v954_v9 = vld [vmem:[%s1636_s27 + $0x48] sm:$0xff] }
 0x1f1   : > { %v1285_v14 = vpop.eup %1284  ;;  %v889_v15 = vadd.f32 1.0, %v1283_v10  ;;  %1304 = vpow2.f32 %v841_v4  ;;  %v752_v17 = vpop.f32.mrb[11].mxu1  ;;  %v801_v21 = vsub.f32 0.0, %v747_v8  ;;  %v751_v31 = vadd.f32 %v750_v13, %v1610_v0  ;;  %v950_v4 = vld [vmem:[%s1636_s27 + $0x28] sm:$0xff] }
 0x1f2   : > { %v1287_v18 = vpop.eup %1286  ;;  %1306 = vrcp.f32 %v885_v11  ;;  %v886_v20 = vadd.f32 1.0, %v1285_v14  ;;  %v753_v36 = vadd.f32 %v752_v17, %v1612_v1  ;;  %v802_v43 = vsub.f32 0.0, %v749_v26  ;;  %v951_v14 = vld [vmem:[%s1636_s27 + $0x30] sm:$0xff] }
 0x1f3   : > { %v1289_v22 = vpop.eup %1288  ;;  %1308 = vrcp.f32 %v889_v15  ;;  %v890_v24 = vadd.f32 1.0, %v1287_v18  ;;  %v849_v39 = vmul.f32 1.442695, %v801_v21  ;;  %v803_v50 = vsub.f32 0.0, %v751_v31 }
 0x1f4   : > { %v1291_v27 = vpop.eup %1290  ;;  %1310 = vrcp.f32 %v886_v20  ;;  %v887_v29 = vadd.f32 1.0, %v1289_v22  ;;  %v804_v55 = vsub.f32 0.0, %v753_v36  ;;  %v851_v63 = vmul.f32 1.442695, %v802_v43  ;;  %v956_v43 = vld [vmem:[%s1636_s27 + $0x58] sm:$0xff] }
 0x1f5   : > { %v1293_v32 = vpop.eup %1292  ;;  %v977_v33 = vmul.f32 %v1291_v27, %v945_v19  ;;  %1312 = vrcp.f32 %v890_v24  ;;  %v853_v48 = vmul.f32 1.442695, %v803_v50 }
 0x1f6   : > { %v1295_v37 = vpop.eup %1294  ;;  %v978_v38 = vmul.f32 %v1293_v32, %v946_v23  ;;  %1314 = vrcp.f32 %v887_v29  ;;  %v756_v40 = vpop.f32.mrb[12].mxu1  ;;  %v855_v10 = vmul.f32 1.442695, %v804_v55 }
 0x1f7   : > { %v1297_v41 = vpop.eup %1296  ;;  %1009 = vst [vmem:[%s1647_s8] sm:$0xff] %v977_v33  ;;  %v979_v42 = vmul.f32 %v1295_v37, %v947_v28  ;;  %1316 = vpow2.f32 %v843_v25  ;;  %v757_v44 = vadd.f32 %v756_v40, %v1610_v0  ;;  %v758_v45 = vpop.f32.mrb[13].mxu1 }
 0x1f8   : > { %v1299_v46 = vpop.eup %1298  ;;  %1010 = vst [vmem:[%s1647_s8 + $0x8] sm:$0xff] %v978_v38  ;;  %v980_v47 = vmul.f32 %v1297_v41, %v948_v34  ;;  %1318 = vpow2.f32 %v845_v30  ;;  %v759_v51 = vadd.f32 %v758_v45, %v1612_v1  ;;  %v760_v52 = vpop.f32.mrb[14].mxu1 }
 0x1f9   : > { %v1301_v53 = vpop.eup %1300  ;;  %1011 = vst [vmem:[%s1647_s8 + $0x10] sm:$0xff] %v979_v42  ;;  %v891_v54 = vadd.f32 1.0, %v1299_v46  ;;  %1320 = vpow2.f32 %v847_v35  ;;  %v762_v56 = vpop.f32.mrb[15].mxu1  ;;  %v805_v60 = vsub.f32 0.0, %v757_v44  ;;  %v761_v6 = vadd.f32 %v760_v52, %v1610_v0  ;;  %v955_v35 = vld [vmem:[%s1636_s27 + $0x50] sm:$0xff] }
 0x1fa   : > { %v1303_v57 = vpop.eup %1302  ;;  %1012 = vst [vmem:[%s1647_s8 + $0x18] sm:$0xff] %v980_v47  ;;  %v888_v59 = vadd.f32 1.0, %v1301_v53  ;;  %1322 = vpow2.f32 %v849_v39  ;;  %v806_v2 = vsub.f32 0.0, %v759_v51  ;;  %v763_v11 = vadd.f32 %v762_v56, %v1612_v1  ;;  %v952_v39 = vld [vmem:[%s1636_s27 + $0x38] sm:$0xff]  ;;  %v957_v51 = vld [vmem:[%s1636_s27 + $0x60] sm:$0xff] }
 0x1fb   : > { %v1305_v61 = vpop.eup %1304  ;;  %1324 = vrcp.f32 %v891_v54  ;;  %v892_v49 = vadd.f32 1.0, %v1303_v57  ;;  %v857_v15 = vmul.f32 1.442695, %v805_v60  ;;  %v807_v24 = vsub.f32 0.0, %v761_v6 }
 0x1fc   : > { %v1307_v3 = vpop.eup %1306  ;;  %1326 = vrcp.f32 %v888_v59  ;;  %v893_v5 = vadd.f32 1.0, %v1305_v61  ;;  %v859_v19 = vmul.f32 1.442695, %v806_v2  ;;  %v808_v29 = vsub.f32 0.0, %v763_v11  ;;  %v958_v11 = vld [vmem:[%s1636_s27 + $0x68] sm:$0xff] }
 0x1fd   : > { %v1309_v7 = vpop.eup %1308  ;;  %v981_v8 = vmul.f32 %v1307_v3, %v949_v58  ;;  %1328 = vrcp.f32 %v892_v49  ;;  %v861_v41 = vmul.f32 1.442695, %v807_v24 }
 0x1fe   : > { %v1311_v12 = vpop.eup %1310  ;;  %v985_v13 = vmul.f32 %v1309_v7, %v953_v62  ;;  %1330 = vrcp.f32 %v893_v5  ;;  %v766_v16 = vpop.f32.mrb[16].mxu1  ;;  %v863_v45 = vmul.f32 1.442695, %v808_v29 }
 0x1ff   : > { %v1313_v17 = vpop.eup %1312  ;;  %1013 = vst [vmem:[%s1647_s8 + $0x20] sm:$0xff] %v981_v8  ;;  %v982_v18 = vmul.f32 %v1311_v12, %v950_v4  ;;  %1332 = vpow2.f32 %v851_v63  ;;  %v767_v20 = vadd.f32 %v766_v16, %v1610_v0  ;;  %v768_v21 = vpop.f32.mrb[17].mxu1 }
 0x200   : > { %v1315_v22 = vpop.eup %1314  ;;  %1017 = vst [vmem:[%s1647_s8 + $0x40] sm:$0xff] %v985_v13  ;;  %v986_v23 = vmul.f32 %v1313_v17, %v954_v9  ;;  %1334 = vpow2.f32 %v853_v48  ;;  %v769_v25 = vadd.f32 %v768_v21, %v1612_v1  ;;  %v770_v26 = vpop.f32.mrb[18].mxu1 }
 0x201   : > { %v1317_v27 = vpop.eup %1316  ;;  %1014 = vst [vmem:[%s1647_s8 + $0x28] sm:$0xff] %v982_v18  ;;  %v983_v28 = vmul.f32 %v1315_v22, %v951_v14  ;;  %1336 = vpow2.f32 %v855_v10  ;;  %v772_v30 = vpop.f32.mrb[19].mxu1  ;;  %v809_v33 = vsub.f32 0.0, %v767_v20  ;;  %v771_v46 = vadd.f32 %v770_v26, %v1610_v0  ;;  %v960_v20 = vld [vmem:[%s1636_s27 + $0x78] sm:$0xff]  ;;  %v961_v26 = vld [vmem:[%s1636_s27 + $0x80] sm:$0xff] }
 0x202   : > { %v1319_v31 = vpop.eup %1318  ;;  %1018 = vst [vmem:[%s1647_s8 + $0x48] sm:$0xff] %v986_v23  ;;  %v894_v32 = vadd.f32 1.0, %v1317_v27  ;;  %1338 = vpow2.f32 %v857_v15  ;;  %v810_v37 = vsub.f32 0.0, %v769_v25  ;;  %v773_v53 = vadd.f32 %v772_v30, %v1612_v1  ;;  %v959_v15 = vld [vmem:[%s1636_s27 + $0x70] sm:$0xff] }
 0x203   : > { %v1321_v34 = vpop.eup %1320  ;;  %1015 = vst [vmem:[%s1647_s8 + $0x30] sm:$0xff] %v983_v28  ;;  %v895_v36 = vadd.f32 1.0, %v1319_v31  ;;  %1340 = vpow2.f32 %v859_v19  ;;  %v865_v52 = vmul.f32 1.442695, %v809_v33  ;;  %v811_v3 = vsub.f32 0.0, %v771_v46 }
 0x204   : > { %v1323_v38 = vpop.eup %1322  ;;  %1342 = vrcp.f32 %v894_v32  ;;  %v896_v40 = vadd.f32 1.0, %v1321_v34  ;;  %v867_v57 = vmul.f32 1.442695, %v810_v37  ;;  %v812_v6 = vsub.f32 0.0, %v773_v53 }
 0x205   : > { %v1325_v42 = vpop.eup %1324  ;;  %1344 = vrcp.f32 %v895_v36  ;;  %v897_v44 = vadd.f32 1.0, %v1323_v38  ;;  %v869_v17 = vmul.f32 1.442695, %v811_v3  ;;  %v962_v38 = vld [vmem:[%s1636_s27 + $0x88] sm:$0xff] }
 0x206   : > { %v1327_v47 = vpop.eup %1326  ;;  %v987_v50 = vmul.f32 %v1325_v42, %v955_v35  ;;  %1346 = vrcp.f32 %v896_v40  ;;  %v776_v54 = vpop.f32.mrb[20].mxu1  ;;  %v871_v22 = vmul.f32 1.442695, %v812_v6 }
 0x207   : > { %v1329_v55 = vpop.eup %1328  ;;  %v984_v56 = vmul.f32 %v1327_v47, %v952_v39  ;;  %1348 = vrcp.f32 %v897_v44  ;;  %v777_v58 = vadd.f32 %v776_v54, %v1610_v0  ;;  %v778_v59 = vpop.f32.mrb[21].mxu1 }
 0x208   : > { %v1331_v60 = vpop.eup %1330  ;;  %1019 = vst [vmem:[%s1647_s8 + $0x50] sm:$0xff] %v987_v50  ;;  %v988_v61 = vmul.f32 %v1329_v55, %v956_v43  ;;  %1350 = vpow2.f32 %v861_v41  ;;  %v779_v62 = vadd.f32 %v778_v59, %v1612_v1  ;;  %v780_v49 = vpop.f32.mrb[22].mxu1  ;;  %v963_v41 = vld [vmem:[%s1636_s27 + $0x90] sm:$0xff]  ;;  %v966_v55 = vld [vmem:[%s1636_s27 + $0xa8] sm:$0xff] }
 0x209   : > { %v1333_v63 = vpop.eup %1332  ;;  %1016 = vst [vmem:[%s1647_s8 + $0x38] sm:$0xff] %v984_v56  ;;  %v989_v2 = vmul.f32 %v1331_v60, %v957_v51  ;;  %1352 = vpow2.f32 %v863_v45  ;;  %v782_v4 = vpop.f32.mrb[23].mxu1  ;;  %v813_v9 = vsub.f32 0.0, %v777_v58  ;;  %v781_v18 = vadd.f32 %v780_v49, %v1610_v0  ;;  %v964_v45 = vld [vmem:[%s1636_s27 + $0x98] sm:$0xff] }
 0x20a   : > { %v1335_v5 = vpop.eup %1334  ;;  %1020 = vst [vmem:[%s1647_s8 + $0x58] sm:$0xff] %v988_v61  ;;  %v898_v48 = vadd.f32 1.0, %v1333_v63  ;;  %1354 = vpow2.f32 %v865_v52  ;;  %v814_v13 = vsub.f32 0.0, %v779_v62  ;;  %v783_v23 = vadd.f32 %v782_v4, %v1612_v1  ;;  %v965_v52 = vld [vmem:[%s1636_s27 + $0xa0] sm:$0xff] }
 0x20b   : > { %v1337_v7 = vpop.eup %1336  ;;  %1021 = vst [vmem:[%s1647_s8 + $0x60] sm:$0xff] %v989_v2  ;;  %v899_v8 = vadd.f32 1.0, %v1335_v5  ;;  %1356 = vpow2.f32 %v867_v57  ;;  %v873_v27 = vmul.f32 1.442695, %v813_v9  ;;  %v815_v32 = vsub.f32 0.0, %v781_v18  ;;  %v967_v2 = vld [vmem:[%s1636_s27 + $0xb0] sm:$0xff] }
 0x20c   : > { %v1339_v10 = vpop.eup %1338  ;;  %1358 = vrcp.f32 %v898_v48  ;;  %v900_v12 = vadd.f32 1.0, %v1337_v7  ;;  %v875_v30 = vmul.f32 1.442695, %v814_v13  ;;  %v816_v34 = vsub.f32 0.0, %v783_v23  ;;  %v968_v5 = vld [vmem:[%s1636_s27 + $0xb8] sm:$0xff]  ;;  %v969_v7 = vld [vmem:[%s1636_s27 + $0xc0] sm:$0xff] }
 0x20d   : > { %v1341_v14 = vpop.eup %1340  ;;  %1360 = vrcp.f32 %v899_v8  ;;  %v901_v16 = vadd.f32 1.0, %v1339_v10  ;;  %v877_v43 = vmul.f32 1.442695, %v815_v32  ;;  %v975_v32 = vld [vmem:[%s1636_s27 + $0xf0] sm:$0xff] }
 0x20e   : > { %v1343_v19 = vpop.eup %1342  ;;  %1362 = vrcp.f32 %v900_v12  ;;  %v902_v21 = vadd.f32 1.0, %v1341_v14  ;;  %v879_v47 = vmul.f32 1.442695, %v816_v34 }
 0x20f   : > { %v1345_v24 = vpop.eup %1344  ;;  %v990_v25 = vmul.f32 %v1343_v19, %v958_v11  ;;  %1364 = vrcp.f32 %v901_v16  ;;  %v970_v11 = vld [vmem:[%s1636_s27 + $0xc8] sm:$0xff] }
 0x210   : > { %v1347_v28 = vpop.eup %1346  ;;  %v991_v29 = vmul.f32 %v1345_v24, %v959_v15  ;;  %1366 = vrcp.f32 %v902_v21  ;;  %v971_v21 = vld [vmem:[%s1636_s27 + $0xd0] sm:$0xff]  ;;  %v973_v24 = vld [vmem:[%s1636_s27 + $0xe0] sm:$0xff] }
 0x211   : > { %v1349_v0 = vpop.eup %1348  ;;  %1022 = vst [vmem:[%s1647_s8 + $0x68] sm:$0xff] %v990_v25  ;;  %v992_v31 = vmul.f32 %v1347_v28, %v960_v20  ;;  %1368 = vpow2.f32 %v869_v17 }
 0x212   : > { %v1351_v1 = vpop.eup %1350  ;;  %1023 = vst [vmem:[%s1647_s8 + $0x70] sm:$0xff] %v991_v29  ;;  %v993_v33 = vmul.f32 %v1349_v0, %v961_v26  ;;  %1370 = vpow2.f32 %v871_v22  ;;  %v972_v22 = vld [vmem:[%s1636_s27 + $0xd8] sm:$0xff] }
 0x213   : > { %v1353_v35 = vpop.eup %1352  ;;  %1024 = vst [vmem:[%s1647_s8 + $0x78] sm:$0xff] %v992_v31  ;;  %v903_v36 = vadd.f32 1.0, %v1351_v1  ;;  %1372 = vpow2.f32 %v873_v27  ;;  %v974_v27 = vld [vmem:[%s1636_s27 + $0xe8] sm:$0xff]  ;;  %v976_v1 = vld [vmem:[%s1636_s27 + $0xf8] sm:$0xff] }
 0x214   : > { %v1355_v37 = vpop.eup %1354  ;;  %1025 = vst [vmem:[%s1647_s8 + $0x80] sm:$0xff] %v993_v33  ;;  %v904_v39 = vadd.f32 1.0, %v1353_v35  ;;  %1374 = vpow2.f32 %v875_v30 }
 0x215   : > { %v1357_v40 = vpop.eup %1356  ;;  %1376 = vrcp.f32 %v903_v36  ;;  %v905_v42 = vadd.f32 1.0, %v1355_v37 }
 0x216   : > { %v1359_v44 = vpop.eup %1358  ;;  %1378 = vrcp.f32 %v904_v39  ;;  %v906_v46 = vadd.f32 1.0, %v1357_v40 }
 0x217   : > { %v1361_v50 = vpop.eup %1360  ;;  %v994_v51 = vmul.f32 %v1359_v44, %v962_v38  ;;  %1380 = vrcp.f32 %v905_v42 }
 0x218   : > { %v1363_v53 = vpop.eup %1362  ;;  %v995_v54 = vmul.f32 %v1361_v50, %v963_v41  ;;  %1382 = vrcp.f32 %v906_v46 }
 0x219   : > { %v1365_v56 = vpop.eup %1364  ;;  %1026 = vst [vmem:[%s1647_s8 + $0x88] sm:$0xff] %v994_v51  ;;  %v996_v57 = vmul.f32 %v1363_v53, %v964_v45  ;;  %1384 = vpow2.f32 %v877_v43 }
 0x21a   : > { %v1367_v58 = vpop.eup %1366  ;;  %1027 = vst [vmem:[%s1647_s8 + $0x90] sm:$0xff] %v995_v54  ;;  %v997_v59 = vmul.f32 %v1365_v56, %v965_v52  ;;  %1386 = vpow2.f32 %v879_v47 }
 0x21b   : > { %v1369_v60 = vpop.eup %1368  ;;  %1028 = vst [vmem:[%s1647_s8 + $0x98] sm:$0xff] %v996_v57  ;;  %v998_v61 = vmul.f32 %v1367_v58, %v966_v55 }
 0x21c   : > { %v1371_v62 = vpop.eup %1370  ;;  %1029 = vst [vmem:[%s1647_s8 + $0xa0] sm:$0xff] %v997_v59  ;;  %v907_v49 = vadd.f32 1.0, %v1369_v60 }
 0x21d   : > { %v1373_v63 = vpop.eup %1372  ;;  %1030 = vst [vmem:[%s1647_s8 + $0xa8] sm:$0xff] %v998_v61  ;;  %v908_v3 = vadd.f32 1.0, %v1371_v62 }
 0x21e   : > { %v1375_v4 = vpop.eup %1374  ;;  %1388 = vrcp.f32 %v907_v49  ;;  %v909_v48 = vadd.f32 1.0, %v1373_v63 }
 0x21f   : > { %v1377_v6 = vpop.eup %1376  ;;  %1390 = vrcp.f32 %v908_v3  ;;  %v910_v8 = vadd.f32 1.0, %v1375_v4 }
 0x220   : > { %v1379_v9 = vpop.eup %1378  ;;  %v999_v10 = vmul.f32 %v1377_v6, %v967_v2  ;;  %1392 = vrcp.f32 %v909_v48 }
 0x221   : > { %v1381_v12 = vpop.eup %1380  ;;  %v1000_v13 = vmul.f32 %v1379_v9, %v968_v5  ;;  %1394 = vrcp.f32 %v910_v8 }
 0x222   : > { %v1383_v14 = vpop.eup %1382  ;;  %1031 = vst [vmem:[%s1647_s8 + $0xb0] sm:$0xff] %v999_v10  ;;  %v1001_v15 = vmul.f32 %v1381_v12, %v969_v7 }
 0x223   : > { %v1385_v16 = vpop.eup %1384  ;;  %1032 = vst [vmem:[%s1647_s8 + $0xb8] sm:$0xff] %v1000_v13  ;;  %v1002_v17 = vmul.f32 %v1383_v14, %v970_v11 }
 0x224   : > { %v1387_v18 = vpop.eup %1386  ;;  %1033 = vst [vmem:[%s1647_s8 + $0xc0] sm:$0xff] %v1001_v15  ;;  %v911_v19 = vadd.f32 1.0, %v1385_v16 }
 0x225   : > { %1034 = vst [vmem:[%s1647_s8 + $0xc8] sm:$0xff] %v1002_v17  ;;  %v912_v20 = vadd.f32 1.0, %v1387_v18 }
 0x226   : > { %1396 = vrcp.f32 %v911_v19 }
 0x227   : > { %1398 = vrcp.f32 %v912_v20 }
 0x228   : > { %v1389_v23 = vpop.eup %1388 }
 0x229   : > { %v1391_v25 = vpop.eup %1390  ;;  %v1003_v26 = vmul.f32 %v1389_v23, %v971_v21 }
 0x22a   : > { %v1393_v28 = vpop.eup %1392  ;;  %v1004_v29 = vmul.f32 %v1391_v25, %v972_v22 }
 0x22b   : > { %v1395_v30 = vpop.eup %1394  ;;  %1035 = vst [vmem:[%s1647_s8 + $0xd0] sm:$0xff] %v1003_v26  ;;  %v1005_v0 = vmul.f32 %v1393_v28, %v973_v24 }
 0x22c   : > { %1036 = vst [vmem:[%s1647_s8 + $0xd8] sm:$0xff] %v1004_v29  ;;  %v1006_v31 = vmul.f32 %v1395_v30, %v974_v27 }
 0x22d   : > { %1037 = vst [vmem:[%s1647_s8 + $0xe0] sm:$0xff] %v1005_v0 }
 0x22e   : > { %1038 = vst [vmem:[%s1647_s8 + $0xe8] sm:$0xff] %v1006_v31 }
 0x230   : > { %v1397_v33 = vpop.eup %1396 }
 0x231   : > { %v1399_v34 = vpop.eup %1398  ;;  %v1007_v35 = vmul.f32 %v1397_v33, %v975_v32 }
 0x232   : > { %v1008_v36 = vmul.f32 %v1399_v34, %v976_v1 }
 0x233   : > { %1039 = vst [vmem:[%s1647_s8 + $0xf0] sm:$0xff] %v1007_v35 }
 0x234   : > { %1040 = vst [vmem:[%s1647_s8 + $0xf8] sm:$0xff] %v1008_v36 }
 0x235 PF: > { %s17_s24 = sadd.s32 1, %s1406_s24  }
 0x236   : > { %p14_p4 = scmp.ge.s32.totalorder %s17_s24, 4  }
 0x238   :  { %16 = sbr.rel (!%p14_p4) target bundleno = 1 (0x1), region = 84 }

// kernel: esa_forward.4
= control target key start
LH: loop header
LB: loop body
LE: loop exit
PB: predicated region body
PF: predicated region fallthrough
CT: control target
= control target key end

     0   :  { %s2255_s27 = smov 0   ;;  %s2880_s0 = inlined_call_operand.vmem [shape: f32[2,32,16,16], index: 0, kind: input, shape index: {}]   ;;  %s2881_s1 = inlined_call_operand.vmem [shape: f32[2,32,16,16], index: 1, kind: input, shape index: {}]   ;;  %s2882_s2 = inlined_call_operand.vmem [shape: f32[144,16], index: 2, kind: input, shape index: {}]   ;;  %s2883_s3 = inlined_call_operand.vmem [shape: f32[1,16], index: 3, kind: input, shape index: {}]   ;;  %s2884_s4 = inlined_call_operand.vmem [shape: f32[144,16], index: 4, kind: input, shape index: {}]   ;;  %s2885_s5 = inlined_call_operand.vmem [shape: f32[1,16], index: 5, kind: input, shape index: {}]   ;;  %s2886_s6 = inlined_call_operand.vmem [shape: f32[48,512], index: 6, kind: input, shape index: {}]   ;;  %s2887_s7 = inlined_call_operand.vmem [shape: f32[32,3], index: 7, kind: input, shape index: {}]   ;;  %s2888_s8 = inlined_call_operand.vmem [shape: f32[2,32,512], index: 8, kind: output, shape index: {}]  }
   0x1 LB: > { %s1903_s28 = sadd.s32 4294967295, %s2183_s27   ;;  %p1907_p0 = scmp.ge.s32.totalorder %s2183_s27, 1  ;;  %s2183_s27 = sphi %s2255_s27, %s18_s27  }
   0x2   : > { %p272_p1 = scmp.lt.s32.totalorder %s2183_s27, 3 }
   0x4   : > { %p273_p2 = pnand %p1907_p0, %p272_p1 }
   0x5   : > { %p311_p3 = scmp.lt.s32.totalorder (!%p273_p2), %s1903_s28, 1  ;;  %s2278_s18 = smov (!%p273_p2), 0  }
   0x6   : > { %276 = sbr.rel (%p273_p2) target bundleno = 1394 (0x572), region = 52 }
   0xd   : > { %s2890_s28 = smov (!%p311_p3, %s1903_s28), 1 }
   0xe   : > { %s1967_s29 = sshll.u32 %s2890_s28, 9  ;;  %s1969_s30 = sshll.u32 %s2890_s28, 7 }
   0xf   : > { %s2266_s11 = scalar_lea.vmem %s2880_s0, %s1967_s29  ;;  %s2271_s14 = scalar_lea.vmem %s2881_s1, %s1967_s29 }
  0x10   : > { %s2276_s17 = scalar_lea.vmem %s2888_s8, %s1969_s30 }
  0x11 LB: >> { %v456_v0 = vld [vmem:[%s2882_s2] sm:$0xff]  ;;  %v457_v1 = vld [vmem:[%s2882_s2 + $0x8] sm:$0xff]  ;;  %v2193_v2 = vmov 0.0|0.0   ;;  %v458_v4 = vld [vmem:[%s2882_s2 + $0x10] sm:$0xff]  ;;  %s1970_s28 = sshll.u32 %s2187_s18, 5  ;;  %s2194_s15 = smov 16   ;;  %s2187_s18 = sphi %s2278_s18, %s331_s18  }
  0x12   : >> { %1975 = vmatprep.subr.bf16.mxu0 %v2193_v2  ;;  %2107 = vmatprep.subr.bf16.mxu1 %v2193_v2  ;;  %v1976_v3 = vpack.c.bf16 %v457_v1, %v456_v0  ;;  %v459_v5 = vld [vmem:[%s2882_s2 + $0x18] sm:$0xff]  ;;  %s2299_s29 = scalar_lea.vmem %s2271_s14, %s1970_s28  ;;  %s2302_s30 = scalar_lea.vmem %s2266_s11, %s1970_s28  ;;  %v460_v7 = vld [vmem:[%s2882_s2 + $0x20] sm:$0xff]  ;;  %v461_v10 = vld [vmem:[%s2882_s2 + $0x28] sm:$0xff]  ;;  %vm337_vm0 = vcmask 130048   ;;  %vm339_vm1 = vcmask 129024   ;;  %vm352_vm2 = vcmask 261248  }
  0x13   : >> { %v1979_v6 = vpack.c.bf16 %v459_v5, %v458_v4  ;;  %v342_v8 = vld [vmem:[%s2299_s29] sm:$0xff]  ;;  %s2195_s16 = smov 32   ;;  %v343_v11 = vld [vmem:[%s2299_s29 + $0x8] sm:$0x7f]  ;;  %v1982_v13 = vpack.c.bf16 %v461_v10, %v460_v7  ;;  %v1918_v14 = vld [vmem:[%s2302_s30 + $0x10] sm:$0xff]  ;;  %s2196_s28 = smov 48  }
  0x14   : >> { %1977 = vmatpush1.bf16.msra.mxu0 %v1976_v3  ;;  %2116 = vmatpush1.bf16.msra.mxu1 %v1976_v3  ;;  %v356_v9 = vld [vmem:[%s2302_s30 + $0x1] sm:$0xff]  ;;  %v357_v12 = vld [vmem:[%s2302_s30 + $0x9] sm:$0x7f]  ;;  %v462_v15 = vld [vmem:[%s2882_s2 + $0x30] sm:$0xff]  ;;  %s2198_s22 = smov 80   ;;  %s2200_s13 = smov 112  }
  0x15   : >> { %1978 = vmatprep.subr.bf16.mxu0 %v2193_v2  ;;  %2108 = vmatprep.subr.bf16.mxu1 %v2193_v2  ;;  %v463_v16 = vld [vmem:[%s2882_s2 + $0x38] sm:$0xff]  ;;  %v335_v17 = vld [vmem:[%s2302_s30] sm:$0xff]  ;;  %v336_v20 = vld [vmem:[%s2302_s30 + $0x8] sm:$0x7f]  ;;  %vm366_vm3 = vcmask 392448   ;;  %vm354_vm4 = vcmask 260224  }
  0x16   : >> { %346 = vrot.lane.b32.xlu0 %v342_v8, %s2194_s15  ;;  %360 = vrot.lane.b32.xlu1 %v356_v9, %s2195_s16  ;;  %v1934_v18 = vld [vmem:[%s2302_s30 + $0x21] sm:$0xff]  ;;  %v1919_v19 = vld [vmem:[%s2302_s30 + $0x18] sm:$0x7f]  ;;  %338 = vst.msk [vmem:[#allocation2] sm:$0xff] %vm337_vm0, %v335_v17  ;;  %v1985_v22 = vpack.c.bf16 %v463_v16, %v462_v15  ;;  %vm368_vm5 = vcmask 391424   ;;  %vm383_vm6 = vcmask 523648  }
  0x17   : >> { %450 = vst.msk [vmem:[#allocation2 + $0x8] sm:$0xff] %vm337_vm0, %v1934_v18  ;;  %v1935_v21 = vld [vmem:[%s2302_s30 + $0x29] sm:$0x7f]  ;;  %v464_v23 = vld [vmem:[%s2882_s2 + $0x40] sm:$0xff]  ;;  %v1922_v25 = vld [vmem:[%s2299_s29 + $0x10] sm:$0xff]  ;;  %vm385_vm7 = vcmask 522624  }
  0x18   : >> { %1980 = vmatpush1.bf16.msra.mxu0 %v1979_v6  ;;  %2117 = vmatpush1.bf16.msra.mxu1 %v1979_v6  ;;  %340 = vst.msk [vmem:[#allocation2 + $0x10] sm:$0x7f] %vm339_vm1, %v336_v20  ;;  %451 = vst.msk [vmem:[#allocation2 + $0x18] sm:$0x7f] %vm339_vm1, %v1935_v21  ;;  %v465_v24 = vld [vmem:[%s2882_s2 + $0x48] sm:$0xff]  ;;  %v466_v28 = vld [vmem:[%s2882_s2 + $0x50] sm:$0xff] }
  0x19   : >> { %1981 = vmatprep.subr.bf16.mxu0 %v2193_v2  ;;  %2109 = vmatprep.subr.bf16.mxu1 %v2193_v2  ;;  %v1923_v26 = vld [vmem:[%s2299_s29 + $0x18] sm:$0x7f]  ;;  %v1988_v27 = vpack.c.bf16 %v465_v24, %v464_v23  ;;  %v468_v35 = vld [vmem:[%s2882_s2 + $0x60] sm:$0xff]  ;;  %v469_v36 = vld [vmem:[%s2882_s2 + $0x68] sm:$0xff]  ;;  %vm398_vm8 = vcmask 654848   ;;  %vm400_vm9 = vcmask 653824  }
  0x1a   : >> { %348 = vrot.lane.b32.xlu0 %v343_v11, %s2194_s15  ;;  %362 = vrot.lane.b32.xlu1 %v357_v12, %s2195_s16  ;;  %v467_v29 = vld [vmem:[%s2882_s2 + $0x58] sm:$0xff]  ;;  %s2197_s15 = smov 64   ;;  %v1928_v37 = vld [vmem:[%s2302_s30 + $0x20] sm:$0xff]  ;;  %v1994_v39 = vpack.c.bf16 %v469_v36, %v468_v35  ;;  %vm412_vm10 = vcmask 786048   ;;  %vm414_vm11 = vcmask 785024   ;;  %vm429_vm12 = vcmask 917248  }
  0x1b   : >> { %v1924_v31 = vld [vmem:[%s2302_s30 + $0x11] sm:$0xff]  ;;  %v1925_v32 = vld [vmem:[%s2302_s30 + $0x19] sm:$0x7f]  ;;  %v1991_v33 = vpack.c.bf16 %v467_v29, %v466_v28  ;;  %v1929_v38 = vld [vmem:[%s2302_s30 + $0x28] sm:$0x7f]  ;;  %vm431_vm13 = vcmask 916224  }
  0x1c   : >> { %1983 = vmatpush1.bf16.msra.mxu0 %v1982_v13  ;;  %2118 = vmatpush1.bf16.msra.mxu1 %v1982_v13  ;;  %v470_v40 = vld [vmem:[%s2882_s2 + $0x70] sm:$0xff]  ;;  %v471_v41 = vld [vmem:[%s2882_s2 + $0x78] sm:$0xff]  ;;  %v1932_v42 = vld [vmem:[%s2299_s29 + $0x20] sm:$0xff]  ;;  %vm444_vm14 = vcmask 1048448   ;;  %vm446_vm15 = vcmask 1047424  }
  0x1d   : >> { %1984 = vmatprep.subr.bf16.mxu0 %v2193_v2  ;;  %2110 = vmatprep.subr.bf16.mxu1 %v2193_v2  ;;  %v1933_v43 = vld [vmem:[%s2299_s29 + $0x28] sm:$0x7f]  ;;  %v1997_v44 = vpack.c.bf16 %v471_v41, %v470_v40  ;;  %v472_v45 = vld [vmem:[%s2882_s2 + $0x80] sm:$0xff]  ;;  %s1939_s29 = sshll.u32 %s2187_s18, 4  ;;  %s331_s18 = sadd.s32 1, %s2187_s18  }
  0x1e   : >> { %377 = vrot.lane.b32.xlu0 %v1918_v14, %s2196_s28  ;;  %379 = vrot.lane.b32.xlu1 %v1919_v19, %s2196_s28  ;;  %v453_v30 = vld [vmem:[#allocation2 + $0x8] sm:$0xff]  ;;  %s2199_s28 = smov 96   ;;  %v1936_v0 = vld [vmem:[%s2883_s3] ss:$0 sm:$0xff]  ;;  %s563_s19 = scalar_lea.vmem [#allocation3], %s1939_s29 }
  0x1f   : >> { %1937 = vmatprep.mubr.msk.f32.mxu0 %vm337_vm0, %v453_v30  ;;  %v455_v34 = vld [vmem:[#allocation2 + $0x18] sm:$0x7f]  ;;  %v473_v46 = vld [vmem:[%s2882_s2 + $0x88] sm:$0xff]  ;;  %p328_p4 = scmp.ge.s32.totalorder %s331_s18, 15  }
  0x20   : >> { %1986 = vmatpush1.bf16.msra.mxu0 %v1985_v22  ;;  %2119 = vmatpush1.bf16.msra.mxu1 %v1985_v22  ;;  %v2000_v47 = vpack.c.bf16 %v473_v46, %v472_v45  ;;  %v2201_v7 = vmov (%p328_p4), 0.0   ;;  %s2405_s20 = smov (%p328_p4), 0  }
  0x21   : >> { %1987 = vmatprep.subr.bf16.mxu0 %v2193_v2  ;;  %2111 = vmatprep.subr.bf16.mxu1 %v2193_v2 }
  0x22   : >> { %392 = vrot.lane.b32.xlu0 %v1922_v25, %s2197_s15  ;;  %394 = vrot.lane.b32.xlu1 %v1923_v26, %s2197_s15 }
  0x23   : >> { %1938 = vmatprep.mubr.msk.f32.mxu1 %vm337_vm0, %v455_v34 }
  0x24   : >> { %1989 = vmatpush1.bf16.msra.mxu0 %v1988_v27  ;;  %2120 = vmatpush1.bf16.msra.mxu1 %v1988_v27 }
  0x25   : >> { %1990 = vmatprep.subr.bf16.mxu0 %v2193_v2  ;;  %2112 = vmatprep.subr.bf16.mxu1 %v2193_v2 }
  0x26   : >> { %406 = vrot.lane.b32.xlu0 %v1924_v31, %s2198_s22  ;;  %408 = vrot.lane.b32.xlu1 %v1925_v32, %s2198_s22 }
  0x28   : >> { %1992 = vmatpush1.bf16.msra.mxu0 %v1991_v33  ;;  %2121 = vmatpush1.bf16.msra.mxu1 %v1991_v33 }
  0x29   : >> { %1993 = vmatprep.subr.bf16.mxu0 %v2193_v2  ;;  %2113 = vmatprep.subr.bf16.mxu1 %v2193_v2 }
  0x2a   : >> { %423 = vrot.lane.b32.xlu0 %v1928_v37, %s2199_s28  ;;  %425 = vrot.lane.b32.xlu1 %v1929_v38, %s2199_s28 }
  0x2c   : >> { %1995 = vmatpush1.bf16.msra.mxu0 %v1994_v39  ;;  %2122 = vmatpush1.bf16.msra.mxu1 %v1994_v39 }
  0x2d   : >> { %1996 = vmatprep.subr.bf16.mxu0 %v2193_v2  ;;  %2114 = vmatprep.subr.bf16.mxu1 %v2193_v2 }
  0x2e   : >> { %438 = vrot.lane.b32.xlu0 %v1932_v42, %s2200_s13  ;;  %440 = vrot.lane.b32.xlu1 %v1933_v43, %s2200_s13 }
  0x30   : >> { %1998 = vmatpush1.bf16.msra.mxu0 %v1997_v44  ;;  %2123 = vmatpush1.bf16.msra.mxu1 %v1997_v44 }
  0x31   : >> { %1999 = vmatprep.subr.bf16.mxu0 %v2193_v2  ;;  %2115 = vmatprep.subr.bf16.mxu1 %v2193_v2 }
  0x34   : >> { %2001 = vmatpush1.bf16.msra.mxu0 %v2000_v47  ;;  %2124 = vmatpush1.bf16.msra.mxu1 %v2000_v47 }
  0x88   : >> { %v347_v48 = vpop.permute.xlu0 %346  ;;  %v361_v49 = vpop.permute.xlu1 %360 }
  0x89   : >> { %353 = vst.msk [vmem:[#allocation2] sm:$0xff] %vm352_vm2, %v347_v48  ;;  %vm566_vm2 = vcmask (%p328_p4), 126976  }
  0x8a   : >> { %367 = vst.msk [vmem:[#allocation2] sm:$0xff] %vm366_vm3, %v361_v49 }
  0x8b   : > { %567 = vst.msk [vmem:[#allocation4] sm:$0x1f] (%p328_p4), %vm566_vm2, %v2201_v7  ;;  %568 = vst.msk [vmem:[#allocation4 + $0x8] sm:$0x1f] (%p328_p4), %vm566_vm2, %v2201_v7 }
  0x8c   : >> { %v349_v50 = vpop.permute.xlu0 %348  ;;  %v363_v51 = vpop.permute.xlu1 %362  ;;  %569 = vst.msk [vmem:[#allocation4 + $0x10] sm:$0x1f] (%p328_p4), %vm566_vm2, %v2201_v7  ;;  %570 = vst.msk [vmem:[#allocation4 + $0x18] sm:$0x1f] (%p328_p4), %vm566_vm2, %v2201_v7 }
  0x8d   : >> { %355 = vst.msk [vmem:[#allocation2 + $0x10] sm:$0x7f] %vm354_vm4, %v349_v50 }
  0x8e   : >> { %369 = vst.msk [vmem:[#allocation2 + $0x10] sm:$0x7f] %vm368_vm5, %v363_v51 }
  0x8f   : > { %571 = vst.msk [vmem:[#allocation4 + $0x20] sm:$0x1f] (%p328_p4), %vm566_vm2, %v2201_v7 }
  0x90   : >> { %v378_v52 = vpop.permute.xlu0 %377  ;;  %v380_v53 = vpop.permute.xlu1 %379 }
  0x91   : >> { %384 = vst.msk [vmem:[#allocation2] sm:$0xff] %vm383_vm6, %v378_v52 }
  0x92   : >> { %386 = vst.msk [vmem:[#allocation2 + $0x10] sm:$0x7f] %vm385_vm7, %v380_v53 }
  0x94   : >> { %v393_v54 = vpop.permute.xlu0 %392  ;;  %v395_v55 = vpop.permute.xlu1 %394 }
  0x95   : >> { %399 = vst.msk [vmem:[#allocation2] sm:$0xff] %vm398_vm8, %v393_v54 }
  0x96   : >> { %401 = vst.msk [vmem:[#allocation2 + $0x10] sm:$0x7f] %vm400_vm9, %v395_v55 }
  0x98   : >> { %v407_v56 = vpop.permute.xlu0 %406  ;;  %v409_v57 = vpop.permute.xlu1 %408 }
  0x99   : >> { %413 = vst.msk [vmem:[#allocation2] sm:$0xff] %vm412_vm10, %v407_v56 }
  0x9a   : >> { %415 = vst.msk [vmem:[#allocation2 + $0x10] sm:$0x7f] %vm414_vm11, %v409_v57 }
  0x9c   : >> { %v424_v58 = vpop.permute.xlu0 %423  ;;  %v426_v59 = vpop.permute.xlu1 %425 }
  0x9d   : >> { %430 = vst.msk [vmem:[#allocation2] sm:$0xff] %vm429_vm12, %v424_v58 }
  0x9e   : >> { %432 = vst.msk [vmem:[#allocation2 + $0x10] sm:$0x7f] %vm431_vm13, %v426_v59 }
  0xa0   : >> { %v439_v60 = vpop.permute.xlu0 %438  ;;  %v441_v61 = vpop.permute.xlu1 %440 }
  0xa1   : >> { %445 = vst.msk [vmem:[#allocation2] sm:$0xff] %vm444_vm14, %v439_v60 }
  0xa2   : >> { %447 = vst.msk [vmem:[#allocation2 + $0x10] sm:$0x7f] %vm446_vm15, %v441_v61 }
  0xa8   : >> { %v452_v62 = vld [vmem:[#allocation2] sm:$0xff] }
  0xa9   : >> { %v454_v63 = vld [vmem:[#allocation2 + $0x10] sm:$0x7f]  ;;  %552 = vmatmul.mubr.f32.vlgmr.msra.gmra.mrb[0].mxu0 %v452_v62 }
  0xaa   : >> { %557 = vmatmul.mubr.f32.vlgmr.msra.gmra.mrb[0].mxu1 %v454_v63 }
 0x17a   : > { %330 = sbr.rel (!%p328_p4) target bundleno = 17 (0x11), region = 110 }
 0x17c   : >> { %v553_v1 = vpop.f32.mrb[0].mxu0 }
 0x17d   : >> { %v558_v2 = vpop.f32.mrb[0].mxu1  ;;  %v554_v3 = vadd.f32 %v1936_v0, %v553_v1  ;;  %v555_v5 = vpop.f32.mrb[1].mxu0 }
 0x17e   : >> { %v559_v4 = vadd.f32 %v1936_v0, %v558_v2  ;;  %v560_v6 = vpop.f32.mrb[1].mxu1 }
 0x17f   : >> { %564 = vst.msk [vmem:[%s563_s19] sm:$0xff] %vm337_vm0, %v554_v3 }
 0x180   : >> { %565 = vst.msk [vmem:[%s563_s19 + $0x8] sm:$0x7f] %vm339_vm1, %v559_v4 }
 0x181 LB: >> { %s1940_s11 = smul.u32 48, %s2191_s20  ;;  %vm635_vm3 = vcmask 130051   ;;  %vm647_vm4 = vcmask 130054   ;;  %vm637_vm5 = vcmask 123904   ;;  %s1941_s18 = sshll.u32 %s2191_s20, 3  ;;  %vm633_vm6 = vcmask 122880   ;;  %s2191_s20 = sphi %s2405_s20, %s577_s20  }
 0x182   : >> { %s1861_s21 = scalar_lea.vmem [#allocation4], %s1941_s18  ;;  %s577_s20 = sadd.s32 1, %s2191_s20  }
 0x183   : >> { %s580_s14 = scalar_lea.vmem [#allocation3], %s1940_s11  ;;  %p574_p5 = scmp.ge.s32.totalorder %s577_s20, 3  }
 0x184   : > { %vm665_vm7 = vcmask (%p574_p5), 1041409   ;;  %vm667_vm8 = vcmask (%p574_p5), 1045509   ;;  %vm670_vm9 = vcmask (%p574_p5), 1042434   ;;  %vm672_vm10 = vcmask (%p574_p5), 1046534   ;;  %s2202_s22 = smov (%p574_p5), 16   ;;  %s2203_s23 = smov (%p574_p5), 48  }
 0x185   : > { %s2204_s24 = smov (%p574_p5), 32   ;;  %s2205_s25 = smov (%p574_p5), 64   ;;  %vm692_vm11 = vcmask (%p574_p5), 256128   ;;  %vm709_vm12 = vcmask (%p574_p5), 387328   ;;  %vm727_vm13 = vcmask (%p574_p5), 518528   ;;  %vm744_vm14 = vcmask (%p574_p5), 649728  }
 0x186   : > { %s2206_s26 = smov (%p574_p5), 80   ;;  %s2207_s28 = smov (%p574_p5), 96   ;;  %vm761_vm15 = vcmask (%p574_p5), 780928  }
 0x187   : >> { %v581_v8 = vld [vmem:[%s580_s14] sm:$0xff]  ;;  %v583_v9 = vld [vmem:[%s580_s14 + $0x10] sm:$0xff]  ;;  %v582_v22 = vld [vmem:[%s580_s14 + $0x8] sm:$0x7f]  ;;  %s2208_s30 = smov (%p574_p5), 112  }
 0x188   : >> { %v585_v10 = vld [vmem:[%s580_s14 + $0x20] sm:$0xff]  ;;  %v587_v11 = vld [vmem:[%s580_s14 + $0x30] sm:$0xff]  ;;  %v596_v14 = vsel %vm337_vm0, %v581_v8, -inf  ;;  %v597_v15 = vsel %vm337_vm0, %v583_v9, -inf  ;;  %v584_v25 = vld [vmem:[%s580_s14 + $0x18] sm:$0x7f] }
 0x189   : >> { %v589_v12 = vld [vmem:[%s580_s14 + $0x40] sm:$0xff]  ;;  %v591_v13 = vld [vmem:[%s580_s14 + $0x50] sm:$0xff]  ;;  %v598_v16 = vsel %vm337_vm0, %v585_v10, -inf  ;;  %v600_v19 = vsel %vm337_vm0, %v587_v11, -inf  ;;  %v586_v26 = vld [vmem:[%s580_s14 + $0x28] sm:$0x7f] }
 0x18a   : >> { %v593_v17 = vld [vmem:[%s580_s14 + $0x60] sm:$0xff]  ;;  %v599_v18 = vmax.f32 %v596_v14, %v598_v16  ;;  %v602_v20 = vsel %vm337_vm0, %v589_v12, -inf  ;;  %v604_v21 = vsel %vm337_vm0, %v591_v13, -inf  ;;  %v601_v23 = vmax.f32 %v597_v15, %v600_v19  ;;  %v588_v29 = vld [vmem:[%s580_s14 + $0x38] sm:$0x7f] }
 0x18b   : >> { %v606_v24 = vsel %vm337_vm0, %v593_v17, -inf  ;;  %v610_v27 = vsel %vm339_vm1, %v582_v22, -inf  ;;  %v590_v30 = vld [vmem:[%s580_s14 + $0x48] sm:$0x7f]  ;;  %v592_v31 = vld [vmem:[%s580_s14 + $0x58] sm:$0x7f] }
 0x18c   : >> { %v603_v28 = vmax.f32 %v599_v18, %v602_v20  ;;  %v605_v32 = vmax.f32 %v601_v23, %v604_v21  ;;  %v594_v33 = vld [vmem:[%s580_s14 + $0x68] sm:$0x7f]  ;;  %v611_v34 = vsel %vm339_vm1, %v584_v25, -inf  ;;  %v612_v35 = vsel %vm339_vm1, %v586_v26, -inf }
 0x18d   : >> { %v614_v36 = vsel %vm339_vm1, %v588_v29, -inf  ;;  %v613_v38 = vmax.f32 %v610_v27, %v612_v35  ;;  %v616_v40 = vsel %vm339_vm1, %v590_v30, -inf  ;;  %v618_v41 = vsel %vm339_vm1, %v592_v31, -inf }
 0x18e   : >> { %v607_v37 = vmax.f32 %v603_v28, %v606_v24  ;;  %v615_v39 = vmax.f32 %v611_v34, %v614_v36  ;;  %v620_v42 = vsel %vm339_vm1, %v594_v33, -inf }
 0x18f   : >> { %v617_v44 = vmax.f32 %v613_v38, %v616_v40 }
 0x190   : >> { %v608_v43 = vmax.f32 %v607_v37, %v605_v32  ;;  %v619_v45 = vmax.f32 %v615_v39, %v618_v41 }
 0x191   : >> { %v621_v47 = vmax.f32 %v617_v44, %v620_v42 }
 0x192   : >> { %v623_v46 = vsel %vm339_vm1, %v608_v43, -inf  ;;  %v636_v50 = vsel %vm635_vm3, %v608_v43, -inf  ;;  %v648_v51 = vsel %vm647_vm4, %v608_v43, -inf  ;;  %vm675_vm1 = vcmask (%p574_p5), 124928  }
 0x193   : >> { %v624_v48 = vrot.slane %v623_v46, 4  ;;  %v622_v49 = vmax.f32 %v621_v47, %v619_v45  ;;  %vm796_vm3 = vcmask (%p574_p5), 1043328   ;;  %vm1592_vm4 = vcmask (%p574_p5), 1042432  }
 0x195   : >> { %v625_v52 = vmax.f32 %v623_v46, %v624_v48  ;;  %v638_v53 = vsel %vm637_vm5, %v622_v49, -inf  ;;  %v649_v54 = vsel %vm566_vm2, %v622_v49, -inf  ;;  %vm779_vm2 = vcmask (%p574_p5), 912128  }
 0x196   : >> { %v639_v56 = vmax.f32 %v636_v50, %v638_v53  ;;  %v650_v57 = vmax.f32 %v648_v51, %v649_v54  ;;  %vm1579_vm5 = vcmask (%p574_p5), 23552  }
 0x197   : >> { %v626_v55 = vrot.slane %v625_v52, 2 }
 0x198   : >> { %v640_v59 = vrot.slane %v639_v56, 4  ;;  %v651_v60 = vrot.slane %v650_v57, 4 }
 0x199   : >> { %v627_v58 = vmax.f32 %v625_v52, %v626_v55 }
 0x19a   : >> { %v641_v62 = vmax.f32 %v639_v56, %v640_v59  ;;  %v652_v63 = vmax.f32 %v650_v57, %v651_v60 }
 0x19b   : >> { %v628_v61 = vrot.slane %v627_v58, 1 }
 0x19c   : >> { %v642_v1 = vrot.slane %v641_v62, 2  ;;  %v653_v2 = vrot.slane %v652_v63, 2 }
 0x19d   : >> { %v629_v0 = vmax.f32 %v627_v58, %v628_v61 }
 0x19e   : >> { %v643_v3 = vmax.f32 %v641_v62, %v642_v1  ;;  %v654_v4 = vmax.f32 %v652_v63, %v653_v2  ;;  %576 = sbr.rel (!%p574_p5) target bundleno = 385 (0x181), region = 121 }
 0x19f   : >> { %1942 = vst.msk [vmem:[%s1861_s21 + $0x9] sm:$0x1] %vm633_vm6, %v629_v0 }
 0x1a0   : >> { %v644_v5 = vrot.slane %v643_v3, 1  ;;  %v655_v6 = vrot.slane %v654_v4, 1 }
 0x1a2   : >> { %v645_v8 = vmax.f32 %v643_v3, %v644_v5  ;;  %v656_v9 = vmax.f32 %v654_v4, %v655_v6 }
 0x1a4   : >> { %1943 = vst.msk [vmem:[%s1861_s21 + $0xa] sm:$0x1] %vm633_vm6, %v645_v8  ;;  %1944 = vst.msk [vmem:[%s1861_s21 + $0xb] sm:$0x1] %vm633_vm6, %v656_v9 }
 0x1ab   : > { %v677_v10 = vld [vmem:[#allocation4 + $0x1] sm:$0x1]  ;;  %v678_v11 = vld [vmem:[#allocation4 + $0x9] sm:$0x1]  ;;  %v679_v12 = vld [vmem:[#allocation4 + $0x11] sm:$0x1] }
 0x1ac   : > { %v683_v13 = vrot.slane %v678_v11, 7  ;;  %v686_v14 = vrot.slane %v679_v12, 6  ;;  %v712_v15 = vld [vmem:[#allocation4 + $0x8] sm:$0x1]  ;;  %v713_v16 = vld [vmem:[#allocation4 + $0x10] sm:$0x1] }
 0x1ad   : > { %v714_v17 = vld [vmem:[#allocation4 + $0x18] sm:$0x1]  ;;  %v718_v18 = vrot.slane %v713_v16, 7  ;;  %v694_v19 = vld [vmem:[#allocation4 + $0x2] sm:$0x1] }
 0x1ae   : > { %v684_v20 = vsel %vm665_vm7, %v683_v13, %v677_v10  ;;  %v721_v21 = vrot.slane %v714_v17, 6  ;;  %v695_v22 = vld [vmem:[#allocation4 + $0xa] sm:$0x1]  ;;  %v696_v23 = vld [vmem:[#allocation4 + $0x12] sm:$0x1] }
 0x1af   : > { %v685_v24 = vsel %vm667_vm8, %v683_v13, %v684_v20  ;;  %v719_v25 = vsel %vm665_vm7, %v718_v18, %v712_v15  ;;  %v700_v26 = vrot.slane %v695_v22, 7  ;;  %v703_v27 = vrot.slane %v696_v23, 6  ;;  %v729_v28 = vld [vmem:[#allocation4 + $0x9] sm:$0x1]  ;;  %v730_v29 = vld [vmem:[#allocation4 + $0x11] sm:$0x1] }
 0x1b0   : > { %v687_v30 = vsel %vm670_vm9, %v686_v14, %v685_v24  ;;  %v720_v31 = vsel %vm667_vm8, %v718_v18, %v719_v25  ;;  %v731_v32 = vld [vmem:[#allocation4 + $0x19] sm:$0x1]  ;;  %v735_v33 = vrot.slane %v730_v29, 7  ;;  %v746_v34 = vld [vmem:[#allocation4 + $0xa] sm:$0x1] }
 0x1b1   : > { %v688_v35 = vsel %vm672_vm10, %v686_v14, %v687_v30  ;;  %v722_v36 = vsel %vm670_vm9, %v721_v21, %v720_v31  ;;  %v701_v37 = vsel %vm665_vm7, %v700_v26, %v694_v19  ;;  %v738_v38 = vrot.slane %v731_v32, 6  ;;  %v747_v39 = vld [vmem:[#allocation4 + $0x12] sm:$0x1]  ;;  %v748_v40 = vld [vmem:[#allocation4 + $0x1a] sm:$0x1] }
 0x1b2   : > { %689 = vrot.lane.b32.xlu0 %v688_v35, %s2202_s22  ;;  %v723_v41 = vsel %vm672_vm10, %v721_v21, %v722_v36  ;;  %v702_v42 = vsel %vm667_vm8, %v700_v26, %v701_v37  ;;  %v736_v43 = vsel %vm665_vm7, %v735_v33, %v729_v28  ;;  %v752_v44 = vrot.slane %v747_v39, 7  ;;  %v764_v45 = vld [vmem:[#allocation4 + $0x10] sm:$0x1]  ;;  %v765_v46 = vld [vmem:[#allocation4 + $0x18] sm:$0x1] }
 0x1b3   : > { %724 = vrot.lane.b32.xlu1 %v723_v41, %s2203_s23  ;;  %v704_v47 = vsel %vm670_vm9, %v703_v27, %v702_v42  ;;  %v737_v48 = vsel %vm667_vm8, %v735_v33, %v736_v43  ;;  %v755_v49 = vrot.slane %v748_v40, 6  ;;  %v766_v50 = vld [vmem:[#allocation4 + $0x20] sm:$0x1]  ;;  %v770_v51 = vrot.slane %v765_v46, 7  ;;  %v781_v52 = vld [vmem:[#allocation4 + $0x11] sm:$0x1] }
 0x1b4   : > { %v705_v53 = vsel %vm672_vm10, %v703_v27, %v704_v47  ;;  %v739_v54 = vsel %vm670_vm9, %v738_v38, %v737_v48  ;;  %v753_v55 = vsel %vm665_vm7, %v752_v44, %v746_v34  ;;  %v773_v56 = vrot.slane %v766_v50, 6  ;;  %v782_v57 = vld [vmem:[#allocation4 + $0x19] sm:$0x1]  ;;  %v783_v58 = vld [vmem:[#allocation4 + $0x21] sm:$0x1] }
 0x1b5   : > { %v740_v59 = vsel %vm672_vm10, %v738_v38, %v739_v54  ;;  %v754_v60 = vsel %vm667_vm8, %v752_v44, %v753_v55  ;;  %v771_v61 = vsel %vm665_vm7, %v770_v51, %v764_v45  ;;  %v787_v62 = vrot.slane %v782_v57, 7  ;;  %v928_v63 = vld [vmem:[#allocation4 + $0x2] sm:$0x1]  ;;  %v929_v0 = vld [vmem:[#allocation4 + $0xa] sm:$0x1] }
 0x1b6   : > { %706 = vrot.lane.b32.xlu0 %v705_v53, %s2204_s24  ;;  %v756_v1 = vsel %vm670_vm9, %v755_v49, %v754_v60  ;;  %v772_v2 = vsel %vm667_vm8, %v770_v51, %v771_v61  ;;  %v790_v3 = vrot.slane %v783_v58, 6  ;;  %v930_v4 = vld [vmem:[#allocation4 + $0x12] sm:$0x1]  ;;  %v934_v5 = vrot.slane %v929_v0, 7  ;;  %v944_v6 = vld [vmem:[#allocation4 + $0x3] sm:$0x1] }
 0x1b7   : > { %741 = vrot.lane.b32.xlu1 %v740_v59, %s2205_s25  ;;  %v757_v8 = vsel %vm672_vm10, %v755_v49, %v756_v1  ;;  %v774_v9 = vsel %vm670_vm9, %v773_v56, %v772_v2  ;;  %v788_v10 = vsel %vm665_vm7, %v787_v62, %v781_v52  ;;  %v937_v11 = vrot.slane %v930_v4, 6  ;;  %v945_v12 = vld [vmem:[#allocation4 + $0xb] sm:$0x1]  ;;  %v946_v13 = vld [vmem:[#allocation4 + $0x13] sm:$0x1] }
 0x1b8   : > { %v775_v14 = vsel %vm672_vm10, %v773_v56, %v774_v9  ;;  %v789_v15 = vsel %vm667_vm8, %v787_v62, %v788_v10  ;;  %v935_v16 = vsel %vm665_vm7, %v934_v5, %v928_v63  ;;  %v950_v17 = vrot.slane %v945_v12, 7  ;;  %v960_v18 = vld [vmem:[#allocation4 + $0x9] sm:$0x1]  ;;  %v961_v19 = vld [vmem:[#allocation4 + $0x11] sm:$0x1] }
 0x1b9   : > { %v791_v20 = vsel %vm670_vm9, %v790_v3, %v789_v15  ;;  %v936_v21 = vsel %vm667_vm8, %v934_v5, %v935_v16  ;;  %v953_v22 = vrot.slane %v946_v13, 6  ;;  %v962_v23 = vld [vmem:[#allocation4 + $0x19] sm:$0x1]  ;;  %v966_v24 = vrot.slane %v961_v19, 7  ;;  %v976_v25 = vld [vmem:[#allocation4 + $0xa] sm:$0x1] }
 0x1ba   : > { %758 = vrot.lane.b32.xlu0 %v757_v8, %s2206_s26  ;;  %v792_v26 = vsel %vm672_vm10, %v790_v3, %v791_v20  ;;  %v938_v27 = vsel %vm670_vm9, %v937_v11, %v936_v21  ;;  %v951_v28 = vsel %vm665_vm7, %v950_v17, %v944_v6  ;;  %v969_v29 = vrot.slane %v962_v23, 6  ;;  %v977_v30 = vld [vmem:[#allocation4 + $0x12] sm:$0x1]  ;;  %v978_v31 = vld [vmem:[#allocation4 + $0x1a] sm:$0x1] }
 0x1bb   : > { %776 = vrot.lane.b32.xlu1 %v775_v14, %s2207_s28  ;;  %v939_v32 = vsel %vm672_vm10, %v937_v11, %v938_v27  ;;  %v952_v33 = vsel %vm667_vm8, %v950_v17, %v951_v28  ;;  %v967_v34 = vsel %vm665_vm7, %v966_v24, %v960_v18  ;;  %v982_v35 = vrot.slane %v977_v30, 7  ;;  %v992_v36 = vld [vmem:[#allocation4 + $0xb] sm:$0x1]  ;;  %v993_v37 = vld [vmem:[#allocation4 + $0x13] sm:$0x1] }
 0x1bc   : > { %v954_v38 = vsel %vm670_vm9, %v953_v22, %v952_v33  ;;  %v968_v39 = vsel %vm667_vm8, %v966_v24, %v967_v34  ;;  %v985_v40 = vrot.slane %v978_v31, 6  ;;  %v994_v41 = vld [vmem:[#allocation4 + $0x1b] sm:$0x1]  ;;  %v998_v42 = vrot.slane %v993_v37, 7  ;;  %v1008_v43 = vld [vmem:[#allocation4 + $0x11] sm:$0x1] }
 0x1bd   : > { %v970_v44 = vsel %vm670_vm9, %v969_v29, %v968_v39  ;;  %v983_v45 = vsel %vm665_vm7, %v982_v35, %v976_v25  ;;  %v1001_v46 = vrot.slane %v994_v41, 6  ;;  %v1009_v47 = vld [vmem:[#allocation4 + $0x19] sm:$0x1]  ;;  %v1010_v48 = vld [vmem:[#allocation4 + $0x21] sm:$0x1]  ;;  %v955_v49 = vsel %vm672_vm10, %v953_v22, %v954_v38 }
 0x1be   : > { %793 = vrot.lane.b32.xlu0 %v792_v26, %s2208_s30  ;;  %v984_v50 = vsel %vm667_vm8, %v982_v35, %v983_v45  ;;  %v999_v51 = vsel %vm665_vm7, %v998_v42, %v992_v36  ;;  %v1014_v52 = vrot.slane %v1009_v47, 7  ;;  %v1024_v53 = vld [vmem:[#allocation4 + $0x12] sm:$0x1]  ;;  %v1025_v54 = vld [vmem:[#allocation4 + $0x1a] sm:$0x1]  ;;  %v1017_v57 = vrot.slane %v1010_v48, 6 }
 0x1bf   : > { %940 = vrot.lane.b32.xlu1 %v939_v32, %s2202_s22  ;;  %v986_v55 = vsel %vm670_vm9, %v985_v40, %v984_v50  ;;  %v1000_v56 = vsel %vm667_vm8, %v998_v42, %v999_v51  ;;  %v1026_v58 = vld [vmem:[#allocation4 + $0x22] sm:$0x1]  ;;  %v1030_v59 = vrot.slane %v1025_v54, 7  ;;  %v1173_v60 = vld [vmem:[#allocation4 + $0x3] sm:$0x1]  ;;  %v971_v61 = vsel %vm672_vm10, %v969_v29, %v970_v44 }
 0x1c0   : > { %v1002_v62 = vsel %vm670_vm9, %v1001_v46, %v1000_v56  ;;  %v1015_v63 = vsel %vm665_vm7, %v1014_v52, %v1008_v43  ;;  %v1033_v0 = vrot.slane %v1026_v58, 6  ;;  %v1174_v1 = vld [vmem:[#allocation4 + $0xb] sm:$0x1]  ;;  %v2486_v2 = vld [vmem:[#allocation4 + $0x13] sm:$0x1]  ;;  %v987_v9 = vsel %vm672_vm10, %v985_v40, %v986_v55 }
 0x1c1   : > { %v1016_v3 = vsel %vm667_vm8, %v1014_v52, %v1015_v63  ;;  %v1031_v4 = vsel %vm665_vm7, %v1030_v59, %v1024_v53  ;;  %v1179_v5 = vrot.slane %v1174_v1, 7  ;;  %v1189_v6 = vld [vmem:[#allocation4 + $0x4] sm:$0x1]  ;;  %v1190_v8 = vld [vmem:[#allocation4 + $0xc] sm:$0x1]  ;;  %v1003_v10 = vsel %vm672_vm10, %v1001_v46, %v1002_v62  ;;  %v813_v46 = vld [vmem:[%s2884_s4] sm:$0xff] }
 0x1c2   : > { %956 = vrot.lane.b32.xlu0 %v955_v49, %s2204_s24  ;;  %v1032_v11 = vsel %vm667_vm8, %v1030_v59, %v1031_v4  ;;  %v1191_v12 = vld [vmem:[#allocation4 + $0x14] sm:$0x1]  ;;  %v1195_v13 = vrot.slane %v1190_v8, 7  ;;  %v1018_v14 = vsel %vm670_vm9, %v1017_v57, %v1016_v3  ;;  %v1182_v17 = vrot.slane %v2486_v2, 6  ;;  %v1205_v18 = vld [vmem:[#allocation4 + $0xa] sm:$0x1] }
 0x1c3   : > { %972 = vrot.lane.b32.xlu1 %v971_v61, %s2203_s23  ;;  %v1034_v15 = vsel %vm670_vm9, %v1033_v0, %v1032_v11  ;;  %v1180_v16 = vsel %vm665_vm7, %v1179_v5, %v1173_v60  ;;  %v1206_v19 = vld [vmem:[#allocation4 + $0x12] sm:$0x1]  ;;  %v1198_v22 = vrot.slane %v1191_v12, 6  ;;  %v1221_v24 = vld [vmem:[#allocation4 + $0xb] sm:$0x1]  ;;  %v1019_v30 = vsel %vm672_vm10, %v1017_v57, %v1018_v14  ;;  %v814_v53 = vld [vmem:[%s2884_s4 + $0x8] sm:$0xff] }
 0x1c4   : > { %v1181_v20 = vsel %vm667_vm8, %v1179_v5, %v1180_v16  ;;  %v1196_v21 = vsel %vm665_vm7, %v1195_v13, %v1189_v6  ;;  %v1211_v23 = vrot.slane %v1206_v19, 7  ;;  %v1222_v25 = vld [vmem:[#allocation4 + $0x13] sm:$0x1]  ;;  %v2502_v27 = vld [vmem:[#allocation4 + $0x1a] sm:$0x1]  ;;  %v1035_v35 = vsel %vm672_vm10, %v1033_v0, %v1034_v15  ;;  %v815_v61 = vld [vmem:[%s2884_s4 + $0x10] sm:$0xff] }
 0x1c5   : > { %v1197_v26 = vsel %vm667_vm8, %v1195_v13, %v1196_v21  ;;  %v2504_v28 = vld [vmem:[#allocation4 + $0x1b] sm:$0x1]  ;;  %v1227_v29 = vrot.slane %v1222_v25, 7  ;;  %v1237_v32 = vld [vmem:[#allocation4 + $0xc] sm:$0x1]  ;;  %v1183_v36 = vsel %vm670_vm9, %v1182_v17, %v1181_v20  ;;  %v1214_v42 = vrot.slane %v2502_v27, 6 }
 0x1c6   : > { %988 = vrot.lane.b32.xlu0 %v987_v9, %s2205_s25  ;;  %v1212_v31 = vsel %vm665_vm7, %v1211_v23, %v1205_v18  ;;  %v1238_v33 = vld [vmem:[#allocation4 + $0x14] sm:$0x1]  ;;  %v2509_v34 = vld [vmem:[#allocation4 + $0x1c] sm:$0x1]  ;;  %v1253_v39 = vld [vmem:[#allocation4 + $0x12] sm:$0x1]  ;;  %v1199_v41 = vsel %vm670_vm9, %v1198_v22, %v1197_v26  ;;  %v1184_v59 = vsel %vm672_vm10, %v1182_v17, %v1183_v36  ;;  %v2546_v3 = vpack.c.bf16 %v814_v53, %v813_v46 }
 0x1c7   : > { %1004 = vrot.lane.b32.xlu1 %v1003_v10, %s2206_s26  ;;  %v1228_v37 = vsel %vm665_vm7, %v1227_v29, %v1221_v24  ;;  %v1243_v38 = vrot.slane %v1238_v33, 7  ;;  %v1254_v40 = vld [vmem:[#allocation4 + $0x1a] sm:$0x1]  ;;  %v1230_v43 = vrot.slane %v2504_v28, 6  ;;  %v1255_v44 = vld [vmem:[#allocation4 + $0x22] sm:$0x1]  ;;  %v1213_v47 = vsel %vm667_vm8, %v1211_v23, %v1212_v31 }
 0x1c8   : > { %v1259_v45 = vrot.slane %v1254_v40, 7  ;;  %v1229_v48 = vsel %vm667_vm8, %v1227_v29, %v1228_v37  ;;  %v1246_v50 = vrot.slane %v2509_v34, 6  ;;  %v1269_v51 = vld [vmem:[#allocation4 + $0x13] sm:$0x1]  ;;  %v1270_v52 = vld [vmem:[#allocation4 + $0x1b] sm:$0x1]  ;;  %v1200_v63 = vsel %vm672_vm10, %v1198_v22, %v1199_v41 }
 0x1c9   : > { %v1244_v49 = vsel %vm665_vm7, %v1243_v38, %v1237_v32  ;;  %v1262_v56 = vrot.slane %v1255_v44, 6  ;;  %v2531_v57 = vld [vmem:[#allocation4 + $0x23] sm:$0x1]  ;;  %v1275_v58 = vrot.slane %v1270_v52, 7  ;;  %v816_v62 = vld [vmem:[%s2884_s4 + $0x18] sm:$0xff]  ;;  %v1215_v0 = vsel %vm670_vm9, %v1214_v42, %v1213_v47  ;;  %v817_v10 = vld [vmem:[%s2884_s4 + $0x20] sm:$0xff] }
 0x1ca   : > { %1020 = vrot.lane.b32.xlu0 %v1019_v30, %s2207_s28  ;;  %v1245_v54 = vsel %vm667_vm8, %v1243_v38, %v1244_v49  ;;  %v1260_v55 = vsel %vm665_vm7, %v1259_v45, %v1253_v39  ;;  %v2209_v2 = vmov 0.0|0.0   ;;  %v659_v4 = vld [vmem:[#allocation4 + $0x8] sm:$0x1]  ;;  %v660_v5 = vld [vmem:[#allocation4 + $0x10] sm:$0x1]  ;;  %v1231_v6 = vsel %vm670_vm9, %v1230_v43, %v1229_v48  ;;  %v818_v11 = vld [vmem:[%s2884_s4 + $0x28] sm:$0xff] }
 0x1cb   : > { %1036 = vrot.lane.b32.xlu1 %v1035_v35, %s2208_s30  ;;  %v1261_v60 = vsel %vm667_vm8, %v1259_v45, %v1260_v55  ;;  %v1276_v1 = vsel %vm665_vm7, %v1275_v58, %v1269_v51  ;;  %2002 = vmatprep.subr.bf16.mxu0 %v2209_v2  ;;  %v1247_v8 = vsel %vm670_vm9, %v1246_v50, %v1245_v54  ;;  %v1278_v9 = vrot.slane %v2531_v57, 6  ;;  %v819_v15 = vld [vmem:[%s2884_s4 + $0x30] sm:$0xff]  ;;  %v820_v16 = vld [vmem:[%s2884_s4 + $0x38] sm:$0xff]  ;;  %v799_v21 = vld [vmem:[#allocation4 + $0x1a] sm:$0x1] }
 0x1cc   : > { %2029 = vmatprep.subr.bf16.mxu1 %v2209_v2  ;;  %v1263_v12 = vsel %vm670_vm9, %v1262_v56, %v1261_v60  ;;  %v1277_v13 = vsel %vm667_vm8, %v1275_v58, %v1276_v1  ;;  %2004 = vmatpush1.bf16.msra.mxu0 %v2546_v3  ;;  %v2562_v14 = vpack.c.bf16 %v816_v62, %v815_v61  ;;  %v658_v17 = vld [vmem:[#allocation4] sm:$0x1]  ;;  %v664_v19 = vrot.slane %v659_v4, 7  ;;  %v800_v22 = vld [vmem:[#allocation4 + $0x22] sm:$0x1]  ;;  %v821_v61 = vld [vmem:[%s2884_s4 + $0x40] sm:$0xff] }
 0x1cd   : > { %v1216_v18 = vsel %vm672_vm10, %v1214_v42, %v1215_v0  ;;  %2005 = vmatprep.subr.bf16.mxu0 %v2209_v2  ;;  %v669_v20 = vrot.slane %v660_v5, 6  ;;  %v1232_v23 = vsel %vm672_vm10, %v1230_v43, %v1231_v6  ;;  %v1248_v24 = vsel %vm672_vm10, %v1246_v50, %v1247_v8  ;;  %2031 = vmatpush1.bf16.msra.mxu1 %v2546_v3  ;;  %v798_v25 = vld [vmem:[#allocation4 + $0x12] sm:$0x1]  ;;  %v915_v26 = vld [vmem:[#allocation4 + $0x9] sm:$0x1]  ;;  %v822_v62 = vld [vmem:[%s2884_s4 + $0x48] sm:$0xff] }
 0x1ce   : > { %1185 = vrot.lane.b32.xlu0 %v1184_v59, %s2202_s22  ;;  %v916_v27 = vld [vmem:[#allocation4 + $0x11] sm:$0x1]  ;;  %v1264_v28 = vsel %vm672_vm10, %v1262_v56, %v1263_v12  ;;  %v1279_v29 = vsel %vm670_vm9, %v1278_v9, %v1277_v13  ;;  %v666_v30 = vsel %vm665_vm7, %v664_v19, %v658_v17  ;;  %2032 = vmatprep.subr.bf16.mxu1 %v2209_v2  ;;  %v914_v31 = vld [vmem:[#allocation4 + $0x1] sm:$0x1]  ;;  %v1041_v32 = vld [vmem:[#allocation4 + $0x1b] sm:$0x1] }
 0x1cf   : > { %1201 = vrot.lane.b32.xlu1 %v1200_v63, %s2204_s24  ;;  %v2582_v33 = vpack.c.bf16 %v818_v11, %v817_v10  ;;  %v668_v34 = vsel %vm667_vm8, %v664_v19, %v666_v30  ;;  %v804_v35 = vrot.slane %v799_v21, 7  ;;  %v807_v36 = vrot.slane %v800_v22, 6  ;;  %v1042_v37 = vld [vmem:[#allocation4 + $0x23] sm:$0x1]  ;;  %v1160_v38 = vld [vmem:[#allocation4 + $0xa] sm:$0x1] }
 0x1d0   : > { %2007 = vmatpush1.bf16.msra.mxu0 %v2562_v14  ;;  %v2587_v39 = vpack.c.bf16 %v820_v16, %v819_v15  ;;  %v671_v40 = vsel %vm670_vm9, %v669_v20, %v668_v34  ;;  %v920_v41 = vrot.slane %v915_v26, 7  ;;  %v923_v42 = vrot.slane %v916_v27, 6  ;;  %v1040_v43 = vld [vmem:[#allocation4 + $0x13] sm:$0x1]  ;;  %v1161_v44 = vld [vmem:[#allocation4 + $0x12] sm:$0x1] }
 0x1d1   : > { %2008 = vmatprep.subr.bf16.mxu0 %v2209_v2  ;;  %v1280_v45 = vsel %vm672_vm10, %v1278_v9, %v1279_v29  ;;  %v673_v46 = vsel %vm672_vm10, %v669_v20, %v671_v40  ;;  %2034 = vmatpush1.bf16.msra.mxu1 %v2562_v14  ;;  %v805_v47 = vsel %vm665_vm7, %v804_v35, %v798_v25  ;;  %v1046_v48 = vrot.slane %v1041_v32, 7  ;;  %v1286_v49 = vld [vmem:[#allocation4 + $0x1c] sm:$0x1]  ;;  %v1159_v53 = vld [vmem:[#allocation4 + $0x2] sm:$0x1]  ;;  %v828_v27 = vld [vmem:[%s2884_s4 + $0x78] sm:$0xff] }
 0x1d2   : > { %1217 = vrot.lane.b32.xlu0 %v1216_v18, %s2203_s23  ;;  %676 = vst.msk [vmem:[#allocation5] sm:$0x7] %vm675_vm1, %v673_v46  ;;  %2035 = vmatprep.subr.bf16.mxu1 %v2209_v2  ;;  %v806_v50 = vsel %vm667_vm8, %v804_v35, %v805_v47  ;;  %v921_v51 = vsel %vm665_vm7, %v920_v41, %v914_v31  ;;  %v1049_v52 = vrot.slane %v1042_v37, 6  ;;  %v1165_v54 = vrot.slane %v1160_v38, 7  ;;  %v1287_v55 = vld [vmem:[#allocation4 + $0x24] sm:$0x1] }
 0x1d3   : > { %1233 = vrot.lane.b32.xlu1 %v1232_v23, %s2205_s25  ;;  %v808_v56 = vsel %vm670_vm9, %v807_v36, %v806_v50  ;;  %v922_v57 = vsel %vm667_vm8, %v920_v41, %v921_v51  ;;  %v1047_v58 = vsel %vm665_vm7, %v1046_v48, %v1040_v43  ;;  %v1168_v59 = vrot.slane %v1161_v44, 6  ;;  %v1285_v60 = vld [vmem:[#allocation4 + $0x14] sm:$0x1]  ;;  %v823_v17 = vld [vmem:[%s2884_s4 + $0x50] sm:$0xff]  ;;  %v824_v18 = vld [vmem:[%s2884_s4 + $0x58] sm:$0xff] }
 0x1d4   : > { %2010 = vmatpush1.bf16.msra.mxu0 %v2582_v33  ;;  %v809_v63 = vsel %vm672_vm10, %v807_v36, %v808_v56  ;;  %v924_v0 = vsel %vm670_vm9, %v923_v42, %v922_v57  ;;  %v1048_v1 = vsel %vm667_vm8, %v1046_v48, %v1047_v58  ;;  %v1291_v4 = vrot.slane %v1286_v49, 7  ;;  %v825_v23 = vld [vmem:[%s2884_s4 + $0x60] sm:$0xff]  ;;  %v827_v26 = vld [vmem:[%s2884_s4 + $0x70] sm:$0xff]  ;;  %v830_v30 = vld [vmem:[%s2884_s4 + $0x88] sm:$0xff] }
 0x1d5   : > { %2011 = vmatprep.subr.bf16.mxu0 %v2209_v2  ;;  %811 = vst.msk [vmem:[#allocation5 + $0x4] sm:$0x7] %vm675_vm1, %v809_v63  ;;  %v2616_v5 = vsel %vm672_vm10, %v923_v42, %v924_v0  ;;  %2037 = vmatpush1.bf16.msra.mxu1 %v2582_v33  ;;  %v1050_v6 = vsel %vm670_vm9, %v1049_v52, %v1048_v1  ;;  %v1294_v9 = vrot.slane %v1287_v55, 6  ;;  %v829_v29 = vld [vmem:[%s2884_s4 + $0x80] sm:$0xff]  ;;  %v1414_v1 = vld [vmem:[%s2886_s6 + $0x48] sm:$0xff] }
 0x1d6   : > { %1249 = vrot.lane.b32.xlu0 %v1248_v24, %s2206_s26  ;;  %v1166_v8 = vsel %vm665_vm7, %v1165_v54, %v1159_v53  ;;  %2038 = vmatprep.subr.bf16.mxu1 %v2209_v2  ;;  %v2623_v10 = vsel %vm672_vm10, %v1049_v52, %v1050_v6  ;;  %v1292_v12 = vsel %vm665_vm7, %v1291_v4, %v1285_v60  ;;  %v826_v24 = vld [vmem:[%s2884_s4 + $0x68] sm:$0xff]  ;;  %v1945_v57 = vld [vmem:[%s2885_s5] ss:$0 sm:$0xff] }
 0x1d7   : > { %1265 = vrot.lane.b32.xlu1 %v1264_v28, %s2207_s28  ;;  %v1167_v11 = vsel %vm667_vm8, %v1165_v54, %v1166_v8  ;;  %v2629_v13 = vpack.c.bf16 %v822_v62, %v821_v61  ;;  %v1293_v16 = vsel %vm667_vm8, %v1291_v4, %v1292_v12  ;;  %v2650_v22 = vpack.c.bf16 %v824_v18, %v823_v17  ;;  %v1406_v61 = vld [vmem:[%s2886_s6 + $0x8] sm:$0xff]  ;;  %v1405_v62 = vld [vmem:[%s2886_s6] sm:$0xff] }
 0x1d8   : > { %2013 = vmatpush1.bf16.msra.mxu0 %v2587_v39  ;;  %v1169_v15 = vsel %vm670_vm9, %v1168_v59, %v1167_v11  ;;  %v1295_v20 = vsel %vm670_vm9, %v1294_v9, %v1293_v16  ;;  %v2662_v25 = vpack.c.bf16 %v826_v24, %v825_v23  ;;  %v2674_v28 = vpack.c.bf16 %v828_v27, %v827_v26  ;;  %v1409_v0 = vld [vmem:[%s2886_s6 + $0x20] sm:$0xff]  ;;  %v1418_v4 = vld [vmem:[%s2886_s6 + $0x68] sm:$0xff] }
 0x1d9   : > { %2014 = vmatprep.subr.bf16.mxu0 %v2209_v2  ;;  %v2641_v19 = vsel %vm672_vm10, %v1168_v59, %v1169_v15  ;;  %2040 = vmatpush1.bf16.msra.mxu1 %v2587_v39  ;;  %v2646_v21 = vsel %vm672_vm10, %v1294_v9, %v1295_v20  ;;  %v2686_v31 = vpack.c.bf16 %v830_v30, %v829_v29  ;;  %v1413_v11 = vld [vmem:[%s2886_s6 + $0x40] sm:$0xff]  ;;  %v1422_v15 = vld [vmem:[%s2886_s6 + $0x88] sm:$0xff]  ;;  %v1408_v20 = vld [vmem:[%s2886_s6 + $0x18] sm:$0xff] }
 0x1da   : > { %1281 = vrot.lane.b32.xlu0 %v1280_v45, %s2208_s30  ;;  %2041 = vmatprep.subr.bf16.mxu1 %v2209_v2  ;;  %v2087_v6 = vpack.c.bf16 %v1418_v4, %v1414_v1  ;;  %v1417_v12 = vld [vmem:[%s2886_s6 + $0x60] sm:$0xff]  ;;  %v1426_v16 = vld [vmem:[%s2886_s6 + $0xa8] sm:$0xff]  ;;  %v1407_v29 = vld [vmem:[%s2886_s6 + $0x10] sm:$0xff] }
 0x1db   : > { %v1421_v17 = vld [vmem:[%s2886_s6 + $0x80] sm:$0xff]  ;;  %v2091_v18 = vpack.c.bf16 %v1426_v16, %v1422_v15  ;;  %v1411_v30 = vld [vmem:[%s2886_s6 + $0x30] sm:$0xff] }
 0x1dc   : > { %2016 = vmatpush1.bf16.msra.mxu0 %v2629_v13 }
 0x1dd   : > { %2017 = vmatprep.subr.bf16.mxu0 %v2209_v2  ;;  %2043 = vmatpush1.bf16.msra.mxu1 %v2629_v13 }
 0x1de   : > { %2044 = vmatprep.subr.bf16.mxu1 %v2209_v2 }
 0x1e0   : > { %2019 = vmatpush1.bf16.msra.mxu0 %v2650_v22 }
 0x1e1   : > { %2020 = vmatprep.subr.bf16.mxu0 %v2209_v2  ;;  %2046 = vmatpush1.bf16.msra.mxu1 %v2650_v22 }
 0x1e2   : > { %2047 = vmatprep.subr.bf16.mxu1 %v2209_v2 }
 0x1e4   : > { %2022 = vmatpush1.bf16.msra.mxu0 %v2662_v25 }
 0x1e5   : > { %2023 = vmatprep.subr.bf16.mxu0 %v2209_v2  ;;  %2049 = vmatpush1.bf16.msra.mxu1 %v2662_v25 }
 0x1e6   : > { %2050 = vmatprep.subr.bf16.mxu1 %v2209_v2 }
 0x1e8   : > { %2025 = vmatpush1.bf16.msra.mxu0 %v2674_v28 }
 0x1e9   : > { %2026 = vmatprep.subr.bf16.mxu0 %v2209_v2  ;;  %2052 = vmatpush1.bf16.msra.mxu1 %v2674_v28 }
 0x1ea   : > { %2053 = vmatprep.subr.bf16.mxu1 %v2209_v2 }
 0x1ec   : > { %2028 = vmatpush1.bf16.msra.mxu0 %v2686_v31 }
 0x1ed   : > { %2056 = vmatprep.subr.bf16.mxu0 %v2209_v2  ;;  %2055 = vmatpush1.bf16.msra.mxu1 %v2686_v31 }
 0x224   : > { %v690_v32 = vpop.permute.xlu0 %689 }
 0x225   : > { %693 = vst.msk [vmem:[#allocation5] sm:$0x7] %vm692_vm11, %v690_v32  ;;  %v725_v34 = vpop.permute.xlu1 %724  ;;  %v1420_v32 = vld [vmem:[%s2886_s6 + $0x78] sm:$0xff] }
 0x228   : > { %v707_v35 = vpop.permute.xlu0 %706 }
 0x229   : > { %710 = vst.msk [vmem:[#allocation5] sm:$0x7] %vm709_vm12, %v707_v35  ;;  %v742_v36 = vpop.permute.xlu1 %741 }
 0x22a   : > { %728 = vst.msk [vmem:[#allocation5] sm:$0x7] %vm727_vm13, %v725_v34  ;;  %v2097_v34 = vpack.c.bf16 %v1411_v30, %v1407_v29 }
 0x22b   : > { %745 = vst.msk [vmem:[#allocation5] sm:$0x7] %vm744_vm14, %v742_v36  ;;  %v1415_v36 = vld [vmem:[%s2886_s6 + $0x50] sm:$0xff] }
 0x22c   : > { %v759_v37 = vpop.permute.xlu0 %758 }
 0x22d   : > { %762 = vst.msk [vmem:[#allocation5] sm:$0x7] %vm761_vm15, %v759_v37  ;;  %v777_v38 = vpop.permute.xlu1 %776  ;;  %v1419_v37 = vld [vmem:[%s2886_s6 + $0x70] sm:$0xff] }
 0x22e   : > { %780 = vst.msk [vmem:[#allocation5] sm:$0x7] %vm779_vm2, %v777_v38 }
 0x230   : > { %v794_v40 = vpop.permute.xlu0 %793 }
 0x231   : > { %797 = vst.msk [vmem:[#allocation5] sm:$0x7] %vm796_vm3, %v794_v40  ;;  %v941_v41 = vpop.permute.xlu1 %940  ;;  %v1424_v40 = vld [vmem:[%s2886_s6 + $0x98] sm:$0xff] }
 0x234   : > { %v957_v42 = vpop.permute.xlu0 %956 }
 0x235   : > { %v973_v43 = vpop.permute.xlu1 %972 }
 0x238   : > { %v812_v44 = vld [vmem:[#allocation5] sm:$0x77]  ;;  %v989_v45 = vpop.permute.xlu0 %988 }
 0x239   : > { %927 = vst.msk [vmem:[#allocation5] sm:$0x7] %vm675_vm1, %v2616_v5  ;;  %v1005_v46 = vpop.permute.xlu1 %1004  ;;  %v839_v47 = vcombine.high %v812_v44, %v812_v44  ;;  %1053 = vst.msk [vmem:[#allocation5 + $0x4] sm:$0x7] %vm675_vm1, %v2623_v10  ;;  %v2085_v5 = vpack.c.bf16 %v1409_v0, %v1405_v62 }
 0x23a   : > { %943 = vst.msk [vmem:[#allocation5] sm:$0x7] %vm692_vm11, %v941_v41  ;;  %v1428_v41 = vld [vmem:[%s2886_s6 + $0xb8] sm:$0xff] }
 0x23b   : > { %959 = vst.msk [vmem:[#allocation5] sm:$0x7] %vm709_vm12, %v957_v42  ;;  %1946 = vmatprep.mubr.msk.f32.mxu0 %vm337_vm0, %v839_v47  ;;  %v2101_v42 = vpack.c.bf16 %v1419_v37, %v1415_v36 }
 0x23c   : > { %975 = vst.msk [vmem:[#allocation5] sm:$0x7] %vm727_vm13, %v973_v43  ;;  %908 = vmatmul.mubr.f32.vlgmr.msra.gmra.mrb[0].mxu0 %v812_v44  ;;  %v1021_v48 = vpop.permute.xlu0 %1020  ;;  %v2103_v43 = vpack.c.bf16 %v1428_v41, %v1424_v40  ;;  %v1423_v44 = vld [vmem:[%s2886_s6 + $0x90] sm:$0xff] }
 0x23d   : > { %991 = vst.msk [vmem:[#allocation5] sm:$0x7] %vm744_vm14, %v989_v45  ;;  %2058 = vmatpush1.bf16.msra.mxu0 %v2546_v3  ;;  %v1037_v49 = vpop.permute.xlu1 %1036  ;;  %v1427_v45 = vld [vmem:[%s2886_s6 + $0xb0] sm:$0xff] }
 0x23e   : > { %1007 = vst.msk [vmem:[#allocation5] sm:$0x7] %vm761_vm15, %v1005_v46  ;;  %2059 = vmatprep.subr.bf16.mxu0 %v2209_v2  ;;  %v2105_v46 = vpack.c.bf16 %v1427_v45, %v1423_v44 }
 0x23f   : > { %1023 = vst.msk [vmem:[#allocation5] sm:$0x7] %vm779_vm2, %v1021_v48 }
 0x240   : > { %1039 = vst.msk [vmem:[#allocation5] sm:$0x7] %vm796_vm3, %v1037_v49  ;;  %v1186_v50 = vpop.permute.xlu0 %1185  ;;  %v1575_v49 = vld [vmem:[%s2887_s7] sm:$0xff] }
 0x241   : > { %2061 = vmatpush1.bf16.msra.mxu0 %v2562_v14  ;;  %v1202_v51 = vpop.permute.xlu1 %1201 }
 0x242   : > { %2062 = vmatprep.subr.bf16.mxu0 %v2209_v2 }
 0x244   : > { %v1218_v52 = vpop.permute.xlu0 %1217 }
 0x245   : > { %2064 = vmatpush1.bf16.msra.mxu0 %v2582_v33  ;;  %v1234_v53 = vpop.permute.xlu1 %1233 }
 0x246   : > { %2065 = vmatprep.subr.bf16.mxu0 %v2209_v2 }
 0x247   : > { %v1054_v3 = vld [vmem:[#allocation5] sm:$0x77] }
 0x248   : > { %1172 = vst.msk [vmem:[#allocation5] sm:$0x7] %vm675_vm1, %v2641_v19  ;;  %v1081_v54 = vcombine.high %v1054_v3, %v1054_v3  ;;  %v1250_v55 = vpop.permute.xlu0 %1249  ;;  %1298 = vst.msk [vmem:[#allocation5 + $0x4] sm:$0x7] %vm675_vm1, %v2646_v21  ;;  %v1425_v19 = vld [vmem:[%s2886_s6 + $0xa0] sm:$0xff]  ;;  %v1412_v21 = vld [vmem:[%s2886_s6 + $0x38] sm:$0xff] }
 0x249   : > { %1188 = vst.msk [vmem:[#allocation5] sm:$0x7] %vm692_vm11, %v1186_v50  ;;  %2067 = vmatpush1.bf16.msra.mxu0 %v2587_v39  ;;  %v1266_v14 = vpop.permute.xlu1 %1265  ;;  %v2095_v23 = vpack.c.bf16 %v1412_v21, %v1408_v20  ;;  %v1576_v50 = vld [vmem:[%s2887_s7 + $0x8] sm:$0xff] }
 0x24a   : > { %1204 = vst.msk [vmem:[#allocation5] sm:$0x7] %vm709_vm12, %v1202_v51  ;;  %1948 = vmatprep.mubr.msk.f32.mxu1 %vm337_vm0, %v1081_v54  ;;  %2068 = vmatprep.subr.bf16.mxu0 %v2209_v2  ;;  %v1577_v51 = vld [vmem:[%s2887_s7 + $0x10] sm:$0xff] }
 0x24b   : > { %1220 = vst.msk [vmem:[#allocation5] sm:$0x7] %vm727_vm13, %v1218_v52  ;;  %1149 = vmatmul.mubr.f32.vlgmr.msra.gmra.mrb[0].mxu1 %v1054_v3  ;;  %v1578_v3 = vld [vmem:[%s2887_s7 + $0x18] sm:$0xff] }
 0x24c   : > { %1236 = vst.msk [vmem:[#allocation5] sm:$0x7] %vm744_vm14, %v1234_v53  ;;  %v1282_v33 = vpop.permute.xlu0 %1281  ;;  %1497 = vmatprep.mubr.f32.mxu1 %v2201_v7 }
 0x24d   : > { %2070 = vmatpush1.bf16.msra.mxu0 %v2629_v13  ;;  %1252 = vst.msk [vmem:[#allocation5] sm:$0x7] %vm761_vm15, %v1250_v55  ;;  %v2089_v13 = vpack.c.bf16 %v1417_v12, %v1413_v11 }
 0x24e   : > { %2071 = vmatprep.subr.bf16.mxu0 %v2209_v2  ;;  %1268 = vst.msk [vmem:[#allocation5] sm:$0x7] %vm779_vm2, %v1266_v14 }
 0x24f   : > { %1284 = vst.msk [vmem:[#allocation5] sm:$0x7] %vm796_vm3, %v1282_v33 }
 0x251   : > { %2073 = vmatpush1.bf16.msra.mxu0 %v2650_v22  ;;  %v2093_v22 = vpack.c.bf16 %v1425_v19, %v1421_v17 }
 0x252   : > { %2074 = vmatprep.subr.bf16.mxu0 %v2209_v2 }
 0x255   : > { %2076 = vmatpush1.bf16.msra.mxu0 %v2662_v25 }
 0x256   : > { %2077 = vmatprep.subr.bf16.mxu0 %v2209_v2  ;;  %v1299_v39 = vld [vmem:[#allocation5] sm:$0x77] }
 0x257   : > { %v1326_v56 = vcombine.high %v1299_v39, %v1299_v39 }
 0x259   : > { %2079 = vmatpush1.bf16.msra.mxu0 %v2674_v28  ;;  %1950 = vmatprep.mubr.msk.f32.mxu0 %vm337_vm0, %v1326_v56  ;;  %vm1429_vm0 = vcmask 392192  }
 0x25a   : > { %2080 = vmatprep.subr.bf16.mxu0 %v2209_v2  ;;  %v1410_v2 = vld [vmem:[%s2886_s6 + $0x28] sm:$0xff] }
 0x25b   : > { %v2083_v63 = vpack.c.bf16 %v1410_v2, %v1406_v61 }
 0x25d   : > { %2082 = vmatpush1.bf16.msra.mxu0 %v2686_v31  ;;  %2084 = vmatprep.subr.bf16.mxu1 %v2083_v63  ;;  %v1416_v31 = vld [vmem:[%s2886_s6 + $0x58] sm:$0xff] }
 0x25e   : > { %2086 = vmatpush1.bf16.msra.mxu1 %v2085_v5  ;;  %v2099_v35 = vpack.c.bf16 %v1420_v32, %v1416_v31 }
 0x25f   : > { %2088 = vmatprep.subr.bf16.mxu1 %v2087_v6 }
 0x260   : > { %1394 = vmatmul.mubr.f32.vlgmr.msra.gmra.mrb[2].mxu0 %v1299_v39 }
 0x261   : > { %1758 = vmatprep.mubr.f32.mxu0 %v2201_v7 }
 0x262   : > { %2090 = vmatpush1.bf16.msra.mxu1 %v2089_v13 }
 0x263   : > { %2092 = vmatprep.subr.bf16.mxu1 %v2091_v18 }
 0x266   : > { %2094 = vmatpush1.bf16.msra.mxu1 %v2093_v22 }
 0x267   : > { %2096 = vmatprep.subr.bf16.mxu1 %v2095_v23 }
 0x30f   : > { %v909_v58 = vpop.f32.mrb[0].mxu0 }
 0x310   : > { %v910_v59 = vadd.f32 %v1945_v57, %v909_v58  ;;  %v911_v60 = vpop.f32.mrb[1].mxu0 }
 0x312   : > { %913 = vst.msk [vmem:[#allocation6] sm:$0x7] %vm675_vm1, %v910_v59 }
 0x31e   : > { %v1150_v8 = vpop.f32.mrb[0].mxu1 }
 0x31f   : > { %v1151_v9 = vadd.f32 %v1945_v57, %v1150_v8  ;;  %v1152_v10 = vpop.f32.mrb[1].mxu1 }
 0x321   : > { %1155 = vrot.lane.b32.xlu1 %v1151_v9, %s2202_s22 }
 0x333   : > { %v1395_v24 = vpop.f32.mrb[2].mxu0 }
 0x334   : > { %v1396_v25 = vadd.f32 %v1945_v57, %v1395_v24  ;;  %v1397_v26 = vpop.f32.mrb[3].mxu0 }
 0x336   : > { %1400 = vrot.lane.b32.xlu0 %v1396_v25, %s2204_s24 }
 0x393   : > { %v1156_v27 = vpop.permute.xlu1 %1155 }
 0x394   : > { %1158 = vst.msk [vmem:[#allocation6] sm:$0x7] %vm692_vm11, %v1156_v27 }
 0x3a8   : > { %v1401_v28 = vpop.permute.xlu0 %1400 }
 0x3a9   : > { %1403 = vst.msk [vmem:[#allocation6] sm:$0x7] %vm709_vm12, %v1401_v28 }
 0x3b0   : > { %v1404_v38 = vld [vmem:[#allocation6] sm:$0x7] }
 0x3b1   : > { %1951 = vmatmul.mubr.msk.f32.vlgmr.msra.gmra.mrb[2].mxu1 %vm1429_vm0, %v1404_v38 }
 0x3b2   : > { %2098 = vmatpush1.bf16.msra.mxu1 %v2097_v34  ;;  %1568 = vmatprep.mubr.f32.mxu1 %v2201_v7 }
 0x3b3   : > { %2100 = vmatprep.subr.bf16.mxu1 %v2099_v35 }
 0x3b6   : > { %2102 = vmatpush1.bf16.msra.mxu1 %v2101_v42 }
 0x3b7   : > { %2104 = vmatprep.subr.bf16.mxu1 %v2103_v43 }
 0x3ba   : > { %2106 = vmatpush1.bf16.msra.mxu1 %v2105_v46 }
 0x3bd   : > { %1952 = vmatmul.mubr.msk.f32.vlgmr.msra.gmra.mrb[4].mxu1 %vm1429_vm0, %v1404_v38 }
 0x3be   : > { %1669 = vmatprep.mubr.f32.mxu1 %v2201_v7 }
 0x484   : > { %v1499_v47 = vpop.f32.mrb[2].mxu1 }
 0x485   : > { %v1501_v48 = vpop.f32.mrb[3].mxu1 }
 0x486   : > { %1953 = vmatprep.subr.msk.mxu1 %vm1592_vm4, %v1501_v48 }
 0x487   : > { %1954 = vmatpush1.msk.msra.mxu1 %vm1592_vm4, %v1499_v47 }
 0x488   : > { %1955 = vmatmul.mubr.msk.f32.vlgmr.msra.gmra.mrb[6].mxu1 %vm1579_vm5, %v1575_v49 }
 0x489   : > { %1675 = vmatprep.mubr.f32.mxu1 %v2201_v7 }
 0x48c   : > { %1956 = vmatmul.mubr.msk.f32.gmra.mrb[8].mxu1 %vm1579_vm5, %v1576_v50 }
 0x48d   : > { %1681 = vmatprep.mubr.f32.mxu1 %v2201_v7 }
 0x490   : > { %v1570_v52 = vpop.f32.mrb[4].mxu1  ;;  %1957 = vmatmul.mubr.msk.f32.gmra.mrb[10].mxu1 %vm1579_vm5, %v1577_v51 }
 0x491   : > { %v1572_v53 = vpop.f32.mrb[5].mxu1  ;;  %1687 = vmatprep.mubr.f32.mxu1 %v2201_v7 }
 0x492   : > { %1959 = vmatprep.subr.msk.mxu0 %vm1592_vm4, %v1572_v53  ;;  %2125 = vmatprep.subr.msk.mxu1 %vm1592_vm4, %v1572_v53 }
 0x493   : > { %1960 = vmatpush1.msk.msra.mxu0 %vm1592_vm4, %v1570_v52  ;;  %2126 = vmatpush1.msk.msra.mxu1 %vm1592_vm4, %v1570_v52 }
 0x494   : > { %1961 = vmatmul.mubr.msk.f32.vlgmr.msra.gmra.mrb[4].mxu0 %vm1579_vm5, %v1575_v49  ;;  %1958 = vmatmul.mubr.msk.f32.gmra.mrb[12].mxu1 %vm1579_vm5, %v1578_v3 }
 0x495   : > { %1764 = vmatprep.mubr.f32.mxu0 %v2201_v7  ;;  %1776 = vmatprep.mubr.f32.mxu1 %v2201_v7 }
 0x498   : > { %1962 = vmatmul.mubr.msk.f32.gmra.mrb[6].mxu0 %vm1579_vm5, %v1576_v50  ;;  %1964 = vmatmul.mubr.msk.f32.vlgmr.msra.gmra.mrb[14].mxu1 %vm1579_vm5, %v1578_v3 }
 0x499   : > { %1770 = vmatprep.mubr.f32.mxu0 %v2201_v7 }
 0x49c   : > { %1963 = vmatmul.mubr.msk.f32.gmra.mrb[8].mxu0 %vm1579_vm5, %v1577_v51 }
 0x55b   : > { %v1671_v54 = vpop.f32.mrb[6].mxu1 }
 0x55c   : > { %1783 = vst [vmem:[%s2276_s17] sm:$0xff] %v1671_v54  ;;  %v1673_v55 = vpop.f32.mrb[7].mxu1 }
 0x55d   : > { %1784 = vst [vmem:[%s2276_s17 + $0x8] sm:$0xff] %v1673_v55 }
 0x55f   : > { %v1677_v14 = vpop.f32.mrb[8].mxu1 }
 0x560   : > { %1787 = vst [vmem:[%s2276_s17 + $0x20] sm:$0xff] %v1677_v14  ;;  %v1679_v33 = vpop.f32.mrb[9].mxu1 }
 0x561   : > { %1788 = vst [vmem:[%s2276_s17 + $0x28] sm:$0xff] %v1679_v33 }
 0x563   : > { %v1683_v39 = vpop.f32.mrb[10].mxu1 }
 0x564   : > { %1791 = vst [vmem:[%s2276_s17 + $0x40] sm:$0xff] %v1683_v39  ;;  %v1685_v56 = vpop.f32.mrb[11].mxu1 }
 0x565   : > { %1792 = vst [vmem:[%s2276_s17 + $0x48] sm:$0xff] %v1685_v56 }
 0x567   : > { %v1760_v7 = vpop.f32.mrb[4].mxu0  ;;  %v1689_v57 = vpop.f32.mrb[12].mxu1 }
 0x568   : > { %1785 = vst [vmem:[%s2276_s17 + $0x10] sm:$0xff] %v1760_v7  ;;  %v1762_v58 = vpop.f32.mrb[5].mxu0  ;;  %1795 = vst [vmem:[%s2276_s17 + $0x60] sm:$0xff] %v1689_v57  ;;  %v1691_v59 = vpop.f32.mrb[13].mxu1 }
 0x569   : > { %1786 = vst [vmem:[%s2276_s17 + $0x18] sm:$0xff] %v1762_v58  ;;  %1796 = vst [vmem:[%s2276_s17 + $0x68] sm:$0xff] %v1691_v59 }
 0x56b   : > { %v1766_v60 = vpop.f32.mrb[6].mxu0  ;;  %v1778_v61 = vpop.f32.mrb[14].mxu1 }
 0x56c   : > { %1789 = vst [vmem:[%s2276_s17 + $0x30] sm:$0xff] %v1766_v60  ;;  %v1768_v2 = vpop.f32.mrb[7].mxu0  ;;  %1797 = vst [vmem:[%s2276_s17 + $0x70] sm:$0xff] %v1778_v61  ;;  %v1780_v62 = vpop.f32.mrb[15].mxu1 }
 0x56d   : > { %1790 = vst [vmem:[%s2276_s17 + $0x38] sm:$0xff] %v1768_v2  ;;  %1798 = vst [vmem:[%s2276_s17 + $0x78] sm:$0xff] %v1780_v62 }
 0x56f   : > { %v1772_v63 = vpop.f32.mrb[8].mxu0 }
 0x570   : > { %1793 = vst [vmem:[%s2276_s17 + $0x50] sm:$0xff] %v1772_v63  ;;  %v1774_v0 = vpop.f32.mrb[9].mxu0 }
 0x571   : > { %1794 = vst [vmem:[%s2276_s17 + $0x58] sm:$0xff] %v1774_v0 }
 0x572 PF: > { %s18_s27 = sadd.s32 1, %s2183_s27  }
 0x573   : > { %p15_p6 = scmp.ge.s32.totalorder %s18_s27, 4  }
 0x575   :  { %17 = sbr.rel (!%p15_p6) target bundleno = 1 (0x1), region = 132 }

</bundles_post_ra>
